<compile_context>
chip_gen: v7x
topology: tpu7x:2x2x1
jax: 0.10.0
libtpu: 0.0.40
codegen_flags: <defaults>
</compile_context>

<pallas_src>
import functools

import jax
import jax.numpy as jnp
import numpy as np
from jax import lax
from jax.experimental import pallas as pl
from jax.experimental.pallas import tpu as pltpu


EDGE_TILE = 1024   # max edge rows per grid step (multiple of 128)
NODE_TILE = 256    # max node rows per grid step (multiple of 8)


# ----------------------------- shared helpers -----------------------------

def _silu(x):
    return x * jax.nn.sigmoid(x)


def _layernorm(x, gamma, beta, eps=1e-5):
    mean = jnp.mean(x, axis=-1, keepdims=True)
    var = jnp.mean(jnp.square(x - mean), axis=-1, keepdims=True)
    return (x - mean) * lax.rsqrt(var + eps) * gamma + beta


def _cdiv(a, b):
    return -(-a // b)


def _round_up(a, b):
    return _cdiv(a, b) * b


def _vmem_limit_bytes():
    """Generation-aware VMEM limit: ~3/4 of physical, in [32 MiB, 96 MiB]."""
    try:
        cap = int(pltpu.get_tpu_info().vmem_capacity_bytes)
    except Exception:
        cap = 64 * 1024 * 1024
    return int(max(32 * 1024 * 1024, min(cap * 3 // 4, 96 * 1024 * 1024)))


# ------------------------------- Pallas kernels -------------------------------

def edge_kernel(i_ref, j_ref, ea_ref, xw1ab_ref,
                w1c_ref, b1_ref, w2_ref, b2_ref, w3_ref, b3_ref,
                g_ref, be_ref, out_ref, out_bf16_ref):
    te = ea_ref.shape[0]
    two_n = xw1ab_ref.shape[0]
    n = two_n // 2

    # Fused one-hot row gather of the pre-projected node features on the MXU:
    # one K = 2N matmul computes (x @ W1a)[i] + (x @ W1b)[j].  One-hots are exact in bf16.
    iota2 = lax.broadcasted_iota(jnp.int32, (te, two_n), 1)
    i = i_ref[...]                                   # (te, 1)
    j = j_ref[...]                                   # (te, 1)
    oh = ((iota2 == i) | (iota2 == (j + n))).astype(jnp.bfloat16)       # (te, 2N)
    gij = jnp.dot(oh, xw1ab_ref[...], preferred_element_type=jnp.float32)

    e = ea_ref[...]                                  # f32 (te, De)
    # concat([x_i, x_j, e]) @ W1 == x_i@W1a + x_j@W1b + e@W1c (no concat materialized).
    h = gij + jnp.dot(e.astype(jnp.bfloat16), w1c_ref[...],
                      preferred_element_type=jnp.float32) + b1_ref[...]
    h = _silu(h)
    h = _silu(jnp.dot(h.astype(jnp.bfloat16), w2_ref[...],
                      preferred_element_type=jnp.float32) + b2_ref[...])
    h = jnp.dot(h.astype(jnp.bfloat16), w3_ref[...],
                preferred_element_type=jnp.float32) + b3_ref[...]
    h = _layernorm(h, g_ref[...], be_ref[...])
    e_new = e + h
    out_ref[...] = e_new                             # f32 result (returned to caller)
    out_bf16_ref[...] = e_new.astype(jnp.bfloat16)   # bf16 stream for the node kernel


def node_kernel(j_ref, ea_ref, x_ref,
                w1_ref, b1_ref, w2_ref, b2_ref, w3_ref, b3_ref,
                g_ref, be_ref, out_ref, agg_ref, *, n_edges):
    k = pl.program_id(1)
    tn = agg_ref.shape[0]
    te = ea_ref.shape[0]

    @pl.when(k == 0)
    def _():
        agg_ref[...] = jnp.zeros_like(agg_ref)

    # Mask the (possibly partial / garbage) tail edge rows to exact zero so they add nothing
    # (and cannot poison the accumulation with NaN/inf from uninitialized VMEM).
    e_local = lax.broadcasted_iota(jnp.int32, (te, 1), 0)
    valid = (k * te + e_local) < n_edges
    ea = jnp.where(valid, ea_ref[...], jnp.zeros_like(ea_ref[...]))     # bf16 (te, De)

    # scatter-add over target index j as a per-tile one-hot matmul (bf16 in, f32 acc):
    # agg[n, d] += sum_e [j[e] == n] * e'[e, d]
    node_ids = pl.program_id(0) * tn + lax.broadcasted_iota(jnp.int32, (tn, te), 0)
    oh = (node_ids == j_ref[...]).astype(jnp.bfloat16)                  # (tn, te)
    agg_ref[...] += jnp.dot(oh, ea, preferred_element_type=jnp.float32)

    @pl.when(k == pl.num_programs(1) - 1)
    def _():
        xt = x_ref[...]                                                 # f32 (tn, Dn)
        # concat([x, agg]) @ W1 as ONE K = Dn+De matmul (fills the 256-wide MXU K dim).
        xin = jnp.concatenate(
            [xt.astype(jnp.bfloat16), agg_ref[...].astype(jnp.bfloat16)], axis=-1)
        h = jnp.dot(xin, w1_ref[...], preferred_element_type=jnp.float32) + b1_ref[...]
        h = _silu(h)
        h = _silu(jnp.dot(h.astype(jnp.bfloat16), w2_ref[...],
                          preferred_element_type=jnp.float32) + b2_ref[...])
        h = jnp.dot(h.astype(jnp.bfloat16), w3_ref[...],
                    preferred_element_type=jnp.float32) + b3_ref[...]
        h = _layernorm(h, g_ref[...], be_ref[...])
        out_ref[...] = xt + h


# ------------------------------- host wrapper ---------------------------------

def init_params(key, node_dim, edge_dim):
    """Deterministic synthetic parameters. Weights stored as (in, out)."""
    keys = jax.random.split(key, 6)
    e_in = 2 * node_dim + edge_dim
    n_in = node_dim + edge_dim

    def lin(k, fan_in, fan_out):
        scale = 1.0 / jnp.sqrt(jnp.float32(fan_in))
        kw, kb = jax.random.split(k)
        w = jax.random.uniform(kw, (fan_in, fan_out), jnp.float32, -scale, scale)
        b = jax.random.uniform(kb, (1, fan_out), jnp.float32, -scale, scale)
        return w, b

    p = {}
    p["e_w1"], p["e_b1"] = lin(keys[0], e_in, edge_dim)
    p["e_w2"], p["e_b2"] = lin(keys[1], edge_dim, edge_dim)
    p["e_w3"], p["e_b3"] = lin(keys[2], edge_dim, edge_dim)
    p["e_gamma"] = jnp.ones((1, edge_dim), jnp.float32)
    p["e_beta"] = jnp.zeros((1, edge_dim), jnp.float32)

    p["n_w1"], p["n_b1"] = lin(keys[3], n_in, node_dim)
    p["n_w2"], p["n_b2"] = lin(keys[4], node_dim, node_dim)
    p["n_w3"], p["n_b3"] = lin(keys[5], node_dim, node_dim)
    p["n_gamma"] = jnp.ones((1, node_dim), jnp.float32)
    p["n_beta"] = jnp.zeros((1, node_dim), jnp.float32)
    return p


def mesh_graph_nets_conv(x, edge_index, edge_attr, params,
                         *, edge_tile=None, node_tile=None):
    """Forward pass of MeshGraphNetsConv. Returns (x_new, edge_attr_new)."""
    N, Dn = x.shape
    E, De = edge_attr.shape

    # Tile selection: as large as practical, but keep >=2 steps on each "parallel" axis
    # so both v7x TensorCores get work; clamp down for small demo graphs.
    if edge_tile is None:
        edge_tile = min(EDGE_TILE, max(128, _round_up(_cdiv(E, 2), 128)))
    if node_tile is None:
        node_tile = min(NODE_TILE, max(8, _round_up(_cdiv(N, 2), 8)))
    e_grid = _cdiv(E, edge_tile)
    n_grid = _cdiv(N, node_tile)

    vmem_limit = _vmem_limit_bytes()

    i_col = edge_index[0].astype(jnp.int32).reshape(E, 1)
    j_col = edge_index[1].astype(jnp.int32).reshape(E, 1)
    j_row = edge_index[1].astype(jnp.int32).reshape(1, E)

    def resident(arr):   # VMEM-resident operand (same block every grid step)
        return pl.BlockSpec(arr.shape, lambda *_: (0, 0))
    # (pl.Buffered(1) on these resident specs would halve their VMEM footprint on v7x;
    #  left at the default buffering for portability.)

    # ---------------------------- edge processor ----------------------------
    e_w1 = params["e_w1"]                                   # (2*Dn + De, De)
    w1a, w1b, w1c = e_w1[:Dn], e_w1[Dn:2 * Dn], e_w1[2 * Dn:]
    # project-then-gather: (x @ W1a)[i] == x[i] @ W1a, but N*Dn*De work instead of E*Dn*De.
    xw1ab = jnp.concatenate([x @ w1a, x @ w1b], axis=0).astype(jnp.bfloat16)   # (2N, De)
    w1c_bf = w1c.astype(jnp.bfloat16)
    e_w2_bf = params["e_w2"].astype(jnp.bfloat16)
    e_w3_bf = params["e_w3"].astype(jnp.bfloat16)

    edge_cost = pl.CostEstimate(
        flops=int(2 * E * (2 * N + 3 * De) * De),
        transcendentals=int(2 * E * De),
        bytes_accessed=int(4 * E * De + 4 * E * De + 2 * E * De
                           + 2 * 2 * N * De + 8 * E + 4 * 3 * De * De),
    )

    edge_new_f32, edge_new_bf16 = pl.pallas_call(
        edge_kernel,
        out_shape=(jax.ShapeDtypeStruct((E, De), jnp.float32),
                   jax.ShapeDtypeStruct((E, De), jnp.bfloat16)),
        grid_spec=pltpu.PrefetchScalarGridSpec(
            num_scalar_prefetch=0,
            grid=(e_grid,),
            in_specs=[
                pl.BlockSpec((edge_tile, 1), lambda e: (e, 0)),      # i
                pl.BlockSpec((edge_tile, 1), lambda e: (e, 0)),      # j
                pl.BlockSpec((edge_tile, De), lambda e: (e, 0)),     # edge_attr tile (f32)
                resident(xw1ab), resident(w1c_bf), resident(params["e_b1"]),
                resident(e_w2_bf), resident(params["e_b2"]),
                resident(e_w3_bf), resident(params["e_b3"]),
                resident(params["e_gamma"]), resident(params["e_beta"]),
            ],
            out_specs=(pl.BlockSpec((edge_tile, De), lambda e: (e, 0)),
                       pl.BlockSpec((edge_tile, De), lambda e: (e, 0))),
        ),
        compiler_params=pltpu.CompilerParams(
            dimension_semantics=("parallel",),
            vmem_limit_bytes=vmem_limit,
        ),
        cost_estimate=edge_cost,
    )(i_col, j_col, edge_attr, xw1ab, w1c_bf, params["e_b1"],
      e_w2_bf, params["e_b2"], e_w3_bf, params["e_b3"],
      params["e_gamma"], params["e_beta"])

    # ---------------------------- node processor ----------------------------
    n_w1_bf = params["n_w1"].astype(jnp.bfloat16)           # (Dn + De, Dn), stacked [W1a; W1b]
    n_w2_bf = params["n_w2"].astype(jnp.bfloat16)
    n_w3_bf = params["n_w3"].astype(jnp.bfloat16)

    node_cost = pl.CostEstimate(
        flops=int(2 * n_grid * node_tile * e_grid * edge_tile * De
                  + 2 * N * ((Dn + De) * Dn + 2 * Dn * Dn)),
        transcendentals=int(2 * N * Dn),
        bytes_accessed=int(n_grid * 2 * E * De + 4 * 2 * N * Dn
                           + n_grid * 4 * E + 2 * ((Dn + De) * Dn + 2 * Dn * Dn)),
    )

    x_new = pl.pallas_call(
        functools.partial(node_kernel, n_edges=E),
        out_shape=jax.ShapeDtypeStruct((N, Dn), jnp.float32),
        grid_spec=pltpu.PrefetchScalarGridSpec(
            num_scalar_prefetch=0,
            grid=(n_grid, e_grid),                                  # scatter/reduction axis last
            in_specs=[
                pl.BlockSpec((1, edge_tile), lambda n, k: (0, k)),  # j (lane-dense)
                pl.BlockSpec((edge_tile, De), lambda n, k: (k, 0)), # e' tile (bf16 stream)
                pl.BlockSpec((node_tile, Dn), lambda n, k: (n, 0)), # x tile
                resident(n_w1_bf), resident(params["n_b1"]),
                resident(n_w2_bf), resident(params["n_b2"]),
                resident(n_w3_bf), resident(params["n_b3"]),
                resident(params["n_gamma"]), resident(params["n_beta"]),
            ],
            out_specs=pl.BlockSpec((node_tile, Dn), lambda n, k: (n, 0)),
            scratch_shapes=[pltpu.VMEM((node_tile, De), jnp.float32)],
        ),
        compiler_params=pltpu.CompilerParams(
            dimension_semantics=("parallel", "arbitrary"),
            vmem_limit_bytes=vmem_limit,
        ),
        cost_estimate=node_cost,
    )(j_row, edge_new_bf16, x, n_w1_bf, params["n_b1"],
      n_w2_bf, params["n_b2"], n_w3_bf, params["n_b3"],
      params["n_gamma"], params["n_beta"])

    return x_new, edge_new_f32


# ------------------------------- pure-JAX reference -------------------------------

def reference_forward(x, edge_index, edge_attr, params):
    hp = lax.Precision.HIGHEST

    def mlp_ln(h, w1, b1, w2, b2, w3, b3, g, b):
        h = _silu(jnp.dot(h, w1, precision=hp) + b1)
        h = _silu(jnp.dot(h, w2, precision=hp) + b2)
        h = jnp.dot(h, w3, precision=hp) + b3
        return _layernorm(h, g, b)

    i, j = edge_index[0], edge_index[1]
    e_in = jnp.concatenate([x[i], x[j], edge_attr], axis=-1)
    e_new = edge_attr + mlp_ln(e_in, params["e_w1"], params["e_b1"], params["e_w2"],
                               params["e_b2"], params["e_w3"], params["e_b3"],
                               params["e_gamma"], params["e_beta"])
    agg = jnp.zeros((x.shape[0], e_new.shape[1]), e_new.dtype).at[j].add(e_new)
    n_in = jnp.concatenate([x, agg], axis=-1)
    x_new = x + mlp_ln(n_in, params["n_w1"], params["n_b1"], params["n_w2"],
                       params["n_b2"], params["n_w3"], params["n_b3"],
                       params["n_gamma"], params["n_beta"])
    return x_new, e_new


# ----------------------------------- main --------------------------------------

if __name__ == "__main__":
    node_dim = 128     # MGN paper latent size; keeps the feature (lane) axis dense
    edge_dim = 128
    num_nodes = 48
    num_edges = 160

    key = jax.random.PRNGKey(0)
    k_x, k_e, k_src, k_dst, k_p = jax.random.split(key, 5)

    x = jax.random.normal(k_x, (num_nodes, node_dim), jnp.float32)
    edge_attr = jax.random.normal(k_e, (num_edges, edge_dim), jnp.float32)
    src = jax.random.randint(k_src, (num_edges,), 0, num_nodes, jnp.int32)
    dst = jax.random.randint(k_dst, (num_edges,), 0, num_nodes, jnp.int32)
    edge_index = jnp.stack([src, dst], axis=0)

    params = init_params(k_p, node_dim, edge_dim)

    fwd = jax.jit(mesh_graph_nets_conv)
    x_new, edge_attr_new = fwd(x, edge_index, edge_attr, params)
    jax.block_until_ready((x_new, edge_attr_new))

    assert x_new.shape == (num_nodes, node_dim)
    assert edge_attr_new.shape == (num_edges, edge_dim)

    # Correctness check against the pure-f32 (HIGHEST precision) reference. The kernels run
    # the gather/scatter one-hots and all MLP matmuls in bf16 with f32 accumulation, so
    # compare with a correspondingly loose tolerance — real plumbing bugs would be O(1).
    x_ref, e_ref = reference_forward(x, edge_index, edge_attr, params)
    np.testing.assert_allclose(np.asarray(edge_attr_new), np.asarray(e_ref), rtol=0.1, atol=0.1)
    np.testing.assert_allclose(np.asarray(x_new), np.asarray(x_ref), rtol=0.1, atol=0.1)

    print("KERNEL_OK")
</pallas_src>

<mosaic_0001>
module attributes {stable_mosaic.version = 11 : i64} {
  func.func @edge_kernel(%arg0: i32, %arg1: memref<128x1xi32, #tpu.memory_space<vmem>>, %arg2: memref<128x1xi32, #tpu.memory_space<vmem>>, %arg3: memref<128x128xf32, #tpu.memory_space<vmem>>, %arg4: memref<96x128xbf16, #tpu.memory_space<vmem>>, %arg5: memref<128x128xbf16, #tpu.memory_space<vmem>>, %arg6: memref<1x128xf32, #tpu.memory_space<vmem>>, %arg7: memref<128x128xbf16, #tpu.memory_space<vmem>>, %arg8: memref<1x128xf32, #tpu.memory_space<vmem>>, %arg9: memref<128x128xbf16, #tpu.memory_space<vmem>>, %arg10: memref<1x128xf32, #tpu.memory_space<vmem>>, %arg11: memref<1x128xf32, #tpu.memory_space<vmem>>, %arg12: memref<1x128xf32, #tpu.memory_space<vmem>>, %arg13: memref<128x128xf32, #tpu.memory_space<vmem>>, %arg14: memref<128x128xbf16, #tpu.memory_space<vmem>>) attributes {dimension_semantics = [#tpu.dimension_semantics<parallel>], iteration_bounds = array<i64: 2>, scalar_prefetch = 0 : i64, scratch_operands = 0 : i64, tpu.core_type = #tpu.core_type<tc>, window_params = [{transform_indices = @transform_0, window_bounds = array<i64: 128, 1>}, {transform_indices = @transform_1, window_bounds = array<i64: 128, 1>}, {transform_indices = @transform_2, window_bounds = array<i64: 128, 128>}, {pipeline_mode = #tpu.pipeline_mode<synchronous>, transform_indices = @transform_3, window_bounds = array<i64: 96, 128>}, {pipeline_mode = #tpu.pipeline_mode<synchronous>, transform_indices = @transform_4, window_bounds = array<i64: 128, 128>}, {pipeline_mode = #tpu.pipeline_mode<synchronous>, transform_indices = @transform_5, window_bounds = array<i64: 1, 128>}, {pipeline_mode = #tpu.pipeline_mode<synchronous>, transform_indices = @transform_6, window_bounds = array<i64: 128, 128>}, {pipeline_mode = #tpu.pipeline_mode<synchronous>, transform_indices = @transform_7, window_bounds = array<i64: 1, 128>}, {pipeline_mode = #tpu.pipeline_mode<synchronous>, transform_indices = @transform_8, window_bounds = array<i64: 128, 128>}, {pipeline_mode = #tpu.pipeline_mode<synchronous>, transform_indices = @transform_9, window_bounds = array<i64: 1, 128>}, {pipeline_mode = #tpu.pipeline_mode<synchronous>, transform_indices = @transform_10, window_bounds = array<i64: 1, 128>}, {pipeline_mode = #tpu.pipeline_mode<synchronous>, transform_indices = @transform_11, window_bounds = array<i64: 1, 128>}, {transform_indices = @transform_12, window_bounds = array<i64: 128, 128>}, {transform_indices = @transform_13, window_bounds = array<i64: 128, 128>}]} {
    %0 = tpu.iota {dimensions = array<i32: 1>} : vector<128x96xi32>
    %c0 = arith.constant 0 : index
    %c0_0 = arith.constant 0 : index
    %1 = vector.load %arg1[%c0, %c0_0] : memref<128x1xi32, #tpu.memory_space<vmem>>, vector<128x1xi32>
    %c0_1 = arith.constant 0 : index
    %c0_2 = arith.constant 0 : index
    %2 = vector.load %arg2[%c0_1, %c0_2] : memref<128x1xi32, #tpu.memory_space<vmem>>, vector<128x1xi32>
    %3 = vector.broadcast %1 : vector<128x1xi32> to vector<128x96xi32>
    %4 = arith.cmpi eq, %0, %3 : vector<128x96xi32>
    %c48_i32 = arith.constant 48 : i32
    %5 = vector.broadcast %c48_i32 : i32 to vector<128x1xi32>
    %6 = arith.addi %2, %5 : vector<128x1xi32>
    %7 = vector.broadcast %6 : vector<128x1xi32> to vector<128x96xi32>
    %8 = arith.cmpi eq, %0, %7 : vector<128x96xi32>
    %9 = arith.ori %4, %8 : vector<128x96xi1>
    %10 = arith.extui %9 : vector<128x96xi1> to vector<128x96xi32>
    %11 = arith.sitofp %10 : vector<128x96xi32> to vector<128x96xf32>
    %12 = arith.truncf %11 : vector<128x96xf32> to vector<128x96xbf16>
    %c0_3 = arith.constant 0 : index
    %c0_4 = arith.constant 0 : index
    %13 = vector.load %arg4[%c0_3, %c0_4] : memref<96x128xbf16, #tpu.memory_space<vmem>>, vector<96x128xbf16>
    %cst = arith.constant dense<0.000000e+00> : vector<128x128xf32>
    %14 = tpu.matmul %12, %13, %cst {dimension_numbers = #tpu.dot_dimension_numbers<[1], [0], [0], [1], [0, 0, 1, 1], [], []>} : vector<128x96xbf16>, vector<96x128xbf16>, vector<128x128xf32> -> vector<128x128xf32>
    %c0_5 = arith.constant 0 : index
    %c0_6 = arith.constant 0 : index
    %15 = vector.load %arg3[%c0_5, %c0_6] : memref<128x128xf32, #tpu.memory_space<vmem>>, vector<128x128xf32>
    %16 = arith.truncf %15 : vector<128x128xf32> to vector<128x128xbf16>
    %c0_7 = arith.constant 0 : index
    %c0_8 = arith.constant 0 : index
    %17 = vector.load %arg5[%c0_7, %c0_8] : memref<128x128xbf16, #tpu.memory_space<vmem>>, vector<128x128xbf16>
    %cst_9 = arith.constant dense<0.000000e+00> : vector<128x128xf32>
    %18 = tpu.matmul %16, %17, %cst_9 {dimension_numbers = #tpu.dot_dimension_numbers<[1], [0], [0], [1], [0, 0, 1, 1], [], []>} : vector<128x128xbf16>, vector<128x128xbf16>, vector<128x128xf32> -> vector<128x128xf32>
    %19 = arith.addf %14, %18 : vector<128x128xf32>
    %c0_10 = arith.constant 0 : index
    %c0_11 = arith.constant 0 : index
    %20 = vector.load %arg6[%c0_10, %c0_11] : memref<1x128xf32, #tpu.memory_space<vmem>>, vector<1x128xf32>
    %21 = vector.broadcast %20 : vector<1x128xf32> to vector<128x128xf32>
    %22 = arith.addf %19, %21 : vector<128x128xf32>
    %23 = arith.negf %22 : vector<128x128xf32>
    %24 = math.exp %23 : vector<128x128xf32>
    %cst_12 = arith.constant 1.000000e+00 : f32
    %25 = vector.broadcast %cst_12 : f32 to vector<128x128xf32>
    %26 = arith.addf %25, %24 : vector<128x128xf32>
    %27 = arith.divf %25, %26 : vector<128x128xf32>
    %28 = arith.mulf %22, %27 : vector<128x128xf32>
    %29 = arith.truncf %28 : vector<128x128xf32> to vector<128x128xbf16>
    %c0_13 = arith.constant 0 : index
    %c0_14 = arith.constant 0 : index
    %30 = vector.load %arg7[%c0_13, %c0_14] : memref<128x128xbf16, #tpu.memory_space<vmem>>, vector<128x128xbf16>
    %cst_15 = arith.constant dense<0.000000e+00> : vector<128x128xf32>
    %31 = tpu.matmul %29, %30, %cst_15 {dimension_numbers = #tpu.dot_dimension_numbers<[1], [0], [0], [1], [0, 0, 1, 1], [], []>} : vector<128x128xbf16>, vector<128x128xbf16>, vector<128x128xf32> -> vector<128x128xf32>
    %c0_16 = arith.constant 0 : index
    %c0_17 = arith.constant 0 : index
    %32 = vector.load %arg8[%c0_16, %c0_17] : memref<1x128xf32, #tpu.memory_space<vmem>>, vector<1x128xf32>
    %33 = vector.broadcast %32 : vector<1x128xf32> to vector<128x128xf32>
    %34 = arith.addf %31, %33 : vector<128x128xf32>
    %35 = arith.negf %34 : vector<128x128xf32>
    %36 = math.exp %35 : vector<128x128xf32>
    %cst_18 = arith.constant 1.000000e+00 : f32
    %37 = vector.broadcast %cst_18 : f32 to vector<128x128xf32>
    %38 = arith.addf %37, %36 : vector<128x128xf32>
    %39 = arith.divf %37, %38 : vector<128x128xf32>
    %40 = arith.mulf %34, %39 : vector<128x128xf32>
    %41 = arith.truncf %40 : vector<128x128xf32> to vector<128x128xbf16>
    %c0_19 = arith.constant 0 : index
    %c0_20 = arith.constant 0 : index
    %42 = vector.load %arg9[%c0_19, %c0_20] : memref<128x128xbf16, #tpu.memory_space<vmem>>, vector<128x128xbf16>
    %cst_21 = arith.constant dense<0.000000e+00> : vector<128x128xf32>
    %43 = tpu.matmul %41, %42, %cst_21 {dimension_numbers = #tpu.dot_dimension_numbers<[1], [0], [0], [1], [0, 0, 1, 1], [], []>} : vector<128x128xbf16>, vector<128x128xbf16>, vector<128x128xf32> -> vector<128x128xf32>
    %c0_22 = arith.constant 0 : index
    %c0_23 = arith.constant 0 : index
    %44 = vector.load %arg10[%c0_22, %c0_23] : memref<1x128xf32, #tpu.memory_space<vmem>>, vector<1x128xf32>
    %45 = vector.broadcast %44 : vector<1x128xf32> to vector<128x128xf32>
    %46 = arith.addf %43, %45 : vector<128x128xf32>
    %c0_24 = arith.constant 0 : index
    %c0_25 = arith.constant 0 : index
    %47 = vector.load %arg11[%c0_24, %c0_25] : memref<1x128xf32, #tpu.memory_space<vmem>>, vector<1x128xf32>
    %c0_26 = arith.constant 0 : index
    %c0_27 = arith.constant 0 : index
    %48 = vector.load %arg12[%c0_26, %c0_27] : memref<1x128xf32, #tpu.memory_space<vmem>>, vector<1x128xf32>
    %cst_28 = arith.constant dense<0.000000e+00> : vector<128xf32>
    %49 = vector.multi_reduction <add>, %46, %cst_28 [1] : vector<128x128xf32> to vector<128xf32>
    %50 = vector.shape_cast %49 : vector<128xf32> to vector<128x1xf32>
    %cst_29 = arith.constant 1.280000e+02 : f32
    %51 = vector.broadcast %cst_29 : f32 to vector<128x1xf32>
    %52 = arith.divf %50, %51 : vector<128x1xf32>
    %53 = vector.broadcast %52 : vector<128x1xf32> to vector<128x128xf32>
    %54 = arith.subf %46, %53 : vector<128x128xf32>
    %55 = arith.mulf %54, %54 : vector<128x128xf32>
    %cst_30 = arith.constant dense<0.000000e+00> : vector<128xf32>
    %56 = vector.multi_reduction <add>, %55, %cst_30 [1] : vector<128x128xf32> to vector<128xf32>
    %57 = vector.shape_cast %56 : vector<128xf32> to vector<128x1xf32>
    %cst_31 = arith.constant 1.280000e+02 : f32
    %58 = vector.broadcast %cst_31 : f32 to vector<128x1xf32>
    %59 = arith.divf %57, %58 : vector<128x1xf32>
    %60 = vector.broadcast %52 : vector<128x1xf32> to vector<128x128xf32>
    %61 = arith.subf %46, %60 : vector<128x128xf32>
    %cst_32 = arith.constant 9.99999974E-6 : f32
    %62 = vector.broadcast %cst_32 : f32 to vector<128x1xf32>
    %63 = arith.addf %59, %62 : vector<128x1xf32>
    %64 = math.rsqrt %63 : vector<128x1xf32>
    %65 = vector.broadcast %64 : vector<128x1xf32> to vector<128x128xf32>
    %66 = arith.mulf %61, %65 : vector<128x128xf32>
    %67 = vector.broadcast %47 : vector<1x128xf32> to vector<128x128xf32>
    %68 = arith.mulf %66, %67 : vector<128x128xf32>
    %69 = vector.broadcast %48 : vector<1x128xf32> to vector<128x128xf32>
    %70 = arith.addf %68, %69 : vector<128x128xf32>
    %71 = arith.addf %15, %70 : vector<128x128xf32>
    %c0_33 = arith.constant 0 : index
    %c0_34 = arith.constant 0 : index
    %72 = vector.load %arg13[%c0_33, %c0_34] : memref<128x128xf32, #tpu.memory_space<vmem>>, vector<128x128xf32>
    tpu.vector_store %arg13[%c0_33, %c0_34], %71 {strides = array<i32>} : memref<128x128xf32, #tpu.memory_space<vmem>>, vector<128x128xf32>,
    %73 = arith.truncf %71 : vector<128x128xf32> to vector<128x128xbf16>
    %c0_35 = arith.constant 0 : index
    %c0_36 = arith.constant 0 : index
    %74 = vector.load %arg14[%c0_35, %c0_36] : memref<128x128xbf16, #tpu.memory_space<vmem>>, vector<128x128xbf16>
    tpu.vector_store %arg14[%c0_35, %c0_36], %73 {strides = array<i32>} : memref<128x128xbf16, #tpu.memory_space<vmem>>, vector<128x128xbf16>,
    return
  }
  func.func @transform_0(%arg0: i32) -> (i32, i32) {
    %c0_i32 = arith.constant 0 : i32
    %c0_i32_0 = arith.constant 0 : i32
    return %arg0, %c0_i32 : i32, i32
  }
  func.func @transform_1(%arg0: i32) -> (i32, i32) {
    %c0_i32 = arith.constant 0 : i32
    %c0_i32_0 = arith.constant 0 : i32
    return %arg0, %c0_i32 : i32, i32
  }
  func.func @transform_2(%arg0: i32) -> (i32, i32) {
    %c0_i32 = arith.constant 0 : i32
    %c0_i32_0 = arith.constant 0 : i32
    return %arg0, %c0_i32 : i32, i32
  }
  func.func @transform_3(%arg0: i32) -> (i32, i32) {
    %c0_i32 = arith.constant 0 : i32
    %c0_i32_0 = arith.constant 0 : i32
    %c0_i32_1 = arith.constant 0 : i32
    return %c0_i32, %c0_i32_0 : i32, i32
  }
  func.func @transform_4(%arg0: i32) -> (i32, i32) {
    %c0_i32 = arith.constant 0 : i32
    %c0_i32_0 = arith.constant 0 : i32
    %c0_i32_1 = arith.constant 0 : i32
    return %c0_i32, %c0_i32_0 : i32, i32
  }
  func.func @transform_5(%arg0: i32) -> (i32, i32) {
    %c0_i32 = arith.constant 0 : i32
    %c0_i32_0 = arith.constant 0 : i32
    %c0_i32_1 = arith.constant 0 : i32
    return %c0_i32, %c0_i32_0 : i32, i32
  }
  func.func @transform_6(%arg0: i32) -> (i32, i32) {
    %c0_i32 = arith.constant 0 : i32
    %c0_i32_0 = arith.constant 0 : i32
    %c0_i32_1 = arith.constant 0 : i32
    return %c0_i32, %c0_i32_0 : i32, i32
  }
  func.func @transform_7(%arg0: i32) -> (i32, i32) {
    %c0_i32 = arith.constant 0 : i32
    %c0_i32_0 = arith.constant 0 : i32
    %c0_i32_1 = arith.constant 0 : i32
    return %c0_i32, %c0_i32_0 : i32, i32
  }
  func.func @transform_8(%arg0: i32) -> (i32, i32) {
    %c0_i32 = arith.constant 0 : i32
    %c0_i32_0 = arith.constant 0 : i32
    %c0_i32_1 = arith.constant 0 : i32
    return %c0_i32, %c0_i32_0 : i32, i32
  }
  func.func @transform_9(%arg0: i32) -> (i32, i32) {
    %c0_i32 = arith.constant 0 : i32
    %c0_i32_0 = arith.constant 0 : i32
    %c0_i32_1 = arith.constant 0 : i32
    return %c0_i32, %c0_i32_0 : i32, i32
  }
  func.func @transform_10(%arg0: i32) -> (i32, i32) {
    %c0_i32 = arith.constant 0 : i32
    %c0_i32_0 = arith.constant 0 : i32
    %c0_i32_1 = arith.constant 0 : i32
    return %c0_i32, %c0_i32_0 : i32, i32
  }
  func.func @transform_11(%arg0: i32) -> (i32, i32) {
    %c0_i32 = arith.constant 0 : i32
    %c0_i32_0 = arith.constant 0 : i32
    %c0_i32_1 = arith.constant 0 : i32
    return %c0_i32, %c0_i32_0 : i32, i32
  }
  func.func @transform_12(%arg0: i32) -> (i32, i32) {
    %c0_i32 = arith.constant 0 : i32
    %c0_i32_0 = arith.constant 0 : i32
    return %arg0, %c0_i32 : i32, i32
  }
  func.func @transform_13(%arg0: i32) -> (i32, i32) {
    %c0_i32 = arith.constant 0 : i32
    %c0_i32_0 = arith.constant 0 : i32
    return %arg0, %c0_i32 : i32, i32
  }
}

module attributes {stable_mosaic.version = 11 : i64} {
  func.func @node_kernel(%arg0: i32, %arg1: i32, %arg2: memref<1x128xi32, #tpu.memory_space<vmem>>, %arg3: memref<128x128xbf16, #tpu.memory_space<vmem>>, %arg4: memref<24x128xf32, #tpu.memory_space<vmem>>, %arg5: memref<256x128xbf16, #tpu.memory_space<vmem>>, %arg6: memref<1x128xf32, #tpu.memory_space<vmem>>, %arg7: memref<128x128xbf16, #tpu.memory_space<vmem>>, %arg8: memref<1x128xf32, #tpu.memory_space<vmem>>, %arg9: memref<128x128xbf16, #tpu.memory_space<vmem>>, %arg10: memref<1x128xf32, #tpu.memory_space<vmem>>, %arg11: memref<1x128xf32, #tpu.memory_space<vmem>>, %arg12: memref<1x128xf32, #tpu.memory_space<vmem>>, %arg13: memref<24x128xf32, #tpu.memory_space<vmem>>, %arg14: memref<24x128xf32, #tpu.memory_space<vmem>>) attributes {dimension_semantics = [#tpu.dimension_semantics<parallel>, #tpu.dimension_semantics<arbitrary>], iteration_bounds = array<i64: 2, 2>, scalar_prefetch = 0 : i64, scratch_operands = 1 : i64, tpu.core_type = #tpu.core_type<tc>, window_params = [{transform_indices = @transform_0, window_bounds = array<i64: 1, 128>}, {transform_indices = @transform_1, window_bounds = array<i64: 128, 128>}, {transform_indices = @transform_2, window_bounds = array<i64: 24, 128>}, {pipeline_mode = #tpu.pipeline_mode<synchronous>, transform_indices = @transform_3, window_bounds = array<i64: 256, 128>}, {pipeline_mode = #tpu.pipeline_mode<synchronous>, transform_indices = @transform_4, window_bounds = array<i64: 1, 128>}, {pipeline_mode = #tpu.pipeline_mode<synchronous>, transform_indices = @transform_5, window_bounds = array<i64: 128, 128>}, {pipeline_mode = #tpu.pipeline_mode<synchronous>, transform_indices = @transform_6, window_bounds = array<i64: 1, 128>}, {pipeline_mode = #tpu.pipeline_mode<synchronous>, transform_indices = @transform_7, window_bounds = array<i64: 128, 128>}, {pipeline_mode = #tpu.pipeline_mode<synchronous>, transform_indices = @transform_8, window_bounds = array<i64: 1, 128>}, {pipeline_mode = #tpu.pipeline_mode<synchronous>, transform_indices = @transform_9, window_bounds = array<i64: 1, 128>}, {pipeline_mode = #tpu.pipeline_mode<synchronous>, transform_indices = @transform_10, window_bounds = array<i64: 1, 128>}, {transform_indices = @transform_11, window_bounds = array<i64: 24, 128>}]} {
    %c0_i32 = arith.constant 0 : i32
    %0 = arith.cmpi eq, %arg1, %c0_i32 : i32
    %1 = arith.extui %0 : i1 to i32
    %c0_i32_0 = arith.constant 0 : i32
    %2 = arith.cmpi ne, %1, %c0_i32_0 : i32
    scf.if %2 {
      %cst_10 = arith.constant 0.000000e+00 : f32
      %31 = vector.broadcast %cst_10 : f32 to vector<24x128xf32>
      %c0_11 = arith.constant 0 : index
      %c0_12 = arith.constant 0 : index
      %32 = vector.load %arg14[%c0_11, %c0_12] : memref<24x128xf32, #tpu.memory_space<vmem>>, vector<24x128xf32>
      tpu.vector_store %arg14[%c0_11, %c0_12], %31 {strides = array<i32>} : memref<24x128xf32, #tpu.memory_space<vmem>>, vector<24x128xf32>,
    } else {
    }
    %3 = tpu.iota {dimensions = array<i32: 0>} : vector<128x1xi32>
    %c128_i32 = arith.constant 128 : i32
    %4 = arith.muli %arg1, %c128_i32 : i32
    %5 = vector.broadcast %4 : i32 to vector<128x1xi32>
    %6 = arith.addi %5, %3 : vector<128x1xi32>
    %c160_i32 = arith.constant 160 : i32
    %7 = vector.broadcast %c160_i32 : i32 to vector<128x1xi32>
    %8 = arith.cmpi slt, %6, %7 : vector<128x1xi32>
    %c0 = arith.constant 0 : index
    %c0_1 = arith.constant 0 : index
    %9 = vector.load %arg3[%c0, %c0_1] : memref<128x128xbf16, #tpu.memory_space<vmem>>, vector<128x128xbf16>
    %cst = arith.constant 0.000000e+00 : bf16
    %10 = vector.broadcast %cst : bf16 to vector<128x128xbf16>
    %11 = vector.shape_cast %8 : vector<128x1xi1> to vector<128x1xi1>
    %12 = vector.broadcast %11 : vector<128x1xi1> to vector<128x128xi1>
    %13 = arith.select %12, %9, %10 : vector<128x128xi1>, vector<128x128xbf16>
    %c24_i32 = arith.constant 24 : i32
    %14 = arith.muli %arg0, %c24_i32 : i32
    %15 = tpu.iota {dimensions = array<i32: 0>} : vector<24x128xi32>
    %16 = vector.broadcast %14 : i32 to vector<24x128xi32>
    %17 = arith.addi %16, %15 : vector<24x128xi32>
    %c0_2 = arith.constant 0 : index
    %c0_3 = arith.constant 0 : index
    %18 = vector.load %arg2[%c0_2, %c0_3] : memref<1x128xi32, #tpu.memory_space<vmem>>, vector<1x128xi32>
    %19 = vector.broadcast %18 : vector<1x128xi32> to vector<24x128xi32>
    %20 = arith.cmpi eq, %17, %19 : vector<24x128xi32>
    %21 = arith.extui %20 : vector<24x128xi1> to vector<24x128xi32>
    %22 = arith.sitofp %21 : vector<24x128xi32> to vector<24x128xf32>
    %23 = arith.truncf %22 : vector<24x128xf32> to vector<24x128xbf16>
    %c0_4 = arith.constant 0 : index
    %c0_5 = arith.constant 0 : index
    %24 = vector.load %arg14[%c0_4, %c0_5] : memref<24x128xf32, #tpu.memory_space<vmem>>, vector<24x128xf32>
    %cst_6 = arith.constant dense<0.000000e+00> : vector<24x128xf32>
    %25 = tpu.matmul %23, %13, %cst_6 {dimension_numbers = #tpu.dot_dimension_numbers<[1], [0], [0], [1], [0, 0, 1, 1], [], []>} : vector<24x128xbf16>, vector<128x128xbf16>, vector<24x128xf32> -> vector<24x128xf32>
    %26 = arith.addf %24, %25 : vector<24x128xf32>
    %c0_7 = arith.constant 0 : index
    %c0_8 = arith.constant 0 : index
    %27 = vector.load %arg14[%c0_7, %c0_8] : memref<24x128xf32, #tpu.memory_space<vmem>>, vector<24x128xf32>
    tpu.vector_store %arg14[%c0_7, %c0_8], %26 {strides = array<i32>} : memref<24x128xf32, #tpu.memory_space<vmem>>, vector<24x128xf32>,
    %c1_i32 = arith.constant 1 : i32
    %28 = arith.cmpi eq, %arg1, %c1_i32 : i32
    %29 = arith.extui %28 : i1 to i32
    %c0_i32_9 = arith.constant 0 : i32
    %30 = arith.cmpi ne, %29, %c0_i32_9 : i32
    scf.if %30 {
      %c0_10 = arith.constant 0 : index
      %c0_11 = arith.constant 0 : index
      %31 = vector.load %arg4[%c0_10, %c0_11] : memref<24x128xf32, #tpu.memory_space<vmem>>, vector<24x128xf32>
      %32 = arith.truncf %31 : vector<24x128xf32> to vector<24x128xbf16>
      %c0_12 = arith.constant 0 : index
      %c0_13 = arith.constant 0 : index
      %33 = vector.load %arg14[%c0_12, %c0_13] : memref<24x128xf32, #tpu.memory_space<vmem>>, vector<24x128xf32>
      %34 = arith.truncf %33 : vector<24x128xf32> to vector<24x128xbf16>
      %35 = tpu.concatenate %32, %34 in 1 : vector<24x128xbf16>, vector<24x128xbf16> -> vector<24x256xbf16>
      %c0_14 = arith.constant 0 : index
      %c0_15 = arith.constant 0 : index
      %36 = vector.load %arg5[%c0_14, %c0_15] : memref<256x128xbf16, #tpu.memory_space<vmem>>, vector<256x128xbf16>
      %cst_16 = arith.constant dense<0.000000e+00> : vector<24x128xf32>
      %37 = tpu.matmul %35, %36, %cst_16 {dimension_numbers = #tpu.dot_dimension_numbers<[1], [0], [0], [1], [0, 0, 1, 1], [], []>} : vector<24x256xbf16>, vector<256x128xbf16>, vector<24x128xf32> -> vector<24x128xf32>
      %c0_17 = arith.constant 0 : index
      %c0_18 = arith.constant 0 : index
      %38 = vector.load %arg6[%c0_17, %c0_18] : memref<1x128xf32, #tpu.memory_space<vmem>>, vector<1x128xf32>
      %39 = vector.broadcast %38 : vector<1x128xf32> to vector<24x128xf32>
      %40 = arith.addf %37, %39 : vector<24x128xf32>
      %41 = arith.negf %40 : vector<24x128xf32>
      %42 = math.exp %41 : vector<24x128xf32>
      %cst_19 = arith.constant 1.000000e+00 : f32
      %43 = vector.broadcast %cst_19 : f32 to vector<24x128xf32>
      %44 = arith.addf %43, %42 : vector<24x128xf32>
      %45 = arith.divf %43, %44 : vector<24x128xf32>
      %46 = arith.mulf %40, %45 : vector<24x128xf32>
      %47 = arith.truncf %46 : vector<24x128xf32> to vector<24x128xbf16>
      %c0_20 = arith.constant 0 : index
      %c0_21 = arith.constant 0 : index
      %48 = vector.load %arg7[%c0_20, %c0_21] : memref<128x128xbf16, #tpu.memory_space<vmem>>, vector<128x128xbf16>
      %cst_22 = arith.constant dense<0.000000e+00> : vector<24x128xf32>
      %49 = tpu.matmul %47, %48, %cst_22 {dimension_numbers = #tpu.dot_dimension_numbers<[1], [0], [0], [1], [0, 0, 1, 1], [], []>} : vector<24x128xbf16>, vector<128x128xbf16>, vector<24x128xf32> -> vector<24x128xf32>
      %c0_23 = arith.constant 0 : index
      %c0_24 = arith.constant 0 : index
      %50 = vector.load %arg8[%c0_23, %c0_24] : memref<1x128xf32, #tpu.memory_space<vmem>>, vector<1x128xf32>
      %51 = vector.broadcast %50 : vector<1x128xf32> to vector<24x128xf32>
      %52 = arith.addf %49, %51 : vector<24x128xf32>
      %53 = arith.negf %52 : vector<24x128xf32>
      %54 = math.exp %53 : vector<24x128xf32>
      %cst_25 = arith.constant 1.000000e+00 : f32
      %55 = vector.broadcast %cst_25 : f32 to vector<24x128xf32>
      %56 = arith.addf %55, %54 : vector<24x128xf32>
      %57 = arith.divf %55, %56 : vector<24x128xf32>
      %58 = arith.mulf %52, %57 : vector<24x128xf32>
      %59 = arith.truncf %58 : vector<24x128xf32> to vector<24x128xbf16>
      %c0_26 = arith.constant 0 : index
      %c0_27 = arith.constant 0 : index
      %60 = vector.load %arg9[%c0_26, %c0_27] : memref<128x128xbf16, #tpu.memory_space<vmem>>, vector<128x128xbf16>
      %cst_28 = arith.constant dense<0.000000e+00> : vector<24x128xf32>
      %61 = tpu.matmul %59, %60, %cst_28 {dimension_numbers = #tpu.dot_dimension_numbers<[1], [0], [0], [1], [0, 0, 1, 1], [], []>} : vector<24x128xbf16>, vector<128x128xbf16>, vector<24x128xf32> -> vector<24x128xf32>
      %c0_29 = arith.constant 0 : index
      %c0_30 = arith.constant 0 : index
      %62 = vector.load %arg10[%c0_29, %c0_30] : memref<1x128xf32, #tpu.memory_space<vmem>>, vector<1x128xf32>
      %63 = vector.broadcast %62 : vector<1x128xf32> to vector<24x128xf32>
      %64 = arith.addf %61, %63 : vector<24x128xf32>
      %c0_31 = arith.constant 0 : index
      %c0_32 = arith.constant 0 : index
      %65 = vector.load %arg11[%c0_31, %c0_32] : memref<1x128xf32, #tpu.memory_space<vmem>>, vector<1x128xf32>
      %c0_33 = arith.constant 0 : index
      %c0_34 = arith.constant 0 : index
      %66 = vector.load %arg12[%c0_33, %c0_34] : memref<1x128xf32, #tpu.memory_space<vmem>>, vector<1x128xf32>
      %cst_35 = arith.constant dense<0.000000e+00> : vector<24xf32>
      %67 = vector.multi_reduction <add>, %64, %cst_35 [1] : vector<24x128xf32> to vector<24xf32>
      %68 = vector.shape_cast %67 : vector<24xf32> to vector<24x1xf32>
      %cst_36 = arith.constant 1.280000e+02 : f32
      %69 = vector.broadcast %cst_36 : f32 to vector<24x1xf32>
      %70 = arith.divf %68, %69 : vector<24x1xf32>
      %71 = vector.broadcast %70 : vector<24x1xf32> to vector<24x128xf32>
      %72 = arith.subf %64, %71 : vector<24x128xf32>
      %73 = arith.mulf %72, %72 : vector<24x128xf32>
      %cst_37 = arith.constant dense<0.000000e+00> : vector<24xf32>
      %74 = vector.multi_reduction <add>, %73, %cst_37 [1] : vector<24x128xf32> to vector<24xf32>
      %75 = vector.shape_cast %74 : vector<24xf32> to vector<24x1xf32>
      %cst_38 = arith.constant 1.280000e+02 : f32
      %76 = vector.broadcast %cst_38 : f32 to vector<24x1xf32>
      %77 = arith.divf %75, %76 : vector<24x1xf32>
      %78 = vector.broadcast %70 : vector<24x1xf32> to vector<24x128xf32>
      %79 = arith.subf %64, %78 : vector<24x128xf32>
      %cst_39 = arith.constant 9.99999974E-6 : f32
      %80 = vector.broadcast %cst_39 : f32 to vector<24x1xf32>
      %81 = arith.addf %77, %80 : vector<24x1xf32>
      %82 = math.rsqrt %81 : vector<24x1xf32>
      %83 = vector.broadcast %82 : vector<24x1xf32> to vector<24x128xf32>
      %84 = arith.mulf %79, %83 : vector<24x128xf32>
      %85 = vector.broadcast %65 : vector<1x128xf32> to vector<24x128xf32>
      %86 = arith.mulf %84, %85 : vector<24x128xf32>
      %87 = vector.broadcast %66 : vector<1x128xf32> to vector<24x128xf32>
      %88 = arith.addf %86, %87 : vector<24x128xf32>
      %89 = arith.addf %31, %88 : vector<24x128xf32>
      %c0_40 = arith.constant 0 : index
      %c0_41 = arith.constant 0 : index
      %90 = vector.load %arg13[%c0_40, %c0_41] : memref<24x128xf32, #tpu.memory_space<vmem>>, vector<24x128xf32>
      tpu.vector_store %arg13[%c0_40, %c0_41], %89 {strides = array<i32>} : memref<24x128xf32, #tpu.memory_space<vmem>>, vector<24x128xf32>,
    } else {
    }
    return
  }
  func.func @transform_0(%arg0: i32, %arg1: i32) -> (i32, i32) {
    %c0_i32 = arith.constant 0 : i32
    %c0_i32_0 = arith.constant 0 : i32
    return %c0_i32, %arg1 : i32, i32
  }
  func.func @transform_1(%arg0: i32, %arg1: i32) -> (i32, i32) {
    %c0_i32 = arith.constant 0 : i32
    %c0_i32_0 = arith.constant 0 : i32
    return %arg1, %c0_i32 : i32, i32
  }
  func.func @transform_2(%arg0: i32, %arg1: i32) -> (i32, i32) {
    %c0_i32 = arith.constant 0 : i32
    %c0_i32_0 = arith.constant 0 : i32
    return %arg0, %c0_i32 : i32, i32
  }
  func.func @transform_3(%arg0: i32, %arg1: i32) -> (i32, i32) {
    %c0_i32 = arith.constant 0 : i32
    %c0_i32_0 = arith.constant 0 : i32
    %c0_i32_1 = arith.constant 0 : i32
    return %c0_i32, %c0_i32_0 : i32, i32
  }
  func.func @transform_4(%arg0: i32, %arg1: i32) -> (i32, i32) {
    %c0_i32 = arith.constant 0 : i32
    %c0_i32_0 = arith.constant 0 : i32
    %c0_i32_1 = arith.constant 0 : i32
    return %c0_i32, %c0_i32_0 : i32, i32
  }
  func.func @transform_5(%arg0: i32, %arg1: i32) -> (i32, i32) {
    %c0_i32 = arith.constant 0 : i32
    %c0_i32_0 = arith.constant 0 : i32
    %c0_i32_1 = arith.constant 0 : i32
    return %c0_i32, %c0_i32_0 : i32, i32
  }
  func.func @transform_6(%arg0: i32, %arg1: i32) -> (i32, i32) {
    %c0_i32 = arith.constant 0 : i32
    %c0_i32_0 = arith.constant 0 : i32
    %c0_i32_1 = arith.constant 0 : i32
    return %c0_i32, %c0_i32_0 : i32, i32
  }
  func.func @transform_7(%arg0: i32, %arg1: i32) -> (i32, i32) {
    %c0_i32 = arith.constant 0 : i32
    %c0_i32_0 = arith.constant 0 : i32
    %c0_i32_1 = arith.constant 0 : i32
    return %c0_i32, %c0_i32_0 : i32, i32
  }
  func.func @transform_8(%arg0: i32, %arg1: i32) -> (i32, i32) {
    %c0_i32 = arith.constant 0 : i32
    %c0_i32_0 = arith.constant 0 : i32
    %c0_i32_1 = arith.constant 0 : i32
    return %c0_i32, %c0_i32_0 : i32, i32
  }
  func.func @transform_9(%arg0: i32, %arg1: i32) -> (i32, i32) {
    %c0_i32 = arith.constant 0 : i32
    %c0_i32_0 = arith.constant 0 : i32
    %c0_i32_1 = arith.constant 0 : i32
    return %c0_i32, %c0_i32_0 : i32, i32
  }
  func.func @transform_10(%arg0: i32, %arg1: i32) -> (i32, i32) {
    %c0_i32 = arith.constant 0 : i32
    %c0_i32_0 = arith.constant 0 : i32
    %c0_i32_1 = arith.constant 0 : i32
    return %c0_i32, %c0_i32_0 : i32, i32
  }
  func.func @transform_11(%arg0: i32, %arg1: i32) -> (i32, i32) {
    %c0_i32 = arith.constant 0 : i32
    %c0_i32_0 = arith.constant 0 : i32
    return %arg0, %c0_i32 : i32, i32
  }
}

</mosaic_0001>

<bundles_post_ra>
// kernel: mesh_graph_nets_conv.3
= control target key start
LH: loop header
LB: loop body
LE: loop exit
PB: predicated region body
PF: predicated region fallthrough
CT: control target
= control target key end

     0   :  { %s2297_s0 = inlined_call_operand.vmem [shape: s32[1,160], index: 0, kind: input, shape index: {}]   ;;  %s2298_s1 = inlined_call_operand.vmem [shape: bf16[160,128], index: 1, kind: input, shape index: {}]   ;;  %s2299_s2 = inlined_call_operand.vmem [shape: f32[48,128], index: 2, kind: input, shape index: {}]   ;;  %s2300_s3 = inlined_call_operand.vmem [shape: bf16[256,128], index: 3, kind: input, shape index: {}]   ;;  %s2301_s4 = inlined_call_operand.vmem [shape: f32[1,128], index: 4, kind: input, shape index: {}]   ;;  %s2302_s5 = inlined_call_operand.vmem [shape: bf16[128,128], index: 5, kind: input, shape index: {}]   ;;  %s2303_s6 = inlined_call_operand.vmem [shape: f32[1,128], index: 6, kind: input, shape index: {}]   ;;  %s2304_s7 = inlined_call_operand.vmem [shape: bf16[128,128], index: 7, kind: input, shape index: {}]   ;;  %s2305_s8 = inlined_call_operand.vmem [shape: f32[1,128], index: 8, kind: input, shape index: {}]   ;;  %s2306_s9 = inlined_call_operand.vmem [shape: f32[1,128], index: 9, kind: input, shape index: {}]   ;;  %s2307_s10 = inlined_call_operand.vmem [shape: f32[1,128], index: 10, kind: input, shape index: {}]   ;;  %s2308_s11 = inlined_call_operand.hbm [shape: f32[48,128], index: 11, kind: output, shape index: {}]  }
   0x1   :  { %2319 = sst [smem:[#allocation15_spill]] %s2308_s11 }
   0x2   :  { %16 = vsyncpa [#allocation4], 0 }
   0x3   :  { %18 = vsyncpa [#allocation4 + $0x1], 0  ;;  %s1861_s17 = smov 0   ;;  %s1863_s18 = smov 0  }
   0x4   :  { %s1865_s19 = smov 0   ;;  %s1867_s20 = smov 0  }
   0x5   :  { %s1869_s21 = smov 0   ;;  %s1871_s22 = smov 0  }
   0x6   :  { %s1873_s23 = smov 0   ;;  %s1875_s24 = smov 0  }
   0x7 LB: > { %2320 = sst [smem:[#allocation6_spill]] %s1766_s17  ;;  %s1370_s25 = sadd.s32 4294967295, %s1794_s24   ;;  %s1794_s24 = sphi %s1875_s24, %s24_s24   ;;  %s1790_s23 = sphi %s1873_s23, %s2364_s23   ;;  %s1786_s22 = sphi %s1871_s22, %s2363_s22   ;;  %s1782_s21 = sphi %s1869_s21, %s2362_s21   ;;  %s1778_s20 = sphi %s1867_s20, %s2361_s20   ;;  %s1774_s19 = sphi %s1865_s19, %s2360_s19   ;;  %s1770_s18 = sphi %s1863_s18, %s2366_s18   ;;  %s1766_s17 = sphi %s1861_s17, %s2365_s17  }
   0x8   : > { %2321 = sst [smem:[#allocation7_spill]] %s1774_s19  ;;  %s1371_s26 = sadd.s32 4294967294, %s1794_s24  }
   0x9   : > { %2322 = sst [smem:[#allocation8_spill]] %s1786_s22  ;;  %s33_s27 = sadd.s32 1, %s1786_s22 }
   0xa   : > { %2323 = sst [smem:[#allocation9_spill]] %s1790_s23  ;;  %p34_p0 = scmp.ge.s32.totalorder %s33_s27, 2 }
   0xb   : > { %2324 = sst [smem:[#allocation10_spill]] %s1794_s24  ;;  %s36_s28 = sadd.s32 1, %s1790_s23 }
   0xc   : > { %p299_p1 = scmp.ne.s32.totalorder %s1774_s19, %s1770_s18  ;;  %p300_p2 = scmp.eq.s32.totalorder %s1370_s25, 3 }
   0xd   : > { %s2368_s27 = smov (%p34_p0, %s33_s27), 0  ;;  %s2370_s28 = smov (!%p34_p0, %s36_s28), %s1790_s23 }
   0xe   : > { %2325 = sst [smem:[#allocation11_spill]] %s2368_s27  ;;  %p1910_p3 = por %p300_p2, %p299_p1 }
   0xf   : > { %p305_p4 = scmp.ne.s32.totalorder %s1770_s18, %s1766_s17  ;;  %p38_p5 = scmp.ge.s32.totalorder %s2370_s28, 2 }
  0x10   : > { %p306_p6 = scmp.eq.s32.totalorder %s1371_s26, 3  ;;  %p1374_p7 = scmp.ge.s32.totalorder %s1794_s24, 1 }
  0x11   : > { %p380_p8 = scmp.lt.s32.totalorder %s1794_s24, 5  ;;  %s2372_s28 = smov (%p38_p5, %s2370_s28), 0 }
  0x12   : > { %2327 = sst [smem:[#allocation12_spill]] %s2372_s28  ;;  %p1920_p9 = por %p306_p6, %p305_p4 }
  0x13   : > { %p381_p10 = pnand %p1374_p7, %p380_p8  ;;  %s286_s12 = ssub.s32 %s1790_s23, %s2372_s28 }
  0x14   : > { %s2328_s30 = scalar_select %p1920_p9, 1, 0 }
  0x15   : > { %s289_s13 = sadd.s32 1, %s1774_s19  ;;  %p287_p11 = scmp.eq.s32.totalorder %s286_s12, 0 }
  0x16   : > { %2329 = sst [smem:[#allocation13_spill]] %s2328_s30  ;;  %384 = sbr.rel (%p381_p10) target bundleno = 1376 (0x560), region = 64 }
  0x17   : > { %s1928_s14 = scalar_select %p287_p11, %s1774_s19, %s289_s13  }
  0x18   : > { %s2313_s15 = sand.u32 (!%p381_p10), 1, %s1770_s18   ;;  %p432_p12 = scmp.lt.s32.totalorder (!%p381_p10), %s1778_s20, 1 }
  0x19   : > { %2330 = sst [smem:[#allocation14_spill]] %s1928_s14  ;;  %s1562_s16 = smul.u32 (!%p381_p10), 24, %s2313_s15 }
  0x1a   : > { %s1375_s25 = sshll.u32 (!%p381_p10), %s1778_s20, 4  ;;  %s449_s27 = smul.u32 (!%p381_p10), 3, %s1782_s21 }
  0x1b   : > { %p440_p13 = scmp.lt.s32.totalorder (!%p381_p10), %s1375_s25, 19  ;;  %s1953_s11 = scalar_lea.vmem (!%p381_p10), [#allocation3], %s1562_s16 }
  0x1c   : > { %p450_p0 = scmp.lt.s32.totalorder (!%p381_p10), %s449_s27, 5  ;;  %p1378_p1 = scmp.ne.s32.totalorder (!%p381_p10), %s1778_s20, 0 }
  0x1d   : > { %s1936_s26 = scalar_select %p432_p12, %s1778_s20, 1 }
  0x1e   : > { %s2374_s25 = smov (!%p440_p13, %s1375_s25), 19  ;;  %s2376_s27 = smov (!%p450_p0, %s449_s27), 5 }
  0x1f   : > { %s434_s13 = scalar_lea.vmem %s2297_s0, %s1936_s26  ;;  %s1376_s23 = sshll.u32 %s2374_s25, 2  ;;  %v1796_v0 = vmov (!%p1378_p1), 0.0  }
  0x20   : > { %s1946_s19 = scalar_lea.vmem %s2298_s1, %s1376_s23  ;;  %s1377_s15 = sshll.u32 %s2376_s27, 3  ;;  %461 = vst [vmem:[#allocation2] sm:$0xff] (!%p1378_p1), %v1796_v0  ;;  %462 = vst [vmem:[#allocation2 + $0x8] sm:$0xff] (!%p1378_p1), %v1796_v0 }
  0x21   : > { %s1951_s24 = scalar_lea.vmem %s2299_s2, %s1377_s15  ;;  %460 = sbr.rel (%p1378_p1) target bundleno = 40 (0x28), region = 68  ;;  %463 = vst [vmem:[#allocation2 + $0x10] sm:$0xff] (!%p1378_p1), %v1796_v0 }
  0x28 PF: > { %v464_v1 = vlaneseq  ;;  %s1379_s22 = sshll.u32 %s1778_s20, 7  ;;  %v515_v6 = vld [vmem:[%s1946_s19] sm:$0xf]  ;;  %s595_s17 = smul.u32 24, %s1782_s21  ;;  %v516_v16 = vld [vmem:[%s1946_s19 + $0x4] sm:$0xf] }
  0x29   : > { %v1957_v2 = vstv %s1379_s22  ;;  %v517_v23 = vld [vmem:[%s1946_s19 + $0x8] sm:$0xf]  ;;  %v518_v24 = vld [vmem:[%s1946_s19 + $0xc] sm:$0xf]  ;;  %v519_v28 = vld [vmem:[%s1946_s19 + $0x10] sm:$0xf] }
  0x2a   : > { %v1959_v3 = vshrl.u32 %v464_v1, 7  ;;  %v1994_v25 = vstv %s595_s17  ;;  %v520_v34 = vld [vmem:[%s1946_s19 + $0x14] sm:$0xf]  ;;  %v521_v43 = vld [vmem:[%s1946_s19 + $0x18] sm:$0xf]  ;;  %p1396_p2 = scmp.ne.s32.totalorder %s1778_s20, 1 }
  0x2b   : > { %v522_v44 = vld [vmem:[%s1946_s19 + $0x1c] sm:$0xf]  ;;  %v523_v56 = vld [vmem:[%s1946_s19 + $0x20] sm:$0xf]  ;;  %v524_v57 = vld [vmem:[%s1946_s19 + $0x24] sm:$0xf] }
  0x2c   : > { %v1962_v4 = vadd.s32 8, %v1959_v3  ;;  %v483_v5 = vadd.s32 %v1957_v2, %v1959_v3  ;;  %v1968_v7 = vadd.s32 16, %v1959_v3  ;;  %v468_v8 = vadd.s32 24, %v1959_v3  ;;  %v1380_v63 = vld [vmem:[%s434_s13] ss:$0 sm:$0xff]  ;;  %v1648_v48 = vld [vmem:[%s2300_s3 + $0x68] sm:$0xff] (!%p1396_p2)  }
  0x2d   : > { %v469_v9 = vadd.s32 32, %v1959_v3  ;;  %v470_v10 = vadd.s32 40, %v1959_v3  ;;  %v471_v11 = vadd.s32 48, %v1959_v3  ;;  %v472_v12 = vadd.s32 56, %v1959_v3  ;;  %v528_v17 = vld [vmem:[%s1946_s19 + $0x34] sm:$0xf] }
  0x2e   : > { %v484_v13 = vadd.s32 %v1957_v2, %v1962_v4  ;;  %vm499_vm0 = vcmp.lt.s32.totalorder %v483_v5, 160  ;;  %v485_v14 = vadd.s32 %v1957_v2, %v1968_v7  ;;  %v486_v15 = vadd.s32 %v1957_v2, %v468_v8  ;;  %v1649_v51 = vld [vmem:[%s2300_s3 + $0x28] sm:$0xff] (!%p1396_p2)   ;;  %v1651_v54 = vld [vmem:[%s2300_s3 + $0x30] sm:$0xff] (!%p1396_p2)   ;;  %v1658_v8 = vld [vmem:[%s2302_s5 + $0x20] sm:$0xff] (!%p1396_p2)  }
  0x2f   : > { %vm1982_vm1 = vmpackc.low %vm499_vm0, %vm499_vm0  ;;  %v487_v18 = vadd.s32 %v1957_v2, %v469_v9  ;;  %v488_v19 = vadd.s32 %v1957_v2, %v470_v10  ;;  %v489_v20 = vadd.s32 %v1957_v2, %v471_v11  ;;  %v490_v21 = vadd.s32 %v1957_v2, %v472_v12  ;;  %v526_v9 = vld [vmem:[%s1946_s19 + $0x2c] sm:$0xf]  ;;  %v1661_v10 = vld [vmem:[%s2302_s5 + $0x38] sm:$0xff] (!%p1396_p2)  }
  0x30   : > { %vm500_vm2 = vcmp.lt.s32.totalorder %v484_v13, 160  ;;  %v579_v22 = vsel %vm1982_vm1, %v515_v6, 0  ;;  %vm501_vm3 = vcmp.lt.s32.totalorder %v485_v14, 160  ;;  %vm502_vm4 = vcmp.lt.s32.totalorder %v486_v15, 160  ;;  %v2156_v58 = vld [vmem:[%s1951_s24 + $0x8] sm:$0xff] (!%p1396_p2) }
  0x31   : > { %vm564_vm5 = vmpackc.low %vm500_vm2, %vm500_vm2  ;;  %vm503_vm6 = vcmp.lt.s32.totalorder %v487_v18, 160  ;;  %vm504_vm7 = vcmp.lt.s32.totalorder %v488_v19, 160  ;;  %vm505_vm8 = vcmp.lt.s32.totalorder %v489_v20, 160  ;;  %v473_v29 = vadd.s32 64, %v1959_v3 }
  0x32   : > { %v580_v26 = vsel %vm564_vm5, %v516_v16, 0  ;;  %vm1996_vm9 = vmpackc.low %vm501_vm3, %vm501_vm3  ;;  %v474_v30 = vadd.s32 72, %v1959_v3  ;;  %v475_v31 = vadd.s32 80, %v1959_v3  ;;  %vm506_vm11 = vcmp.lt.s32.totalorder %v490_v21, 160  ;;  %v527_v16 = vld [vmem:[%s1946_s19 + $0x30] sm:$0xf] }
  0x33   : > { %v1384_v32 = vcombine.low %v579_v22, %v580_v26  ;;  %vm566_vm10 = vmpackc.low %vm502_vm4, %vm502_vm4  ;;  %v581_v33 = vsel %vm1996_vm9, %v517_v23, 0  ;;  %v476_v35 = vadd.s32 88, %v1959_v3  ;;  %v491_v38 = vadd.s32 %v1957_v2, %v473_v29  ;;  %v529_v22 = vld [vmem:[%s1946_s19 + $0x38] sm:$0xf]  ;;  %v530_v23 = vld [vmem:[%s1946_s19 + $0x3c] sm:$0xf] }
  0x34   : > { %v582_v36 = vsel %vm566_vm10, %v518_v24, 0  ;;  %vm2010_vm12 = vmpackc.low %vm503_vm6, %vm503_vm6  ;;  %v492_v39 = vadd.s32 %v1957_v2, %v474_v30  ;;  %v477_v40 = vadd.s32 96, %v1959_v3  ;;  %v493_v45 = vadd.s32 %v1957_v2, %v475_v31  ;;  %v618_v30 = vld [vmem:[#allocation2 + $0x10] sm:$0xff]  ;;  %v616_v31 = vld [vmem:[#allocation2] sm:$0xff] }
  0x35   : > { %1502 = vmatprep.subr.bf16.mxu0 %v1384_v32  ;;  %v1385_v41 = vcombine.low %v581_v33, %v582_v36  ;;  %vm568_vm13 = vmpackc.low %vm504_vm7, %vm504_vm7  ;;  %v583_v42 = vsel %vm2010_vm12, %v519_v28, 0  ;;  %v494_v46 = vadd.s32 %v1957_v2, %v476_v35  ;;  %vm507_vm15 = vcmp.lt.s32.totalorder %v491_v38, 160  ;;  %v617_v35 = vld [vmem:[#allocation2 + $0x8] sm:$0xff] }
  0x36   : > { %1503 = vmatpush3.bf16.msra.mxu0 %v1384_v32  ;;  %v584_v47 = vsel %vm568_vm13, %v520_v34, 0  ;;  %vm2027_vm14 = vmpackc.low %vm505_vm8, %vm505_vm8  ;;  %vm508_vm0 = vcmp.lt.s32.totalorder %v492_v39, 160  ;;  %v478_v49 = vadd.s32 104, %v1959_v3  ;;  %v495_v55 = vadd.s32 %v1957_v2, %v477_v40  ;;  %v1640_v40 = vld [vmem:[%s2300_s3 + $0x48] sm:$0xff] (!%p1396_p2)  }
  0x37   : > { %1504 = vmatprep.subr.bf16.mxu0 %v1385_v41  ;;  %v1386_v50 = vcombine.low %v583_v42, %v584_v47  ;;  %vm2034_vm1 = vmpackc.low %vm506_vm11, %vm506_vm11  ;;  %v585_v52 = vsel %vm2027_vm14, %v521_v43, 0  ;;  %vm509_vm4 = vcmp.lt.s32.totalorder %v493_v45, 160  ;;  %v479_v59 = vadd.s32 112, %v1959_v3  ;;  %v1642_v42 = vld [vmem:[%s2300_s3 + $0x50] sm:$0xff] (!%p1396_p2)   ;;  %v1645_v45 = vld [vmem:[%s2300_s3 + $0x18] sm:$0xff] (!%p1396_p2)  }
  0x38   : > { %v586_v53 = vsel %vm2034_vm1, %v522_v44, 0  ;;  %vm2042_vm2 = vmpackc.low %vm507_vm15, %vm507_vm15  ;;  %v597_v60 = vadd.s32 %v1994_v25, %v1959_v3  ;;  %vm510_vm5 = vcmp.lt.s32.totalorder %v494_v46, 160  ;;  %v496_v61 = vadd.s32 %v1957_v2, %v478_v49  ;;  %v1643_v43 = vld [vmem:[%s2300_s3 + $0x10] sm:$0xff] (!%p1396_p2)   ;;  %v1644_v44 = vld [vmem:[%s2300_s3 + $0x58] sm:$0xff] (!%p1396_p2)  }
  0x39   : > { %vm2049_vm3 = vmpackc.low %vm508_vm0, %vm508_vm0  ;;  %v480_v62 = vadd.s32 120, %v1959_v3  ;;  %v1387_v0 = vcombine.low %v585_v52, %v586_v53  ;;  %v598_v1 = vadd.s32 %v1994_v25, %v1962_v4  ;;  %v587_v5 = vsel %vm2042_vm2, %v523_v56, 0  ;;  %v525_v3 = vld [vmem:[%s1946_s19 + $0x28] sm:$0xf]  ;;  %v1646_v46 = vld [vmem:[%s2300_s3 + $0x60] sm:$0xff] (!%p1396_p2)  }
  0x3a   : > { %1505 = vmatpush3.bf16.msra.mxu0 %v1385_v41  ;;  %v588_v6 = vsel %vm2049_vm3, %v524_v57, 0  ;;  %vm2069_vm6 = vmpackc.low %vm509_vm4, %vm509_vm4  ;;  %vm511_vm7 = vcmp.lt.s32.totalorder %v495_v55, 160  ;;  %v497_v4 = vadd.s32 %v1957_v2, %v479_v59  ;;  %vm605_vm9 = vcmp.eq.s32.totalorder %v597_v60, %v1380_v63  ;;  %v1641_v41 = vld [vmem:[%s2300_s3 + $0x8] sm:$0xff] (!%p1396_p2)   ;;  %v1647_v47 = vld [vmem:[%s2300_s3 + $0x20] sm:$0xff] (!%p1396_p2)  }
  0x3b   : > { %1506 = vmatprep.subr.bf16.mxu0 %v1386_v50  ;;  %vm2075_vm8 = vmpackc.low %vm510_vm5, %vm510_vm5  ;;  %vm606_vm10 = vcmp.eq.s32.totalorder %v598_v1, %v1380_v63  ;;  %vm512_vm11 = vcmp.lt.s32.totalorder %v496_v61, 160  ;;  %v498_v11 = vadd.s32 %v1957_v2, %v480_v62  ;;  %v1388_v12 = vcombine.low %v587_v5, %v588_v6  ;;  %v1650_v53 = vld [vmem:[%s2300_s3 + $0x70] sm:$0xff] (!%p1396_p2)   ;;  %v1652_v55 = vld [vmem:[%s2300_s3 + $0x78] sm:$0xff] (!%p1396_p2)  }
  0x3c   : > { %vm2081_vm12 = vmpackc.low %vm511_vm7, %vm511_vm7  ;;  %v589_v14 = vsel %vm2069_vm6, %v525_v3, 0  ;;  %v590_v15 = vsel %vm2075_vm8, %v526_v9, 0  ;;  %vm513_vm15 = vcmp.lt.s32.totalorder %v497_v4, 160  ;;  %v1797_v2 = vmov 1.0|1.0   ;;  %v1653_v56 = vld [vmem:[%s2300_s3 + $0x38] sm:$0xff] (!%p1396_p2)  }
  0x3d   : > { %vm1392_vm13 = vmpackc.low %vm606_vm10, %vm605_vm9  ;;  %vm514_vm0 = vcmp.lt.s32.totalorder %v498_v11, 160  ;;  %v1389_v19 = vcombine.low %v589_v14, %v590_v15  ;;  %v591_v20 = vsel %vm2081_vm12, %v527_v16, 0  ;;  %v599_v29 = vadd.s32 %v1994_v25, %v1968_v7  ;;  %v1638_v7 = vld [vmem:[%s2300_s3 + $0x40] sm:$0xff] (!%p1396_p2)   ;;  %v2161_v62 = vld [vmem:[%s1951_s24 + $0x10] sm:$0xff] (!%p1396_p2) }
  0x3e   : > { %1507 = vmatpush3.bf16.msra.mxu0 %v1386_v50  ;;  %vm2091_vm14 = vmpackc.low %vm512_vm11, %vm512_vm11  ;;  %1518 = vmatprep.mubr.msk.bf16.mxu0 %vm1392_vm13, %v1797_v2  ;;  %v1639_v25 = vld [vmem:[%s2300_s3] sm:$0xff] (!%p1396_p2)   ;;  %v1655_v1 = vld [vmem:[%s2302_s5 + $0x8] sm:$0xff] (!%p1396_p2)  }
  0x3f   : > { %1508 = vmatprep.subr.bf16.mxu0 %v1387_v0  ;;  %v592_v21 = vsel %vm2091_vm14, %v528_v17, 0  ;;  %vm577_vm1 = vmpackc.low %vm513_vm15, %vm513_vm15  ;;  %vm607_vm3 = vcmp.eq.s32.totalorder %v599_v29, %v1380_v63  ;;  %v2153_v57 = vld [vmem:[%s1951_s24] sm:$0xff] (!%p1396_p2)  ;;  %v729_v63 = vpack.c.bf16 (!%p1396_p2), %v2161_v62, %v2161_v62  ;;  %v1656_v5 = vld [vmem:[%s2302_s5 + $0x10] sm:$0xff] (!%p1396_p2)  }
  0x40   : > { %vm578_vm2 = vmpackc.low %vm514_vm0, %vm514_vm0  ;;  %v1390_v24 = vcombine.low %v591_v20, %v592_v21  ;;  %v593_v26 = vsel %vm577_vm1, %v529_v22, 0  ;;  %v728_v60 = vpack.c.bf16 (!%p1396_p2), %v2156_v58, %v2153_v57  ;;  %v1657_v6 = vld [vmem:[%s2302_s5 + $0x18] sm:$0xff] (!%p1396_p2)   ;;  %v1659_v3 = vld [vmem:[%s2302_s5 + $0x28] sm:$0xff] (!%p1396_p2)  }
  0x41   : > { %v594_v27 = vsel %vm578_vm2, %v530_v23, 0  ;;  %vm1394_vm4 = vmpackc.low %vm607_vm3, %vm607_vm3  ;;  %v1660_v9 = vld [vmem:[%s2302_s5 + $0x30] sm:$0xff] (!%p1396_p2)   ;;  %v1397_v11 = vld [vmem:[%s2301_s4] ss:$0 sm:$0xff] (!%p1396_p2) }
  0x42   : > { %1509 = vmatpush3.bf16.msra.mxu0 %v1387_v0  ;;  %v1391_v28 = vcombine.low %v593_v26, %v594_v27  ;;  %v1654_v0 = vld [vmem:[%s2302_s5] sm:$0xff] (!%p1396_p2)  }
  0x43   : > { %1510 = vmatprep.subr.bf16.mxu0 %v1388_v12  ;;  %1522 = vmatprep.subr.bf16.mxu1 (!%p1396_p2), %v1654_v0 }
  0x44   : > { %1523 = vmatpush3.bf16.msra.mxu1 (!%p1396_p2), %v1654_v0 }
  0x45   : > { %1524 = vmatprep.subr.bf16.mxu1 (!%p1396_p2), %v1655_v1 }
  0x46   : > { %1511 = vmatpush3.bf16.msra.mxu0 %v1388_v12 }
  0x47   : > { %1512 = vmatprep.subr.bf16.mxu0 %v1389_v19 }
  0x48   : > { %1525 = vmatpush3.bf16.msra.mxu1 (!%p1396_p2), %v1655_v1 }
  0x49   : > { %1526 = vmatprep.subr.bf16.mxu1 (!%p1396_p2), %v1656_v5 }
  0x4a   : > { %1513 = vmatpush3.bf16.msra.mxu0 %v1389_v19 }
  0x4b   : > { %1514 = vmatprep.subr.bf16.mxu0 %v1390_v24 }
  0x4c   : > { %1527 = vmatpush3.bf16.msra.mxu1 (!%p1396_p2), %v1656_v5 }
  0x4d   : > { %1528 = vmatprep.subr.bf16.mxu1 (!%p1396_p2), %v1657_v6 }
  0x4e   : > { %1515 = vmatpush3.bf16.msra.mxu0 %v1390_v24 }
  0x4f   : > { %1516 = vmatprep.subr.bf16.mxu0 %v1391_v28 }
  0x50   : > { %1529 = vmatpush3.bf16.msra.mxu1 (!%p1396_p2), %v1657_v6 }
  0x51   : > { %1530 = vmatprep.subr.bf16.mxu1 (!%p1396_p2), %v1658_v8 }
  0x52   : > { %1517 = vmatpush3.bf16.msra.mxu0 %v1391_v28 }
  0x53   : > { %1454 = vmatprep.subr.bf16.mxu0 (!%p1396_p2), %v1638_v7 }
  0x54   : > { %1531 = vmatpush3.bf16.msra.mxu1 (!%p1396_p2), %v1658_v8 }
  0x55   : > { %1519 = vmatmul.mubr.msk.bf16.vlgmr.msra.gmra.mrb[0].mxu0 %vm1394_vm4, %v1797_v2  ;;  %1532 = vmatprep.subr.bf16.mxu1 (!%p1396_p2), %v1659_v3 }
  0x56   : > { %1455 = vmatpush3.bf16.msra.mxu0 (!%p1396_p2), %v1639_v25 }
  0x57   : > { %1456 = vmatprep.subr.bf16.mxu0 (!%p1396_p2), %v1640_v40  ;;  %v1662_v40 = vld [vmem:[%s2304_s7] sm:$0xff] (!%p1396_p2)  }
  0x58   : > { %1533 = vmatpush3.bf16.msra.mxu1 (!%p1396_p2), %v1659_v3 }
  0x59   : > { %1534 = vmatprep.subr.bf16.mxu1 (!%p1396_p2), %v1660_v9 }
  0x5a   : > { %1457 = vmatpush3.bf16.msra.mxu0 (!%p1396_p2), %v1641_v41  ;;  %v1663_v41 = vld [vmem:[%s2304_s7 + $0x8] sm:$0xff] (!%p1396_p2)  }
  0x5b   : > { %1458 = vmatprep.subr.bf16.mxu0 (!%p1396_p2), %v1642_v42  ;;  %v1664_v42 = vld [vmem:[%s2304_s7 + $0x10] sm:$0xff] (!%p1396_p2)  }
  0x5c   : > { %1535 = vmatpush3.bf16.msra.mxu1 (!%p1396_p2), %v1660_v9 }
  0x5d   : > { %1536 = vmatprep.subr.bf16.mxu1 (!%p1396_p2), %v1661_v10 }
  0x5e   : > { %1459 = vmatpush3.bf16.msra.mxu0 (!%p1396_p2), %v1643_v43  ;;  %v1665_v43 = vld [vmem:[%s2304_s7 + $0x18] sm:$0xff] (!%p1396_p2)  }
  0x5f   : > { %1460 = vmatprep.subr.bf16.mxu0 (!%p1396_p2), %v1644_v44  ;;  %v1666_v44 = vld [vmem:[%s2304_s7 + $0x20] sm:$0xff] (!%p1396_p2)  }
  0x60   : > { %1537 = vmatpush3.bf16.msra.mxu1 (!%p1396_p2), %v1661_v10 }
  0x62   : > { %1461 = vmatpush3.bf16.msra.mxu0 (!%p1396_p2), %v1645_v45  ;;  %v1667_v45 = vld [vmem:[%s2304_s7 + $0x28] sm:$0xff] (!%p1396_p2)  }
  0x63   : > { %1462 = vmatprep.subr.bf16.mxu0 (!%p1396_p2), %v1646_v46  ;;  %v1668_v46 = vld [vmem:[%s2304_s7 + $0x30] sm:$0xff] (!%p1396_p2)  }
  0x66   : > { %1463 = vmatpush3.bf16.msra.mxu0 (!%p1396_p2), %v1647_v47  ;;  %v1669_v47 = vld [vmem:[%s2304_s7 + $0x38] sm:$0xff] (!%p1396_p2)  }
  0x67   : > { %1464 = vmatprep.subr.bf16.mxu0 (!%p1396_p2), %v1648_v48  ;;  %v1417_v48 = vld [vmem:[%s2303_s6] ss:$0 sm:$0xff] (!%p1396_p2) }
  0x6a   : > { %1465 = vmatpush3.bf16.msra.mxu0 (!%p1396_p2), %v1649_v51 }
  0x6b   : > { %1466 = vmatprep.subr.bf16.mxu0 (!%p1396_p2), %v1650_v53 }
  0x6e   : > { %1467 = vmatpush3.bf16.msra.mxu0 (!%p1396_p2), %v1651_v54 }
  0x6f   : > { %1468 = vmatprep.subr.bf16.mxu0 (!%p1396_p2), %v1652_v55 }
  0x72   : > { %1469 = vmatpush3.bf16.msra.mxu0 (!%p1396_p2), %v1653_v56 }
  0x73   : > { %1542 = vmatprep.subr.bf16.mxu0 (!%p1396_p2), %v1662_v40 }
 0x128   : > { %v1520_v32 = vpop.f32.mrb[0].mxu0  ;;  %724 = sbr.rel (%p1396_p2) target bundleno = 1350 (0x546), region = 72 }
 0x129   : > { %v717_v33 = vadd.f32 %v1520_v32, %v618_v30  ;;  %v701_v34 = vpop.f32.mrb[1].mxu0 }
 0x12a   : > { %v715_v36 = vadd.f32 %v701_v34, %v616_v31  ;;  %v1521_v37 = vpop.f32.mrb[2].mxu0 }
 0x12b   : > { %720 = vst [vmem:[#allocation2 + $0x10] sm:$0xff] %v717_v33  ;;  %v704_v38 = vpop.f32.mrb[3].mxu0 }
 0x12c   : > { %718 = vst [vmem:[#allocation2] sm:$0xff] %v715_v36  ;;  %v716_v39 = vadd.f32 %v704_v38, %v617_v35 }
 0x12e   : > { %719 = vst [vmem:[#allocation2 + $0x8] sm:$0xff] %v716_v39 }
 0x132   : > { %v732_v59 = vld [vmem:[#allocation2 + $0x10] sm:$0xff] }
 0x133   : > { %v730_v49 = vld [vmem:[#allocation2] sm:$0xff]  ;;  %v734_v61 = vpack.c.bf16 %v732_v59, %v732_v59 }
 0x135   : > { %v731_v50 = vld [vmem:[#allocation2 + $0x8] sm:$0xff] }
 0x136   : > { %v733_v52 = vpack.c.bf16 %v731_v50, %v730_v49 }
 0x138   : > { %902 = vmatprep.mubr.bf16.mxu0 %v733_v52 }
 0x139   : > { %903 = vmatmul.mubr.bf16.vlgmr.msra.gmra.mrb[0].mxu0 %v728_v60 }
 0x13a   : > { %910 = vmatprep.mubr.bf16.mxu0 %v734_v61  ;;  %1543 = vmatpush3.bf16.msra.mxu0 %v1662_v40 }
 0x13b   : > { %1544 = vmatprep.subr.bf16.mxu0 %v1663_v41 }
 0x13e   : > { %1545 = vmatpush3.bf16.msra.mxu0 %v1663_v41 }
 0x13f   : > { %1546 = vmatprep.subr.bf16.mxu0 %v1664_v42 }
 0x141   : > { %911 = vmatmul.mubr.bf16.gmra.mrb[4].mxu0 %v729_v63 }
 0x142   : > { %1547 = vmatpush3.bf16.msra.mxu0 %v1664_v42  ;;  %v1438_v42 = vld [vmem:[%s2306_s9] ss:$0 sm:$0xff] }
 0x143   : > { %1548 = vmatprep.subr.bf16.mxu0 %v1665_v43 }
 0x146   : > { %1549 = vmatpush3.bf16.msra.mxu0 %v1665_v43 }
 0x147   : > { %1550 = vmatprep.subr.bf16.mxu0 %v1666_v44 }
 0x14a   : > { %1551 = vmatpush3.bf16.msra.mxu0 %v1666_v44  ;;  %v1439_v44 = vld [vmem:[%s2307_s10] ss:$0 sm:$0xff] }
 0x14b   : > { %1552 = vmatprep.subr.bf16.mxu0 %v1667_v45 }
 0x14e   : > { %1553 = vmatpush3.bf16.msra.mxu0 %v1667_v45 }
 0x14f   : > { %1554 = vmatprep.subr.bf16.mxu0 %v1668_v46 }
 0x152   : > { %1555 = vmatpush3.bf16.msra.mxu0 %v1668_v46 }
 0x153   : > { %1556 = vmatprep.subr.bf16.mxu0 %v1669_v47 }
 0x156   : > { %1557 = vmatpush3.bf16.msra.mxu0 %v1669_v47 }
 0x20c   : > { %v1470_v4 = vpop.f32.mrb[0].mxu0 }
 0x20d   : > { %v1471_v12 = vpop.f32.mrb[1].mxu0 }
 0x20e   : > { %v1472_v13 = vadd.f32 %v1471_v12, %v1470_v4  ;;  %v1473_v14 = vpop.f32.mrb[2].mxu0 }
 0x20f   : > { %v1474_v15 = vpop.f32.mrb[3].mxu0 }
 0x210   : > { %v905_v16 = vadd.f32 %v1472_v13, %v1397_v11  ;;  %v1475_v17 = vadd.f32 %v1474_v15, %v1473_v14  ;;  %v1429_v14 = vld [vmem:[%s2305_s8] ss:$0 sm:$0xff] }
 0x212   : > { %v1414_v18 = vmul.f32 -1.442695, %v905_v16  ;;  %v908_v2 = vadd.f32 %v1475_v17, %v1397_v11 }
 0x214   : > { %1670 = vpow2.f32 %v1414_v18  ;;  %v1415_v19 = vmul.f32 -1.442695, %v908_v2  ;;  %v1476_v20 = vpop.f32.mrb[4].mxu0 }
 0x215   : > { %v1477_v21 = vpop.f32.mrb[5].mxu0 }
 0x216   : > { %1672 = vpow2.f32 %v1415_v19  ;;  %v1478_v22 = vadd.f32 %v1477_v21, %v1476_v20  ;;  %v1479_v23 = vpop.f32.mrb[6].mxu0 }
 0x217   : > { %v1480_v24 = vpop.f32.mrb[7].mxu0 }
 0x218   : > { %v913_v26 = vadd.f32 %v1478_v22, %v1397_v11 }
 0x21a   : > { %v1416_v27 = vmul.f32 -1.442695, %v913_v26 }
 0x21c   : > { %1674 = vpow2.f32 %v1416_v27 }
 0x21e   : > { %v1671_v28 = vpop.eup %1670 }
 0x21f   : > { %v927_v29 = vadd.f32 1.0, %v1671_v28 }
 0x220   : > { %v1673_v30 = vpop.eup %1672 }
 0x221   : > { %1676 = vrcp.f32 %v927_v29  ;;  %v928_v31 = vadd.f32 1.0, %v1673_v30 }
 0x223   : > { %1678 = vrcp.f32 %v928_v31 }
 0x226   : > { %v1675_v32 = vpop.eup %1674 }
 0x227   : > { %v929_v33 = vadd.f32 1.0, %v1675_v32 }
 0x229   : > { %1680 = vrcp.f32 %v929_v33 }
 0x22b   : > { %v1677_v34 = vpop.eup %1676 }
 0x22c   : > { %v936_v36 = vmul.f32 %v1677_v34, %v905_v16 }
 0x22d   : > { %v1679_v35 = vpop.eup %1678 }
 0x22e   : > { %v937_v37 = vmul.f32 %v1679_v35, %v908_v2 }
 0x230   : > { %v939_v38 = vpack.c.bf16 %v937_v37, %v936_v36 }
 0x232   : > { %1538 = vmatprep.mubr.bf16.mxu1 %v939_v38 }
 0x233   : > { %v1681_v39 = vpop.eup %1680 }
 0x234   : > { %v938_v7 = vmul.f32 %v1681_v39, %v913_v26 }
 0x236   : > { %v940_v25 = vpack.c.bf16 %v938_v7, %v938_v7 }
 0x238   : > { %1539 = vmatmul.mubr.bf16.vlgmr.msra.gmra.mrb[0].mxu1 %v940_v25 }
 0x30b   : > { %v1540_v49 = vpop.f32.mrb[0].mxu1 }
 0x30c   : > { %v1055_v50 = vadd.f32 %v1540_v49, %v1417_v48  ;;  %v1046_v51 = vpop.f32.mrb[1].mxu1 }
 0x30d   : > { %v1047_v52 = vadd.f32 %v1417_v48, %v1046_v51  ;;  %v1541_v53 = vpop.f32.mrb[2].mxu1 }
 0x30e   : > { %v1428_v54 = vmul.f32 -1.442695, %v1055_v50  ;;  %v1049_v55 = vpop.f32.mrb[3].mxu1 }
 0x30f   : > { %v1426_v56 = vmul.f32 -1.442695, %v1047_v52  ;;  %v1050_v59 = vadd.f32 %v1417_v48, %v1049_v55 }
 0x310   : > { %1682 = vpow2.f32 %v1428_v54 }
 0x311   : > { %1684 = vpow2.f32 %v1426_v56  ;;  %v1427_v60 = vmul.f32 -1.442695, %v1050_v59 }
 0x313   : > { %1686 = vpow2.f32 %v1427_v60 }
 0x31a   : > { %v1683_v61 = vpop.eup %1682 }
 0x31b   : > { %v1685_v63 = vpop.eup %1684  ;;  %v1071_v0 = vadd.f32 1.0, %v1683_v61 }
 0x31c   : > { %v1069_v1 = vadd.f32 1.0, %v1685_v63 }
 0x31d   : > { %v1687_v5 = vpop.eup %1686  ;;  %1688 = vrcp.f32 %v1071_v0 }
 0x31e   : > { %1690 = vrcp.f32 %v1069_v1  ;;  %v1070_v6 = vadd.f32 1.0, %v1687_v5 }
 0x320   : > { %1692 = vrcp.f32 %v1070_v6 }
 0x327   : > { %v1689_v8 = vpop.eup %1688 }
 0x328   : > { %v1691_v3 = vpop.eup %1690  ;;  %v1080_v10 = vmul.f32 %v1689_v8, %v1055_v50 }
 0x329   : > { %v1078_v4 = vmul.f32 %v1691_v3, %v1047_v52 }
 0x32a   : > { %v1693_v9 = vpop.eup %1692  ;;  %v1082_v13 = vpack.c.bf16 %v1080_v10, %v1080_v10 }
 0x32b   : > { %v1079_v11 = vmul.f32 %v1693_v9, %v1050_v59 }
 0x32d   : > { %v1081_v12 = vpack.c.bf16 %v1079_v11, %v1078_v4 }
 0x32f   : > { %1558 = vmatprep.mubr.bf16.mxu0 %v1081_v12 }
 0x330   : > { %1559 = vmatmul.mubr.bf16.vlgmr.msra.gmra.mrb[8].mxu0 %v1082_v13 }
 0x403   : > { %v1560_v15 = vpop.f32.mrb[8].mxu0 }
 0x404   : > { %v1197_v16 = vadd.f32 %v1560_v15, %v1429_v14  ;;  %v1188_v17 = vpop.f32.mrb[9].mxu0 }
 0x405   : > { %v1189_v18 = vadd.f32 %v1429_v14, %v1188_v17  ;;  %v1561_v2 = vpop.f32.mrb[10].mxu0 }
 0x406   : > { %1208 = vadd.xlane.f32.xlu1 %v1197_v16  ;;  %v1191_v19 = vpop.f32.mrb[11].mxu0 }
 0x407   : > { %1204 = vadd.xlane.f32.xlu0 %v1189_v18  ;;  %v1192_v20 = vadd.f32 %v1429_v14, %v1191_v19 }
 0x40b   : > { %1206 = vadd.xlane.f32.xlu0 %v1192_v20 }
 0x493   : > { %v1209_v21 = vpop.xlane.xlu1 %1208 }
 0x494   : > { %v1205_v22 = vpop.xlane.xlu0 %1204  ;;  %v1213_v23 = vmul.f32 0.0078125, %v1209_v21 }
 0x495   : > { %v1211_v24 = vmul.f32 0.0078125, %v1205_v22 }
 0x496   : > { %v1216_v28 = vsub.f32 %v1197_v16, %v1213_v23 }
 0x497   : > { %v1214_v26 = vsub.f32 %v1189_v18, %v1211_v24 }
 0x498   : > { %v1207_v27 = vpop.xlane.xlu0 %1206  ;;  %v1219_v32 = vmul.f32 %v1216_v28, %v1216_v28 }
 0x499   : > { %v1212_v29 = vmul.f32 0.0078125, %v1207_v27  ;;  %v1217_v30 = vmul.f32 %v1214_v26, %v1214_v26 }
 0x49b   : > { %v1215_v31 = vsub.f32 %v1192_v20, %v1212_v29  ;;  %1220 = vadd.xlane.f32.xlu1 %v1217_v30 }
 0x49d   : > { %v1218_v33 = vmul.f32 %v1215_v31, %v1215_v31 }
 0x49f   : > { %1224 = vadd.xlane.f32.xlu1 %v1219_v32  ;;  %1222 = vadd.xlane.f32.xlu0 %v1218_v33 }
 0x528   : > { %v1221_v34 = vpop.xlane.xlu1 %1220 }
 0x529   : > { %v1226_v35 = vmul.f32 0.0078125, %v1221_v34 }
 0x52b   : > { %v1229_v36 = vadd.f32 1e-05, %v1226_v35 }
 0x52c   : > { %v1225_v37 = vpop.xlane.xlu1 %1224  ;;  %v1223_v38 = vpop.xlane.xlu0 %1222 }
 0x52d   : > { %1694 = vrsqrt.f32 %v1229_v36  ;;  %v1228_v39 = vmul.f32 0.0078125, %v1225_v37  ;;  %v1227_v7 = vmul.f32 0.0078125, %v1223_v38 }
 0x52f   : > { %v1231_v25 = vadd.f32 1e-05, %v1228_v39  ;;  %v1230_v40 = vadd.f32 1e-05, %v1227_v7 }
 0x531   : > { %1696 = vrsqrt.f32 %v1231_v25 }
 0x532   : > { %1698 = vrsqrt.f32 %v1230_v40 }
 0x537   : > { %v1695_v41 = vpop.eup %1694 }
 0x538   : > { %v1235_v43 = vmul.f32 %v1695_v41, %v1214_v26 }
 0x53a   : > { %v1244_v45 = vmul.f32 %v1438_v42, %v1235_v43 }
 0x53b   : > { %v1697_v46 = vpop.eup %1696 }
 0x53c   : > { %v1699_v47 = vpop.eup %1698  ;;  %v1253_v48 = vadd.f32 %v1439_v44, %v1244_v45  ;;  %v1237_v49 = vmul.f32 %v1697_v46, %v1216_v28 }
 0x53d   : > { %v1236_v50 = vmul.f32 %v1699_v47, %v1215_v31 }
 0x53e   : > { %v1256_v51 = vadd.f32 %v1253_v48, %v2153_v57  ;;  %v1246_v52 = vmul.f32 %v1438_v42, %v1237_v49 }
 0x53f   : > { %v1245_v53 = vmul.f32 %v1438_v42, %v1236_v50 }
 0x540   : > { %1259 = vst [vmem:[%s1953_s11] sm:$0xff] %v1256_v51  ;;  %v1255_v54 = vadd.f32 %v1439_v44, %v1246_v52 }
 0x541   : > { %v1254_v55 = vadd.f32 %v1439_v44, %v1245_v53 }
 0x542   : > { %v1258_v56 = vadd.f32 %v1255_v54, %v2161_v62 }
 0x543   : > { %v1257_v59 = vadd.f32 %v1254_v55, %v2156_v58 }
 0x544   : > { %1261 = vst [vmem:[%s1953_s11 + $0x10] sm:$0xff] %v1258_v56 }
 0x545   : > { %1260 = vst [vmem:[%s1953_s11 + $0x8] sm:$0xff] %v1257_v59 }
 0x546 PF: > { %s1443_s22 = smul.u32 384, %s1782_s21  ;;  %s1276_s17 = sshll.u32 %s1953_s11, 4  ;;  %s2241_s17 = int_to_ptr.vmem [resolvable:$true] %s1276_s17 }
 0x547   : > { %s2353_s19 = sld [smem:[#allocation15_spill]]  ;;  %s2355_s14 = sand.u32 1, %s1770_s18  }
 0x548   : > { %s2245_s15 = scalar_lea.sflag [#allocation4], %s2355_s14  ;;  %s1700_s16 = scalar_lea.vmem %s2241_s17, 384 }
 0x549   : > { %p1701_p4 = scmp.ne.s32.totalorder %s2241_s17, %s1700_s16  ;;  %s1798_s21 = smov [#allocation3]  }
 0x54a   : > { %s1704_s11 = sshll.u32 %s1798_s21, 4  ;;  %s1705_s11 = int_to_ptr.vmem [resolvable:$false] %s1704_s11 }
 0x54b   : > { %p1702_p5 = pnand %p1701_p4, %p1910_p3  ;;  %s1706_s25 = scalar_lea.vmem %s1705_s11, 768 }
 0x54c   : > { %p1707_p7 = scmp.lt.s32.totalorder %s2241_s17, %s1705_s11  ;;  %p1708_p8 = scmp.lt.s32.totalorder %s1706_s25, %s1700_s16 }
 0x54d   : > { %s2354_s28 = smov %s2353_s19  ;;  %s2239_s30 = scalar_lea.hbm %s2353_s19, %s1443_s22 }
 0x54e   : > { %p1703_p6 = pneg %p1702_p5  ;;  %p1709_p10 = por %p1708_p8, %p1707_p7 }
 0x550   : > { %p1710_p11 = pnand %p1709_p10, %p1703_p6 }
 0x552   : > { %1713 = shalt.err (!%p1710_p11)
}
 0x553   : > { %s1714_s26 = scalar_lea.hbm %s2239_s30, 384  ;;  %s1718_s12 = scalar_lea.hbm %s2354_s28, 768 }
 0x554   : > { %p1715_p12 = scmp.ne.s32.totalorder %s2239_s30, %s1714_s26  ;;  %p1719_p1 = scmp.lt.u32.totalorder %s2239_s30, %s2354_s28 }
 0x555   : > { %p1720_p2 = scmp.lt.u32.totalorder %s1718_s12, %s1714_s26  ;;  %p1722_p5 = scmp.lt.u32.totalorder %s1714_s26, %s2239_s30 }
 0x556   : > { %p1716_p13 = pnand %p1715_p12, %p1910_p3 }
 0x557   : > { %p1721_p4 = por %p1720_p2, %p1719_p1 }
 0x558   : > { %p1717_p0 = pneg %p1716_p13 }
 0x559   : > { %p1723_p6 = por %p1722_p5, %p1721_p4 }
 0x55b   : > { %p1724_p7 = pnand %p1723_p6, %p1717_p0 }
 0x55d   : > { %1727 = shalt.err (!%p1724_p7)
}
 0x55e   : > { %s1799_s23 = smov 128   ;;  %s1800_s27 = smov 8  }
 0x55f   : > { %1563 = dma.vmem_to_hbm [thread:$0]  (%p1910_p3), %s2241_s17, 384, %s2239_s30, %s2245_s15, %s1799_s23, %s1799_s23, %s1800_s27  }
 0x560 PF: > { %s2356_s19 = sld [smem:[#allocation10_spill]]  ;;  %s2357_s14 = sld [smem:[#allocation6_spill]] }
 0x566   : > { %p1569_p8 = scmp.ge.s32.totalorder %s2356_s19, 2  ;;  %s1291_s21 = sand.u32 1, %s2357_s14  }
 0x567   : > { %s1292_s11 = scalar_lea.sflag [#allocation4], %s1291_s21 }
 0x568   : > { %p1566_p10 = pnand %p1569_p8, %p1920_p9 }
 0x56a   : > { %1761 = dma.done.wait (!%p1566_p10), %s1292_s11, 384  }
 0x56b   : > { %1763 = vsyncadd (!%p1566_p10), %s1292_s11, 4294966912  ;;  %s24_s24 = sadd.s32 1, %s2356_s19   ;;  %s2359_s25 = sld [smem:[#allocation7_spill]] }
 0x56c   : > { %p21_p11 = scmp.ge.s32.totalorder %s24_s24, 6   ;;  %s2360_s19 = sld [smem:[#allocation14_spill]] }
 0x56d   : > { %s2361_s20 = sld [smem:[#allocation8_spill]]  ;;  %s2362_s21 = sld [smem:[#allocation9_spill]] }
 0x56e   : > { %s2363_s22 = sld [smem:[#allocation11_spill]]  ;;  %s2364_s23 = sld [smem:[#allocation12_spill]] }
 0x56f   : > { %s2365_s17 = smov %s1770_s18  ;;  %23 = sbr.rel (!%p21_p11) target bundleno = 7 (0x7), region = 113 }
 0x571   : > { %s2366_s18 = smov %s2359_s25 }
 0x576   :  { %1297 = vsyncpa [#allocation4], 1 }
 0x577   :  { %1299 = vsyncpa [#allocation4 + $0x1], 1 }

// kernel: mesh_graph_nets_conv.2
= control target key start
LH: loop header
LB: loop body
LE: loop exit
PB: predicated region body
PF: predicated region fallthrough
CT: control target
= control target key end

     0   :  { %s4072_s0 = inlined_call_operand.vmem [shape: s32[160,1], index: 0, kind: input, shape index: {}]   ;;  %s4073_s1 = inlined_call_operand.vmem [shape: s32[160,1], index: 1, kind: input, shape index: {}]   ;;  %s4074_s2 = inlined_call_operand.vmem [shape: f32[160,128], index: 2, kind: input, shape index: {}]   ;;  %s4075_s3 = inlined_call_operand.vmem [shape: bf16[96,128], index: 3, kind: input, shape index: {}]   ;;  %s4076_s4 = inlined_call_operand.vmem [shape: bf16[128,128], index: 4, kind: input, shape index: {}]   ;;  %s4077_s5 = inlined_call_operand.vmem [shape: f32[1,128], index: 5, kind: input, shape index: {}]   ;;  %s4078_s6 = inlined_call_operand.vmem [shape: bf16[128,128], index: 6, kind: input, shape index: {}]   ;;  %s4079_s7 = inlined_call_operand.vmem [shape: f32[1,128], index: 7, kind: input, shape index: {}]   ;;  %s4080_s8 = inlined_call_operand.vmem [shape: bf16[128,128], index: 8, kind: input, shape index: {}]   ;;  %s4081_s9 = inlined_call_operand.vmem [shape: f32[1,128], index: 9, kind: input, shape index: {}]   ;;  %s4082_s10 = inlined_call_operand.vmem [shape: f32[1,128], index: 10, kind: input, shape index: {}]   ;;  %s4083_s11 = inlined_call_operand.vmem [shape: f32[1,128], index: 11, kind: input, shape index: {}]   ;;  %s4084_s12 = inlined_call_operand.hbm [shape: f32[160,128], index: 12, kind: output, shape index: {0}]   ;;  %s4085_s13 = inlined_call_operand.vmem [shape: bf16[160,128], index: 13, kind: output, shape index: {1}]  }
   0x1   :  { %4090 = sst [smem:[#allocation9_spill]] %s4072_s0 }
   0x2   :  { %4091 = sst [smem:[#allocation10_spill]] %s4073_s1 }
   0x3   :  { %4092 = sst [smem:[#allocation11_spill]] %s4074_s2 }
   0x4   :  { %4093 = sst [smem:[#allocation12_spill]] %s4075_s3 }
   0x5   :  { %19 = vsyncpa [#allocation3], 0 }
   0x6   :  { %21 = vsyncpa [#allocation3 + $0x1], 0  ;;  %s3372_s25 = smov 0   ;;  %s3374_s26 = smov 0  }
   0x7   :  { %s3376_s27 = smov 0   ;;  %s3378_s28 = smov 0  }
   0x8 LB: > { %4094 = sst [smem:[#allocation6_spill]] %s3259_s27  ;;  %s3393_s29 = sadd.s32 4294967295, %s3263_s28   ;;  %s3263_s28 = sphi %s3378_s28, %s4107_s28   ;;  %s3259_s27 = sphi %s3376_s27, %s4109_s27   ;;  %s3255_s26 = sphi %s3374_s26, %s4111_s26   ;;  %s3251_s25 = sphi %s3372_s25, %s4110_s25  }
   0x9   : > { %s2443_s30 = sadd.s32 4294967294, %s3263_s28   ;;  %s3397_s14 = sadd.s32 1, %s3263_s28  }
   0xa   : > { %4095 = sst [smem:[#allocation7_spill]] %s3397_s14  ;;  %s301_s15 = sadd.s32 1, %s3259_s27 }
   0xb   : > { %s298_s16 = ssub.s32 %s3263_s28, %s3397_s14  ;;  %p311_p0 = scmp.ne.s32.totalorder %s3259_s27, %s3255_s26 }
   0xc   : > { %p299_p1 = scmp.eq.s32.totalorder %s298_s16, 0  ;;  %p312_p2 = scmp.eq.s32.totalorder %s3393_s29, 1 }
   0xd   : > { %p317_p3 = scmp.ne.s32.totalorder %s3255_s26, %s3251_s25  ;;  %p318_p4 = scmp.eq.s32.totalorder %s2443_s30, 1 }
   0xe   : > { %s3408_s17 = scalar_select %p299_p1, %s3259_s27, %s301_s15  }
   0xf   : > { %p3410_p5 = por %p312_p2, %p311_p0  ;;  %p3414_p6 = por %p318_p4, %p317_p3 }
  0x10   : > { %4096 = sst [smem:[#allocation8_spill]] %s3408_s17  ;;  %p2446_p7 = scmp.ge.s32.totalorder %s3263_s28, 1 }
  0x11   : > { %p440_p8 = scmp.lt.s32.totalorder %s3263_s28, 3 }
  0x13   : > { %p441_p9 = pnand %p2446_p7, %p440_p8 }
  0x14   : > { %s3421_s20 = sshll.u32 (!%p441_p9), %s3393_s29, 4  ;;  %v3297_v0 = vmov (!%p441_p9), 0   ;;  %v2963_v1 = vld [vmem:[%s4076_s4] sm:$0xff] (!%p441_p9)   ;;  %v2964_v2 = vld [vmem:[%s4076_s4 + $0x8] sm:$0xff] (!%p441_p9)   ;;  %s4099_s0 = sld [smem:[#allocation9_spill]] (!%p441_p9)  ;;  %v2965_v3 = vld [vmem:[%s4076_s4 + $0x10] sm:$0xff] (!%p441_p9)  }
  0x15   : > { %444 = sbr.rel (%p441_p9) target bundleno = 1358 (0x54e), region = 68  ;;  %2962 = vset.pattern.permute.xlu1 (!%p441_p9), %v3297_v0  ;;  %2961 = vset.pattern.permute.xlu0 (!%p441_p9), %v3297_v0  ;;  %p515_p10 = scmp.lt.s32.totalorder (!%p441_p9), %s3421_s20, 19  ;;  %v2966_v10 = vld [vmem:[%s4076_s4 + $0x18] sm:$0xff] (!%p441_p9)   ;;  %v2967_v15 = vld [vmem:[%s4076_s4 + $0x20] sm:$0xff] (!%p441_p9)   ;;  %v2968_v18 = vld [vmem:[%s4076_s4 + $0x28] sm:$0xff] (!%p441_p9)   ;;  %vm1030_vm6 = vcmask (!%p441_p9), 785408  }
  0x16   : > { %2715 = vmatprep.subr.bf16.mxu0 (!%p441_p9), %v2963_v1  ;;  %s4100_s1 = sld [smem:[#allocation10_spill]] (!%p441_p9)  ;;  %s4101_s2 = sld [smem:[#allocation11_spill]] (!%p441_p9)  ;;  %v2969_v26 = vld [vmem:[%s4076_s4 + $0x30] sm:$0xff] (!%p441_p9)   ;;  %v2970_v32 = vld [vmem:[%s4076_s4 + $0x38] sm:$0xff] (!%p441_p9)  }
  0x17   : > { %2716 = vmatpush3.bf16.msra.mxu0 (!%p441_p9), %v2963_v1  ;;  %s4102_s3 = sld [smem:[#allocation12_spill]] (!%p441_p9)  ;;  %s3789_s16 = sand.u32 (!%p441_p9), 1, %s3255_s26  }
  0x18   : > { %2717 = vmatprep.subr.bf16.mxu0 (!%p441_p9), %v2964_v2  ;;  %s4089_s21 = scalar_lea.sflag (!%p441_p9), [#allocation3], %s3789_s16 }
  0x1b   : > { %2718 = vmatpush3.bf16.msra.mxu0 (!%p441_p9), %v2964_v2 }
  0x1c   : > { %s516_s30 = scalar_select %p515_p10, %s3421_s20, 19  ;;  %2719 = vmatprep.subr.bf16.mxu0 %v2965_v3 }
  0x1d   : > { %v2971_v44 = vld [vmem:[%s4102_s3] sm:$0xff]   ;;  %v2972_v46 = vld [vmem:[%s4102_s3 + $0x8] sm:$0xff]   ;;  %v2973_v54 = vld [vmem:[%s4102_s3 + $0x10] sm:$0xff]   ;;  %s2099_s23 = ssub.s32 (%p3410_p5), 20, %s3421_s20 }
  0x1e   : > { %s3431_s15 = sshll.u32 %s516_s30, 3  ;;  %v2974_v57 = vld [vmem:[%s4102_s3 + $0x18] sm:$0xff]   ;;  %v2975_v2 = vld [vmem:[%s4102_s3 + $0x20] sm:$0xff]   ;;  %p2100_p11 = scmp.lt.s32.totalorder (%p3410_p5), %s2099_s23, 16 }
  0x1f   : > { %s3437_s27 = scalar_lea.vmem %s4099_s0, %s3431_s15  ;;  %s3443_s22 = scalar_lea.vmem %s4100_s1, %s3431_s15  ;;  %2720 = vmatpush3.bf16.msra.mxu0 %v2965_v3 }
  0x20   : > { %v568_v4 = vld [vmem:[%s3437_s27 + $0x18] sm:$0xff]  ;;  %v565_v5 = vld [vmem:[%s3437_s27] sm:$0xff]  ;;  %v566_v8 = vld [vmem:[%s3437_s27 + $0x8] sm:$0xff]  ;;  %2721 = vmatprep.subr.bf16.mxu0 %v2966_v10  ;;  %s3466_s24 = scalar_lea.vmem %s4101_s2, %s3431_s15  ;;  %s2447_s15 = sshll.u32 %s3789_s16, 7 }
  0x21   : > { %v581_v6 = vld [vmem:[%s3443_s22] sm:$0xff]  ;;  %607 = vperm.xlu1 %2962, %v568_v4   ;;  %598 = vperm.xlu0 %2961, %v565_v5   ;;  %v582_v9 = vld [vmem:[%s3443_s22 + $0x8] sm:$0xff]  ;;  %v567_v12 = vld [vmem:[%s3437_s27 + $0x10] sm:$0xff]  ;;  %s3830_s30 = scalar_lea.vmem [#allocation2], %s2447_s15 }
  0x22   : > { %v661_v7 = vadd.s32 48, %v581_v6  ;;  %v662_v11 = vadd.s32 48, %v582_v9  ;;  %v584_v13 = vld [vmem:[%s3443_s22 + $0x18] sm:$0xff]  ;;  %v583_v14 = vld [vmem:[%s3443_s22 + $0x10] sm:$0xff]  ;;  %v809_v19 = vld [vmem:[%s3466_s24] sm:$0xff] }
  0x23   : > { %v664_v16 = vadd.s32 48, %v584_v13  ;;  %v663_v17 = vadd.s32 48, %v583_v14  ;;  %2722 = vmatpush3.bf16.msra.mxu0 %v2966_v10  ;;  %v810_v20 = vld [vmem:[%s3466_s24 + $0x8] sm:$0xff]  ;;  %v569_v23 = vld [vmem:[%s3437_s27 + $0x20] sm:$0xff]  ;;  %v588_v29 = vld [vmem:[%s3443_s22 + $0x38] sm:$0xff] }
  0x24   : > { %2723 = vmatprep.subr.bf16.mxu0 %v2967_v15  ;;  %v570_v21 = vld [vmem:[%s3437_s27 + $0x28] sm:$0xff]  ;;  %v825_v22 = vpack.c.bf16 %v810_v20, %v809_v19  ;;  %v585_v25 = vld [vmem:[%s3443_s22 + $0x20] sm:$0xff]  ;;  %v587_v30 = vld [vmem:[%s3443_s22 + $0x30] sm:$0xff]  ;;  %v668_v36 = vadd.s32 48, %v588_v29 }
  0x25   : > { %678 = vperm.xlu1 %2962, %v661_v7   ;;  %601 = vperm.xlu0 %2961, %v566_v8   ;;  %v586_v24 = vld [vmem:[%s3443_s22 + $0x28] sm:$0xff]  ;;  %v665_v28 = vadd.s32 48, %v585_v25  ;;  %v572_v33 = vld [vmem:[%s3437_s27 + $0x38] sm:$0xff]  ;;  %v571_v34 = vld [vmem:[%s3437_s27 + $0x30] sm:$0xff]  ;;  %v667_v37 = vadd.s32 48, %v587_v30 }
  0x26   : > { %2731 = vmatprep.mubr.bf16.mxu0 %v825_v22  ;;  %v666_v27 = vadd.s32 48, %v586_v24  ;;  %v590_v31 = vld [vmem:[%s3443_s22 + $0x48] sm:$0xff]  ;;  %v589_v35 = vld [vmem:[%s3443_s22 + $0x40] sm:$0xff]  ;;  %v811_v38 = vld [vmem:[%s3466_s24 + $0x10] sm:$0xff] }
  0x27   : > { %2724 = vmatpush3.bf16.msra.mxu0 %v2967_v15  ;;  %v812_v39 = vld [vmem:[%s3466_s24 + $0x18] sm:$0xff]  ;;  %v670_v40 = vadd.s32 48, %v590_v31  ;;  %v813_v41 = vld [vmem:[%s3466_s24 + $0x20] sm:$0xff]  ;;  %v814_v42 = vld [vmem:[%s3466_s24 + $0x28] sm:$0xff]  ;;  %v669_v43 = vadd.s32 48, %v589_v35  ;;  %v3298_v31 = vmov 0.0  }
  0x28   : > { %2725 = vmatprep.subr.bf16.mxu0 %v2968_v18  ;;  %v826_v45 = vpack.c.bf16 %v812_v39, %v811_v38  ;;  %v827_v47 = vpack.c.bf16 %v814_v42, %v813_v41  ;;  %v574_v48 = vld [vmem:[%s3437_s27 + $0x48] sm:$0xff]  ;;  %v573_v49 = vld [vmem:[%s3437_s27 + $0x40] sm:$0xff]  ;;  %v815_v50 = vld [vmem:[%s3466_s24 + $0x30] sm:$0xff] }
  0x29   : > { %681 = vperm.xlu1 %2962, %v662_v11   ;;  %604 = vperm.xlu0 %2961, %v567_v12   ;;  %v816_v51 = vld [vmem:[%s3466_s24 + $0x38] sm:$0xff]  ;;  %v817_v52 = vld [vmem:[%s3466_s24 + $0x40] sm:$0xff]  ;;  %v818_v53 = vld [vmem:[%s3466_s24 + $0x48] sm:$0xff] }
  0x2a   : > { %v828_v55 = vpack.c.bf16 %v816_v51, %v815_v50  ;;  %v829_v56 = vpack.c.bf16 %v818_v53, %v817_v52  ;;  %v576_v58 = vld [vmem:[%s3437_s27 + $0x58] sm:$0xff]  ;;  %v575_v59 = vld [vmem:[%s3437_s27 + $0x50] sm:$0xff]  ;;  %v821_v0 = vld [vmem:[%s3466_s24 + $0x60] sm:$0xff] }
  0x2b   : > { %2726 = vmatpush3.bf16.msra.mxu0 %v2968_v18  ;;  %v592_v60 = vld [vmem:[%s3443_s22 + $0x58] sm:$0xff]  ;;  %v591_v61 = vld [vmem:[%s3443_s22 + $0x50] sm:$0xff]  ;;  %v822_v1 = vld [vmem:[%s3466_s24 + $0x68] sm:$0xff] }
  0x2c   : > { %2727 = vmatprep.subr.bf16.mxu0 %v2969_v26  ;;  %v819_v62 = vld [vmem:[%s3466_s24 + $0x50] sm:$0xff]  ;;  %v820_v63 = vld [vmem:[%s3466_s24 + $0x58] sm:$0xff]  ;;  %v672_v3 = vadd.s32 48, %v592_v60  ;;  %v671_v4 = vadd.s32 48, %v591_v61  ;;  %v831_v6 = vpack.c.bf16 %v822_v1, %v821_v0  ;;  %v2976_v7 = vld [vmem:[%s4102_s3 + $0x28] sm:$0xff]  }
  0x2d   : > { %687 = vperm.xlu1 %2962, %v664_v16   ;;  %684 = vperm.xlu0 %2961, %v663_v17   ;;  %v830_v5 = vpack.c.bf16 %v820_v63, %v819_v62  ;;  %v578_v8 = vld [vmem:[%s3437_s27 + $0x68] sm:$0xff]  ;;  %v577_v9 = vld [vmem:[%s3437_s27 + $0x60] sm:$0xff]  ;;  %v823_v12 = vld [vmem:[%s3466_s24 + $0x70] sm:$0xff] }
  0x2e   : > { %v594_v10 = vld [vmem:[%s3443_s22 + $0x68] sm:$0xff]  ;;  %v593_v11 = vld [vmem:[%s3443_s22 + $0x60] sm:$0xff]  ;;  %v824_v13 = vld [vmem:[%s3466_s24 + $0x78] sm:$0xff] }
  0x2f   : > { %2728 = vmatpush3.bf16.msra.mxu0 %v2969_v26  ;;  %v674_v14 = vadd.s32 48, %v594_v10  ;;  %v673_v15 = vadd.s32 48, %v593_v11  ;;  %v832_v16 = vpack.c.bf16 %v824_v13, %v823_v12  ;;  %v580_v17 = vld [vmem:[%s3437_s27 + $0x78] sm:$0xff]  ;;  %v579_v18 = vld [vmem:[%s3437_s27 + $0x70] sm:$0xff]  ;;  %s2448_s27 = sshll.u32 %s3789_s16, 6 }
  0x30   : > { %2729 = vmatprep.subr.bf16.mxu0 %v2970_v32  ;;  %v596_v19 = vld [vmem:[%s3443_s22 + $0x78] sm:$0xff]  ;;  %v595_v20 = vld [vmem:[%s3443_s22 + $0x70] sm:$0xff]  ;;  %s3846_s22 = scalar_lea.vmem [#allocation4], %s2448_s27  }
  0x31   : > { %613 = vperm.xlu1 %2962, %v570_v21   ;;  %610 = vperm.xlu0 %2961, %v569_v23   ;;  %v676_v21 = vadd.s32 48, %v596_v19  ;;  %v675_v22 = vadd.s32 48, %v595_v20  ;;  %v563_v23 = vlaneseq  ;;  %v2978_v19 = vld [vmem:[%s4078_s6 + $0x8] sm:$0xff]   ;;  %v2979_v20 = vld [vmem:[%s4078_s6 + $0x10] sm:$0xff]  }
  0x33   : > { %2730 = vmatpush3.bf16.msra.mxu0 %v2970_v32  ;;  %v3535_v26 = vand.u32 127, %v563_v23  ;;  %v2982_v23 = vld [vmem:[%s4078_s6 + $0x28] sm:$0xff]  }
  0x34   : > { %2747 = vmatprep.subr.bf16.mxu0 %v2971_v44 }
  0x35   : > { %693 = vperm.xlu1 %2962, %v666_v27   ;;  %690 = vperm.xlu0 %2961, %v665_v28  }
  0x36   : > { %2732 = vmatmul.mubr.bf16.vlgmr.msra.gmra.mrb[0].mxu0 %v826_v45 }
  0x37   : > { %2735 = vmatprep.mubr.bf16.mxu0 %v827_v47  ;;  %2748 = vmatpush3.bf16.msra.mxu0 %v2971_v44 }
  0x38   : > { %2749 = vmatprep.subr.bf16.mxu0 %v2972_v46 }
  0x39   : > { %619 = vperm.xlu1 %2962, %v572_v33   ;;  %616 = vperm.xlu0 %2961, %v571_v34  }
  0x3b   : > { %2750 = vmatpush3.bf16.msra.mxu0 %v2972_v46 }
  0x3c   : > { %2751 = vmatprep.subr.bf16.mxu0 %v2973_v54 }
  0x3d   : > { %699 = vperm.xlu1 %2962, %v668_v36   ;;  %696 = vperm.xlu0 %2961, %v667_v37  }
  0x3e   : > { %2736 = vmatmul.mubr.bf16.gmra.mrb[4].mxu0 %v828_v55 }
  0x3f   : > { %2739 = vmatprep.mubr.bf16.mxu0 %v829_v56  ;;  %2752 = vmatpush3.bf16.msra.mxu0 %v2973_v54 }
  0x40   : > { %2753 = vmatprep.subr.bf16.mxu0 %v2974_v57 }
  0x41   : > { %625 = vperm.xlu1 %2962, %v574_v48   ;;  %622 = vperm.xlu0 %2961, %v573_v49  }
  0x43   : > { %2754 = vmatpush3.bf16.msra.mxu0 %v2974_v57 }
  0x44   : > { %2755 = vmatprep.subr.bf16.mxu0 %v2975_v2 }
  0x45   : > { %705 = vperm.xlu1 %2962, %v670_v40   ;;  %702 = vperm.xlu0 %2961, %v669_v43  }
  0x46   : > { %2740 = vmatmul.mubr.bf16.gmra.mrb[8].mxu0 %v830_v5 }
  0x47   : > { %2743 = vmatprep.mubr.bf16.mxu0 %v831_v6  ;;  %2756 = vmatpush3.bf16.msra.mxu0 %v2975_v2 }
  0x48   : > { %2757 = vmatprep.subr.bf16.mxu0 %v2976_v7 }
  0x49   : > { %631 = vperm.xlu1 %2962, %v576_v58   ;;  %628 = vperm.xlu0 %2961, %v575_v59  }
  0x4b   : > { %2758 = vmatpush3.bf16.msra.mxu0 %v2976_v7 }
  0x4d   : > { %711 = vperm.xlu1 %2962, %v672_v3   ;;  %708 = vperm.xlu0 %2961, %v671_v4  }
  0x4e   : > { %2744 = vmatmul.mubr.bf16.gmra.mrb[12].mxu0 %v832_v16 }
  0x51   : > { %637 = vperm.xlu1 %2962, %v578_v8   ;;  %634 = vperm.xlu0 %2961, %v577_v9  }
  0x55   : > { %717 = vperm.xlu1 %2962, %v674_v14   ;;  %714 = vperm.xlu0 %2961, %v673_v15  }
  0x59   : > { %643 = vperm.xlu1 %2962, %v580_v17   ;;  %640 = vperm.xlu0 %2961, %v579_v18   ;;  %v2977_v18 = vld [vmem:[%s4078_s6] sm:$0xff]  }
  0x5a   : > { %2775 = vmatprep.subr.bf16.mxu1 %v2977_v18 }
  0x5b   : > { %2776 = vmatpush3.bf16.msra.mxu1 %v2977_v18 }
  0x5c   : > { %2777 = vmatprep.subr.bf16.mxu1 %v2978_v19 }
  0x5d   : > { %723 = vperm.xlu1 %2962, %v676_v21   ;;  %720 = vperm.xlu0 %2961, %v675_v22   ;;  %v2980_v21 = vld [vmem:[%s4078_s6 + $0x18] sm:$0xff]   ;;  %v2981_v22 = vld [vmem:[%s4078_s6 + $0x20] sm:$0xff]  }
  0x5f   : > { %2778 = vmatpush3.bf16.msra.mxu1 %v2978_v19 }
  0x60   : > { %2779 = vmatprep.subr.bf16.mxu1 %v2979_v20 }
  0x63   : > { %2780 = vmatpush3.bf16.msra.mxu1 %v2979_v20 }
  0x64   : > { %2781 = vmatprep.subr.bf16.mxu1 %v2980_v21 }
  0x67   : > { %2782 = vmatpush3.bf16.msra.mxu1 %v2980_v21 }
  0x68   : > { %2783 = vmatprep.subr.bf16.mxu1 %v2981_v22 }
  0x6b   : > { %2784 = vmatpush3.bf16.msra.mxu1 %v2981_v22 }
  0x6c   : > { %2785 = vmatprep.subr.bf16.mxu1 %v2982_v23 }
  0x6f   : > { %2786 = vmatpush3.bf16.msra.mxu1 %v2982_v23 }
  0xa0   : > { %v608_v24 = vpop.permute.xlu1 %607  ;;  %v599_v25 = vpop.permute.xlu0 %598 }
  0xa1   : > { %vm645_vm1 = vcmp.eq.s32.totalorder %v3535_v26, %v599_v25  ;;  %vm648_vm7 = vcmp.eq.s32.totalorder %v3535_v26, %v608_v24  ;;  %v2983_v24 = vld [vmem:[%s4078_s6 + $0x30] sm:$0xff]   ;;  %v2984_v25 = vld [vmem:[%s4078_s6 + $0x38] sm:$0xff]  }
  0xa2   : > { %2787 = vmatprep.subr.bf16.mxu1 %v2983_v24 }
  0xa3   : > { %2788 = vmatpush3.bf16.msra.mxu1 %v2983_v24 }
  0xa4   : > { %v679_v27 = vpop.permute.xlu1 %678  ;;  %v602_v28 = vpop.permute.xlu0 %601  ;;  %2789 = vmatprep.subr.bf16.mxu1 %v2984_v25 }
  0xa5   : > { %vm725_vm0 = vcmp.eq.s32.totalorder %v3535_v26, %v679_v27  ;;  %vm646_vm3 = vcmp.eq.s32.totalorder %v3535_v26, %v602_v28 }
  0xa6   : > { %vm741_vm2 = vmor %vm645_vm1, %vm725_vm0 }
  0xa7   : > { %v2455_v32 = vsel %vm741_vm2, 1.0, %v3298_v31  ;;  %2790 = vmatpush3.bf16.msra.mxu1 %v2984_v25 }
  0xa8   : > { %v682_v29 = vpop.permute.xlu1 %681  ;;  %v605_v30 = vpop.permute.xlu0 %604 }
  0xa9   : > { %vm726_vm4 = vcmp.eq.s32.totalorder %v3535_v26, %v682_v29  ;;  %vm647_vm10 = vcmp.eq.s32.totalorder %v3535_v26, %v605_v30 }
  0xaa   : > { %vm742_vm5 = vmor %vm646_vm3, %vm726_vm4 }
  0xab   : > { %v2456_v33 = vsel %vm742_vm5, 1.0, %v3298_v31 }
  0xac   : > { %v789_v34 = vpack.c.bf16 %v2456_v33, %v2455_v32  ;;  %v688_v35 = vpop.permute.xlu1 %687  ;;  %v685_v36 = vpop.permute.xlu0 %684 }
  0xad   : > { %vm728_vm8 = vcmp.eq.s32.totalorder %v3535_v26, %v688_v35  ;;  %vm727_vm9 = vcmp.eq.s32.totalorder %v3535_v26, %v685_v36 }
  0xae   : > { %vm744_vm11 = vmor %vm648_vm7, %vm728_vm8  ;;  %2759 = vmatprep.mubr.msk.bf16.mxu0 %vm1030_vm6, %v789_v34 }
  0xaf   : > { %v2458_v37 = vsel %vm744_vm11, 1.0, %v3298_v31  ;;  %vm743_vm12 = vmor %vm647_vm10, %vm727_vm9 }
  0xb0   : > { %v2457_v38 = vsel %vm743_vm12, 1.0, %v3298_v31  ;;  %v614_v39 = vpop.permute.xlu1 %613  ;;  %v611_v40 = vpop.permute.xlu0 %610 }
  0xb1   : > { %v790_v41 = vpack.c.bf16 %v2458_v37, %v2457_v38  ;;  %vm650_vm13 = vcmp.eq.s32.totalorder %v3535_v26, %v614_v39  ;;  %vm649_vm0 = vcmp.eq.s32.totalorder %v3535_v26, %v611_v40 }
  0xb3   : > { %2760 = vmatmul.mubr.msk.bf16.vlgmr.msra.gmra.mrb[0].mxu0 %vm1030_vm6, %v790_v41 }
  0xb4   : > { %v694_v42 = vpop.permute.xlu1 %693  ;;  %v691_v43 = vpop.permute.xlu0 %690 }
  0xb5   : > { %vm730_vm14 = vcmp.eq.s32.totalorder %v3535_v26, %v694_v42  ;;  %vm729_vm15 = vcmp.eq.s32.totalorder %v3535_v26, %v691_v43 }
  0xb6   : > { %vm746_vm1 = vmor %vm650_vm13, %vm730_vm14 }
  0xb7   : > { %v2460_v44 = vsel %vm746_vm1, 1.0, %v3298_v31  ;;  %vm745_vm2 = vmor %vm649_vm0, %vm729_vm15 }
  0xb8   : > { %v2459_v45 = vsel %vm745_vm2, 1.0, %v3298_v31  ;;  %v620_v46 = vpop.permute.xlu1 %619  ;;  %v617_v47 = vpop.permute.xlu0 %616 }
  0xb9   : > { %v791_v48 = vpack.c.bf16 %v2460_v44, %v2459_v45  ;;  %vm652_vm3 = vcmp.eq.s32.totalorder %v3535_v26, %v620_v46  ;;  %vm651_vm7 = vcmp.eq.s32.totalorder %v3535_v26, %v617_v47 }
  0xbb   : > { %2763 = vmatprep.mubr.msk.bf16.mxu0 %vm1030_vm6, %v791_v48 }
  0xbc   : > { %v700_v49 = vpop.permute.xlu1 %699  ;;  %v697_v50 = vpop.permute.xlu0 %696 }
  0xbd   : > { %vm732_vm4 = vcmp.eq.s32.totalorder %v3535_v26, %v700_v49  ;;  %vm731_vm5 = vcmp.eq.s32.totalorder %v3535_v26, %v697_v50 }
  0xbe   : > { %vm748_vm8 = vmor %vm652_vm3, %vm732_vm4 }
  0xbf   : > { %v2462_v51 = vsel %vm748_vm8, 1.0, %v3298_v31  ;;  %vm747_vm9 = vmor %vm651_vm7, %vm731_vm5 }
  0xc0   : > { %v2461_v52 = vsel %vm747_vm9, 1.0, %v3298_v31  ;;  %v626_v53 = vpop.permute.xlu1 %625  ;;  %v623_v54 = vpop.permute.xlu0 %622 }
  0xc1   : > { %v792_v55 = vpack.c.bf16 %v2462_v51, %v2461_v52  ;;  %vm654_vm10 = vcmp.eq.s32.totalorder %v3535_v26, %v626_v53  ;;  %vm653_vm13 = vcmp.eq.s32.totalorder %v3535_v26, %v623_v54 }
  0xc3   : > { %2764 = vmatmul.mubr.msk.bf16.gmra.mrb[4].mxu0 %vm1030_vm6, %v792_v55 }
  0xc4   : > { %v706_v56 = vpop.permute.xlu1 %705  ;;  %v703_v57 = vpop.permute.xlu0 %702 }
  0xc5   : > { %vm734_vm11 = vcmp.eq.s32.totalorder %v3535_v26, %v706_v56  ;;  %vm733_vm12 = vcmp.eq.s32.totalorder %v3535_v26, %v703_v57 }
  0xc6   : > { %vm750_vm14 = vmor %vm654_vm10, %vm734_vm11 }
  0xc7   : > { %v2464_v58 = vsel %vm750_vm14, 1.0, %v3298_v31  ;;  %vm749_vm15 = vmor %vm653_vm13, %vm733_vm12 }
  0xc8   : > { %v2463_v59 = vsel %vm749_vm15, 1.0, %v3298_v31  ;;  %v632_v60 = vpop.permute.xlu1 %631  ;;  %v629_v61 = vpop.permute.xlu0 %628 }
  0xc9   : > { %v793_v62 = vpack.c.bf16 %v2464_v58, %v2463_v59  ;;  %vm656_vm0 = vcmp.eq.s32.totalorder %v3535_v26, %v632_v60  ;;  %vm655_vm3 = vcmp.eq.s32.totalorder %v3535_v26, %v629_v61 }
  0xcb   : > { %2767 = vmatprep.mubr.msk.bf16.mxu0 %vm1030_vm6, %v793_v62 }
  0xcc   : > { %v712_v63 = vpop.permute.xlu1 %711  ;;  %v709_v0 = vpop.permute.xlu0 %708 }
  0xcd   : > { %vm736_vm1 = vcmp.eq.s32.totalorder %v3535_v26, %v712_v63  ;;  %vm735_vm2 = vcmp.eq.s32.totalorder %v3535_v26, %v709_v0 }
  0xce   : > { %vm752_vm4 = vmor %vm656_vm0, %vm736_vm1 }
  0xcf   : > { %v2466_v1 = vsel %vm752_vm4, 1.0, %v3298_v31  ;;  %vm751_vm5 = vmor %vm655_vm3, %vm735_vm2 }
  0xd0   : > { %v2465_v2 = vsel %vm751_vm5, 1.0, %v3298_v31  ;;  %v638_v3 = vpop.permute.xlu1 %637  ;;  %v635_v4 = vpop.permute.xlu0 %634 }
  0xd1   : > { %v794_v5 = vpack.c.bf16 %v2466_v1, %v2465_v2  ;;  %vm658_vm7 = vcmp.eq.s32.totalorder %v3535_v26, %v638_v3  ;;  %vm657_vm10 = vcmp.eq.s32.totalorder %v3535_v26, %v635_v4 }
  0xd3   : > { %2768 = vmatmul.mubr.msk.bf16.gmra.mrb[8].mxu0 %vm1030_vm6, %v794_v5 }
  0xd4   : > { %v718_v6 = vpop.permute.xlu1 %717  ;;  %v715_v7 = vpop.permute.xlu0 %714 }
  0xd5   : > { %vm738_vm8 = vcmp.eq.s32.totalorder %v3535_v26, %v718_v6  ;;  %vm737_vm9 = vcmp.eq.s32.totalorder %v3535_v26, %v715_v7 }
  0xd6   : > { %vm754_vm11 = vmor %vm658_vm7, %vm738_vm8 }
  0xd7   : > { %v2468_v8 = vsel %vm754_vm11, 1.0, %v3298_v31  ;;  %vm753_vm12 = vmor %vm657_vm10, %vm737_vm9 }
  0xd8   : > { %v2467_v9 = vsel %vm753_vm12, 1.0, %v3298_v31  ;;  %v644_v10 = vpop.permute.xlu1 %643  ;;  %v641_v11 = vpop.permute.xlu0 %640 }
  0xd9   : > { %v795_v12 = vpack.c.bf16 %v2468_v8, %v2467_v9  ;;  %vm660_vm13 = vcmp.eq.s32.totalorder %v3535_v26, %v644_v10  ;;  %vm659_vm0 = vcmp.eq.s32.totalorder %v3535_v26, %v641_v11 }
  0xdb   : > { %2771 = vmatprep.mubr.msk.bf16.mxu0 %vm1030_vm6, %v795_v12 }
  0xdc   : > { %v724_v13 = vpop.permute.xlu1 %723  ;;  %v721_v14 = vpop.permute.xlu0 %720 }
  0xdd   : > { %vm740_vm14 = vcmp.eq.s32.totalorder %v3535_v26, %v724_v13  ;;  %vm739_vm15 = vcmp.eq.s32.totalorder %v3535_v26, %v721_v14  ;;  %v3620_v26 = vld [vmem:[%s4077_s5] ss:$0 sm:$0xff] }
  0xde   : > { %vm756_vm1 = vmor %vm660_vm13, %vm740_vm14 }
  0xdf   : > { %v2470_v15 = vsel %vm756_vm1, 1.0, %v3298_v31  ;;  %vm755_vm2 = vmor %vm659_vm0, %vm739_vm15 }
  0xe0   : > { %v2469_v16 = vsel %vm755_vm2, 1.0, %v3298_v31 }
  0xe1   : > { %v796_v17 = vpack.c.bf16 %v2470_v15, %v2469_v16 }
  0xe3   : > { %2772 = vmatmul.mubr.msk.bf16.gmra.mrb[12].mxu0 %vm1030_vm6, %v796_v17 }
 0x186   : > { %v2761_v27 = vpop.f32.mrb[0].mxu0 }
 0x187   : > { %v1161_v28 = vadd.f32 %v2761_v27, %v3620_v26  ;;  %v1089_v29 = vpop.f32.mrb[1].mxu0 }
 0x188   : > { %v1159_v30 = vadd.f32 %v3620_v26, %v1089_v29  ;;  %v2762_v31 = vpop.f32.mrb[2].mxu0 }
 0x189   : > { %v2496_v32 = vmul.f32 -1.442695, %v1161_v28  ;;  %v1162_v33 = vadd.f32 %v2762_v31, %v3620_v26  ;;  %v1092_v34 = vpop.f32.mrb[3].mxu0 }
 0x18a   : > { %v2494_v35 = vmul.f32 -1.442695, %v1159_v30  ;;  %v1160_v36 = vadd.f32 %v3620_v26, %v1092_v34 }
 0x18b   : > { %2993 = vpow2.f32 %v2496_v32  ;;  %v2497_v37 = vmul.f32 -1.442695, %v1162_v33 }
 0x18c   : > { %2995 = vpow2.f32 %v2494_v35  ;;  %v2495_v38 = vmul.f32 -1.442695, %v1160_v36 }
 0x18d   : > { %2997 = vpow2.f32 %v2497_v37 }
 0x18e   : > { %2999 = vpow2.f32 %v2495_v38 }
 0x195   : > { %v2994_v39 = vpop.eup %2993 }
 0x196   : > { %v2996_v40 = vpop.eup %2995  ;;  %v1225_v41 = vadd.f32 1.0, %v2994_v39  ;;  %v2765_v42 = vpop.f32.mrb[4].mxu0 }
 0x197   : > { %v2998_v43 = vpop.eup %2997  ;;  %v1223_v44 = vadd.f32 1.0, %v2996_v40  ;;  %v3627_v45 = vadd.f32 %v2765_v42, %v3620_v26  ;;  %v1105_v46 = vpop.f32.mrb[5].mxu0 }
 0x198   : > { %v3000_v47 = vpop.eup %2999  ;;  %3001 = vrcp.f32 %v1225_v41  ;;  %v1226_v48 = vadd.f32 1.0, %v2998_v43  ;;  %v3630_v49 = vadd.f32 %v3620_v26, %v1105_v46  ;;  %v2766_v50 = vpop.f32.mrb[6].mxu0 }
 0x199   : > { %3003 = vrcp.f32 %v1223_v44  ;;  %v1224_v51 = vadd.f32 1.0, %v3000_v47  ;;  %v2500_v52 = vmul.f32 -1.442695, %v3627_v45  ;;  %v1166_v53 = vadd.f32 %v2766_v50, %v3620_v26  ;;  %v1108_v54 = vpop.f32.mrb[7].mxu0 }
 0x19a   : > { %3005 = vrcp.f32 %v1226_v48  ;;  %v2498_v55 = vmul.f32 -1.442695, %v3630_v49  ;;  %v1164_v56 = vadd.f32 %v3620_v26, %v1108_v54 }
 0x19b   : > { %3007 = vrcp.f32 %v1224_v51  ;;  %v2501_v57 = vmul.f32 -1.442695, %v1166_v53 }
 0x19c   : > { %3009 = vpow2.f32 %v2500_v52  ;;  %v2499_v58 = vmul.f32 -1.442695, %v1164_v56 }
 0x19d   : > { %3011 = vpow2.f32 %v2498_v55 }
 0x19e   : > { %3013 = vpow2.f32 %v2501_v57 }
 0x19f   : > { %3015 = vpow2.f32 %v2499_v58 }
 0x1a2   : > { %v3002_v59 = vpop.eup %3001 }
 0x1a3   : > { %v3004_v60 = vpop.eup %3003  ;;  %v1273_v63 = vmul.f32 %v3002_v59, %v1161_v28 }
 0x1a4   : > { %v3006_v61 = vpop.eup %3005  ;;  %v1271_v3 = vmul.f32 %v3004_v60, %v1159_v30 }
 0x1a5   : > { %v3008_v62 = vpop.eup %3007  ;;  %v1274_v0 = vmul.f32 %v3006_v61, %v1162_v33 }
 0x1a6   : > { %v3010_v1 = vpop.eup %3009  ;;  %v2769_v2 = vpop.f32.mrb[8].mxu0  ;;  %v1272_v4 = vmul.f32 %v3008_v62, %v1160_v36 }
 0x1a7   : > { %v3012_v5 = vpop.eup %3011  ;;  %v1229_v6 = vadd.f32 1.0, %v3010_v1  ;;  %v3637_v7 = vadd.f32 %v2769_v2, %v3620_v26  ;;  %v1121_v8 = vpop.f32.mrb[9].mxu0  ;;  %v1288_v9 = vpack.c.bf16 %v1274_v0, %v1273_v63 }
 0x1a8   : > { %v3014_v10 = vpop.eup %3013  ;;  %v1227_v11 = vadd.f32 1.0, %v3012_v5  ;;  %v3640_v12 = vadd.f32 %v3620_v26, %v1121_v8  ;;  %v2770_v13 = vpop.f32.mrb[10].mxu0  ;;  %v1287_v14 = vpack.c.bf16 %v1272_v4, %v1271_v3 }
 0x1a9   : > { %v3016_v15 = vpop.eup %3015  ;;  %3017 = vrcp.f32 %v1229_v6  ;;  %v1230_v16 = vadd.f32 1.0, %v3014_v10  ;;  %v2504_v17 = vmul.f32 -1.442695, %v3637_v7  ;;  %v1170_v18 = vadd.f32 %v2770_v13, %v3620_v26  ;;  %v1124_v19 = vpop.f32.mrb[11].mxu0 }
 0x1aa   : > { %3019 = vrcp.f32 %v1227_v11  ;;  %v1228_v20 = vadd.f32 1.0, %v3016_v15  ;;  %v2502_v21 = vmul.f32 -1.442695, %v3640_v12  ;;  %v1168_v22 = vadd.f32 %v3620_v26, %v1124_v19  ;;  %2791 = vmatprep.mubr.bf16.mxu1 %v1287_v14  ;;  %v2985_v19 = vld [vmem:[%s4080_s8] sm:$0xff]  }
 0x1ab   : > { %3021 = vrcp.f32 %v1230_v16  ;;  %v2505_v23 = vmul.f32 -1.442695, %v1170_v18  ;;  %2792 = vmatmul.mubr.bf16.vlgmr.msra.gmra.mrb[0].mxu1 %v1288_v9  ;;  %2807 = vmatprep.subr.bf16.mxu1 %v2985_v19 }
 0x1ac   : > { %3023 = vrcp.f32 %v1228_v20  ;;  %v2503_v24 = vmul.f32 -1.442695, %v1168_v22  ;;  %2808 = vmatpush3.bf16.msra.mxu1 %v2985_v19  ;;  %v2986_v20 = vld [vmem:[%s4080_s8 + $0x8] sm:$0xff]  }
 0x1ad   : > { %3025 = vpow2.f32 %v2504_v17  ;;  %2809 = vmatprep.subr.bf16.mxu1 %v2986_v20 }
 0x1ae   : > { %3027 = vpow2.f32 %v2502_v21  ;;  %v2987_v21 = vld [vmem:[%s4080_s8 + $0x10] sm:$0xff]  }
 0x1af   : > { %3029 = vpow2.f32 %v2505_v23  ;;  %v2989_v23 = vld [vmem:[%s4080_s8 + $0x20] sm:$0xff]  }
 0x1b0   : > { %3031 = vpow2.f32 %v2503_v24  ;;  %2810 = vmatpush3.bf16.msra.mxu1 %v2986_v20  ;;  %v2990_v24 = vld [vmem:[%s4080_s8 + $0x28] sm:$0xff]  }
 0x1b1   : > { %2811 = vmatprep.subr.bf16.mxu1 %v2987_v21 }
 0x1b3   : > { %v3018_v25 = vpop.eup %3017 }
 0x1b4   : > { %v3020_v27 = vpop.eup %3019  ;;  %v1277_v30 = vmul.f32 %v3018_v25, %v3627_v45  ;;  %2812 = vmatpush3.bf16.msra.mxu1 %v2987_v21  ;;  %v2991_v25 = vld [vmem:[%s4080_s8 + $0x30] sm:$0xff]  }
 0x1b5   : > { %v3022_v28 = vpop.eup %3021  ;;  %v1275_v34 = vmul.f32 %v3020_v27, %v3630_v49  ;;  %v2992_v27 = vld [vmem:[%s4080_s8 + $0x38] sm:$0xff]  }
 0x1b6   : > { %v3024_v29 = vpop.eup %3023  ;;  %v1278_v31 = vmul.f32 %v3022_v28, %v1166_v53  ;;  %v2773_v32 = vpop.f32.mrb[12].mxu0  ;;  %v3681_v28 = vld [vmem:[%s4079_s7] ss:$0 sm:$0xff] }
 0x1b7   : > { %v3026_v33 = vpop.eup %3025  ;;  %v1276_v35 = vmul.f32 %v3024_v29, %v1164_v56  ;;  %v1173_v36 = vadd.f32 %v2773_v32, %v3620_v26  ;;  %v1137_v37 = vpop.f32.mrb[13].mxu0 }
 0x1b8   : > { %v3028_v38 = vpop.eup %3027  ;;  %v1233_v39 = vadd.f32 1.0, %v3026_v33  ;;  %v1171_v40 = vadd.f32 %v3620_v26, %v1137_v37  ;;  %v2774_v41 = vpop.f32.mrb[14].mxu0  ;;  %v1290_v42 = vpack.c.bf16 %v1278_v31, %v1277_v30 }
 0x1b9   : > { %v3030_v43 = vpop.eup %3029  ;;  %v1231_v44 = vadd.f32 1.0, %v3028_v38  ;;  %v1174_v46 = vadd.f32 %v2774_v41, %v3620_v26  ;;  %v1140_v45 = vpop.f32.mrb[15].mxu0  ;;  %v1289_v47 = vpack.c.bf16 %v1276_v35, %v1275_v34  ;;  %v2508_v49 = vmul.f32 -1.442695, %v1173_v36 }
 0x1ba   : > { %v3032_v48 = vpop.eup %3031  ;;  %3033 = vrcp.f32 %v1233_v39  ;;  %v1234_v50 = vadd.f32 1.0, %v3030_v43  ;;  %v1172_v51 = vadd.f32 %v3620_v26, %v1140_v45  ;;  %v2506_v53 = vmul.f32 -1.442695, %v1171_v40 }
 0x1bb   : > { %3035 = vrcp.f32 %v1231_v44  ;;  %v1232_v52 = vadd.f32 1.0, %v3032_v48  ;;  %2795 = vmatprep.mubr.bf16.mxu1 %v1289_v47  ;;  %v2509_v54 = vmul.f32 -1.442695, %v1174_v46 }
 0x1bc   : > { %3037 = vrcp.f32 %v1234_v50  ;;  %2796 = vmatmul.mubr.bf16.gmra.mrb[4].mxu1 %v1290_v42  ;;  %v2507_v55 = vmul.f32 -1.442695, %v1172_v51 }
 0x1bd   : > { %3039 = vrcp.f32 %v1232_v52 }
 0x1be   : > { %3041 = vpow2.f32 %v2508_v49 }
 0x1bf   : > { %3043 = vpow2.f32 %v2506_v53 }
 0x1c0   : > { %3045 = vpow2.f32 %v2509_v54 }
 0x1c1   : > { %3047 = vpow2.f32 %v2507_v55 }
 0x1c4   : > { %v3034_v56 = vpop.eup %3033 }
 0x1c5   : > { %v3036_v57 = vpop.eup %3035  ;;  %v1281_v60 = vmul.f32 %v3034_v56, %v3637_v7 }
 0x1c6   : > { %v3038_v58 = vpop.eup %3037  ;;  %v1279_v62 = vmul.f32 %v3036_v57, %v3640_v12 }
 0x1c7   : > { %v3040_v59 = vpop.eup %3039  ;;  %v1282_v26 = vmul.f32 %v3038_v58, %v1170_v18 }
 0x1c8   : > { %v3042_v61 = vpop.eup %3041  ;;  %v1280_v63 = vmul.f32 %v3040_v59, %v1168_v22  ;;  %v2988_v22 = vld [vmem:[%s4080_s8 + $0x18] sm:$0xff]  }
 0x1c9   : > { %v3044_v0 = vpop.eup %3043  ;;  %v1237_v1 = vadd.f32 1.0, %v3042_v61  ;;  %v1292_v2 = vpack.c.bf16 %v1282_v26, %v1281_v60  ;;  %2813 = vmatprep.subr.bf16.mxu1 %v2988_v22 }
 0x1ca   : > { %v3046_v3 = vpop.eup %3045  ;;  %v1235_v4 = vadd.f32 1.0, %v3044_v0  ;;  %v1291_v5 = vpack.c.bf16 %v1280_v63, %v1279_v62  ;;  %2814 = vmatpush3.bf16.msra.mxu1 %v2988_v22 }
 0x1cb   : > { %v3048_v6 = vpop.eup %3047  ;;  %3049 = vrcp.f32 %v1237_v1  ;;  %v1238_v8 = vadd.f32 1.0, %v3046_v3  ;;  %2815 = vmatprep.subr.bf16.mxu1 %v2989_v23 }
 0x1cc   : > { %3051 = vrcp.f32 %v1235_v4  ;;  %v1236_v9 = vadd.f32 1.0, %v3048_v6  ;;  %2799 = vmatprep.mubr.bf16.mxu1 %v1291_v5 }
 0x1cd   : > { %3053 = vrcp.f32 %v1238_v8  ;;  %2800 = vmatmul.mubr.bf16.gmra.mrb[8].mxu1 %v1292_v2 }
 0x1ce   : > { %3055 = vrcp.f32 %v1236_v9  ;;  %2816 = vmatpush3.bf16.msra.mxu1 %v2989_v23 }
 0x1cf   : > { %2817 = vmatprep.subr.bf16.mxu1 %v2990_v24 }
 0x1d2   : > { %2818 = vmatpush3.bf16.msra.mxu1 %v2990_v24 }
 0x1d3   : > { %2819 = vmatprep.subr.bf16.mxu1 %v2991_v25 }
 0x1d5   : > { %v3050_v7 = vpop.eup %3049 }
 0x1d6   : > { %v3052_v10 = vpop.eup %3051  ;;  %v1285_v13 = vmul.f32 %v3050_v7, %v1173_v36  ;;  %2820 = vmatpush3.bf16.msra.mxu1 %v2991_v25 }
 0x1d7   : > { %v3054_v11 = vpop.eup %3053  ;;  %v1283_v15 = vmul.f32 %v3052_v10, %v1171_v40  ;;  %2821 = vmatprep.subr.bf16.mxu1 %v2992_v27 }
 0x1d8   : > { %v3056_v12 = vpop.eup %3055  ;;  %v1286_v14 = vmul.f32 %v3054_v11, %v1174_v46 }
 0x1d9   : > { %v1284_v16 = vmul.f32 %v3056_v12, %v1172_v51 }
 0x1da   : > { %v1294_v17 = vpack.c.bf16 %v1286_v14, %v1285_v13  ;;  %2822 = vmatpush3.bf16.msra.mxu1 %v2992_v27 }
 0x1db   : > { %v1293_v18 = vpack.c.bf16 %v1284_v16, %v1283_v15 }
 0x1dd   : > { %2803 = vmatprep.mubr.bf16.mxu1 %v1293_v18 }
 0x1de   : > { %2804 = vmatmul.mubr.bf16.gmra.mrb[12].mxu1 %v1294_v17 }
 0x27e   : > { %v2793_v29 = vpop.f32.mrb[0].mxu1 }
 0x27f   : > { %v1409_v30 = vadd.f32 %v2793_v29, %v3681_v28  ;;  %v1400_v31 = vpop.f32.mrb[1].mxu1 }
 0x280   : > { %v1401_v32 = vadd.f32 %v3681_v28, %v1400_v31  ;;  %v2794_v33 = vpop.f32.mrb[2].mxu1 }
 0x281   : > { %v2521_v34 = vmul.f32 -1.442695, %v1409_v30  ;;  %v1412_v35 = vadd.f32 %v2794_v33, %v3681_v28  ;;  %v1403_v36 = vpop.f32.mrb[3].mxu1 }
 0x282   : > { %v2519_v37 = vmul.f32 -1.442695, %v1401_v32  ;;  %v1404_v38 = vadd.f32 %v3681_v28, %v1403_v36 }
 0x283   : > { %3057 = vpow2.f32 %v2521_v34  ;;  %v2522_v39 = vmul.f32 -1.442695, %v1412_v35 }
 0x284   : > { %3059 = vpow2.f32 %v2519_v37  ;;  %v2520_v40 = vmul.f32 -1.442695, %v1404_v38 }
 0x285   : > { %3061 = vpow2.f32 %v2522_v39 }
 0x286   : > { %3063 = vpow2.f32 %v2520_v40 }
 0x28d   : > { %v3058_v41 = vpop.eup %3057 }
 0x28e   : > { %v3060_v42 = vpop.eup %3059  ;;  %v1513_v43 = vadd.f32 1.0, %v3058_v41 }
 0x28f   : > { %v3062_v44 = vpop.eup %3061  ;;  %v1511_v46 = vadd.f32 1.0, %v3060_v42  ;;  %v2797_v45 = vpop.f32.mrb[4].mxu1 }
 0x290   : > { %v3064_v47 = vpop.eup %3063  ;;  %3065 = vrcp.f32 %v1513_v43  ;;  %v1514_v48 = vadd.f32 1.0, %v3062_v44  ;;  %v3688_v50 = vadd.f32 %v2797_v45, %v3681_v28  ;;  %v1416_v49 = vpop.f32.mrb[5].mxu1 }
 0x291   : > { %3067 = vrcp.f32 %v1511_v46  ;;  %v1512_v51 = vadd.f32 1.0, %v3064_v47  ;;  %v1417_v52 = vadd.f32 %v3681_v28, %v1416_v49  ;;  %v2798_v53 = vpop.f32.mrb[6].mxu1 }
 0x292   : > { %3069 = vrcp.f32 %v1514_v48  ;;  %v2525_v54 = vmul.f32 -1.442695, %v3688_v50  ;;  %v1428_v55 = vadd.f32 %v2798_v53, %v3681_v28  ;;  %v1419_v56 = vpop.f32.mrb[7].mxu1 }
 0x293   : > { %3071 = vrcp.f32 %v1512_v51  ;;  %v2523_v57 = vmul.f32 -1.442695, %v1417_v52  ;;  %v1420_v58 = vadd.f32 %v3681_v28, %v1419_v56 }
 0x294   : > { %3073 = vpow2.f32 %v2525_v54  ;;  %v2526_v59 = vmul.f32 -1.442695, %v1428_v55 }
 0x295   : > { %3075 = vpow2.f32 %v2523_v57  ;;  %v2524_v60 = vmul.f32 -1.442695, %v1420_v58 }
 0x296   : > { %3077 = vpow2.f32 %v2526_v59 }
 0x297   : > { %3079 = vpow2.f32 %v2524_v60 }
 0x29a   : > { %v3066_v26 = vpop.eup %3065 }
 0x29b   : > { %v3068_v61 = vpop.eup %3067  ;;  %v1561_v0 = vmul.f32 %v3066_v26, %v1409_v30 }
 0x29c   : > { %v3070_v62 = vpop.eup %3069  ;;  %v1559_v3 = vmul.f32 %v3068_v61, %v1401_v32 }
 0x29d   : > { %v3072_v63 = vpop.eup %3071  ;;  %v1562_v1 = vmul.f32 %v3070_v62, %v1412_v35 }
 0x29e   : > { %v3074_v2 = vpop.eup %3073  ;;  %v1560_v4 = vmul.f32 %v3072_v63, %v1404_v38 }
 0x29f   : > { %v3076_v5 = vpop.eup %3075  ;;  %v1576_v6 = vpack.c.bf16 %v1562_v1, %v1561_v0  ;;  %v1517_v8 = vadd.f32 1.0, %v3074_v2 }
 0x2a0   : > { %v3078_v9 = vpop.eup %3077  ;;  %v1515_v7 = vadd.f32 1.0, %v3076_v5  ;;  %v2801_v10 = vpop.f32.mrb[8].mxu1  ;;  %v1575_v11 = vpack.c.bf16 %v1560_v4, %v1559_v3 }
 0x2a1   : > { %v3080_v12 = vpop.eup %3079  ;;  %3081 = vrcp.f32 %v1517_v8  ;;  %v1518_v13 = vadd.f32 1.0, %v3078_v9  ;;  %v3695_v14 = vadd.f32 %v2801_v10, %v3681_v28  ;;  %v1432_v15 = vpop.f32.mrb[9].mxu1 }
 0x2a2   : > { %3083 = vrcp.f32 %v1515_v7  ;;  %v1516_v16 = vadd.f32 1.0, %v3080_v12  ;;  %v3698_v17 = vadd.f32 %v3681_v28, %v1432_v15  ;;  %v2802_v18 = vpop.f32.mrb[10].mxu1  ;;  %2823 = vmatprep.mubr.bf16.mxu1 %v1575_v11 }
 0x2a3   : > { %3085 = vrcp.f32 %v1518_v13  ;;  %v2529_v19 = vmul.f32 -1.442695, %v3695_v14  ;;  %v1444_v20 = vadd.f32 %v2802_v18, %v3681_v28  ;;  %v1435_v21 = vpop.f32.mrb[11].mxu1  ;;  %2824 = vmatmul.mubr.bf16.vlgmr.msra.gmra.mrb[16].mxu1 %v1576_v6 }
 0x2a4   : > { %3087 = vrcp.f32 %v1516_v16  ;;  %v2527_v22 = vmul.f32 -1.442695, %v3698_v17  ;;  %v1436_v23 = vadd.f32 %v3681_v28, %v1435_v21 }
 0x2a5   : > { %3089 = vpow2.f32 %v2529_v19  ;;  %v2530_v24 = vmul.f32 -1.442695, %v1444_v20 }
 0x2a6   : > { %3091 = vpow2.f32 %v2527_v22  ;;  %v2528_v25 = vmul.f32 -1.442695, %v1436_v23 }
 0x2a7   : > { %3093 = vpow2.f32 %v2530_v24 }
 0x2a8   : > { %3095 = vpow2.f32 %v2528_v25 }
 0x2ab   : > { %v3082_v27 = vpop.eup %3081 }
 0x2ac   : > { %v3084_v29 = vpop.eup %3083  ;;  %v1565_v32 = vmul.f32 %v3082_v27, %v3688_v50 }
 0x2ad   : > { %v3086_v30 = vpop.eup %3085  ;;  %v1563_v35 = vmul.f32 %v3084_v29, %v1417_v52 }
 0x2ae   : > { %v3088_v31 = vpop.eup %3087  ;;  %v1566_v33 = vmul.f32 %v3086_v30, %v1428_v55 }
 0x2af   : > { %v3090_v34 = vpop.eup %3089  ;;  %v1564_v36 = vmul.f32 %v3088_v31, %v1420_v58 }
 0x2b0   : > { %v3092_v37 = vpop.eup %3091  ;;  %v1521_v38 = vadd.f32 1.0, %v3090_v34  ;;  %v1578_v39 = vpack.c.bf16 %v1566_v33, %v1565_v32 }
 0x2b1   : > { %v3094_v40 = vpop.eup %3093  ;;  %v1519_v41 = vadd.f32 1.0, %v3092_v37  ;;  %v2805_v42 = vpop.f32.mrb[12].mxu1  ;;  %v1577_v43 = vpack.c.bf16 %v1564_v36, %v1563_v35 }
 0x2b2   : > { %v3096_v44 = vpop.eup %3095  ;;  %3097 = vrcp.f32 %v1521_v38  ;;  %v1522_v46 = vadd.f32 1.0, %v3094_v40  ;;  %v1457_v45 = vadd.f32 %v2805_v42, %v3681_v28  ;;  %v1448_v47 = vpop.f32.mrb[13].mxu1 }
 0x2b3   : > { %3099 = vrcp.f32 %v1519_v41  ;;  %v1520_v48 = vadd.f32 1.0, %v3096_v44  ;;  %v1449_v50 = vadd.f32 %v3681_v28, %v1448_v47  ;;  %v2806_v49 = vpop.f32.mrb[14].mxu1  ;;  %2827 = vmatprep.mubr.bf16.mxu1 %v1577_v43 }
 0x2b4   : > { %3101 = vrcp.f32 %v1522_v46  ;;  %v2533_v51 = vmul.f32 -1.442695, %v1457_v45  ;;  %v1460_v52 = vadd.f32 %v2806_v49, %v3681_v28  ;;  %v1451_v53 = vpop.f32.mrb[15].mxu1  ;;  %2828 = vmatmul.mubr.bf16.gmra.mrb[20].mxu1 %v1578_v39 }
 0x2b5   : > { %3103 = vrcp.f32 %v1520_v48  ;;  %v2531_v54 = vmul.f32 -1.442695, %v1449_v50  ;;  %v1452_v55 = vadd.f32 %v3681_v28, %v1451_v53 }
 0x2b6   : > { %3105 = vpow2.f32 %v2533_v51  ;;  %v2534_v56 = vmul.f32 -1.442695, %v1460_v52 }
 0x2b7   : > { %3107 = vpow2.f32 %v2531_v54  ;;  %v2532_v57 = vmul.f32 -1.442695, %v1452_v55 }
 0x2b8   : > { %3109 = vpow2.f32 %v2534_v56 }
 0x2b9   : > { %3111 = vpow2.f32 %v2532_v57 }
 0x2bc   : > { %v3098_v58 = vpop.eup %3097 }
 0x2bd   : > { %v3100_v59 = vpop.eup %3099  ;;  %v1569_v61 = vmul.f32 %v3098_v58, %v3695_v14 }
 0x2be   : > { %v3102_v60 = vpop.eup %3101  ;;  %v1567_v0 = vmul.f32 %v3100_v59, %v3698_v17 }
 0x2bf   : > { %v3104_v26 = vpop.eup %3103  ;;  %v1570_v62 = vmul.f32 %v3102_v60, %v1444_v20  ;;  %v2535_v20 = vld [vmem:[%s4081_s9] ss:$0 sm:$0xff] }
 0x2c0   : > { %v3106_v63 = vpop.eup %3105  ;;  %v1568_v1 = vmul.f32 %v3104_v26, %v1436_v23 }
 0x2c1   : > { %v3108_v2 = vpop.eup %3107  ;;  %v1525_v3 = vadd.f32 1.0, %v3106_v63  ;;  %v1580_v28 = vpack.c.bf16 %v1570_v62, %v1569_v61 }
 0x2c2   : > { %v3110_v4 = vpop.eup %3109  ;;  %v1523_v5 = vadd.f32 1.0, %v3108_v2  ;;  %v1579_v6 = vpack.c.bf16 %v1568_v1, %v1567_v0 }
 0x2c3   : > { %v3112_v8 = vpop.eup %3111  ;;  %3113 = vrcp.f32 %v1525_v3  ;;  %v1526_v9 = vadd.f32 1.0, %v3110_v4 }
 0x2c4   : > { %3115 = vrcp.f32 %v1523_v5  ;;  %v1524_v7 = vadd.f32 1.0, %v3112_v8  ;;  %2831 = vmatprep.mubr.bf16.mxu1 %v1579_v6 }
 0x2c5   : > { %3117 = vrcp.f32 %v1526_v9  ;;  %2832 = vmatmul.mubr.bf16.gmra.mrb[24].mxu1 %v1580_v28 }
 0x2c6   : > { %3119 = vrcp.f32 %v1524_v7 }
 0x2cd   : > { %v3114_v10 = vpop.eup %3113 }
 0x2ce   : > { %v3116_v11 = vpop.eup %3115  ;;  %v1573_v14 = vmul.f32 %v3114_v10, %v1457_v45 }
 0x2cf   : > { %v3118_v12 = vpop.eup %3117  ;;  %v1571_v16 = vmul.f32 %v3116_v11, %v1449_v50 }
 0x2d0   : > { %v3120_v13 = vpop.eup %3119  ;;  %v1574_v15 = vmul.f32 %v3118_v12, %v1460_v52 }
 0x2d1   : > { %v1572_v17 = vmul.f32 %v3120_v13, %v1452_v55 }
 0x2d2   : > { %v1582_v18 = vpack.c.bf16 %v1574_v15, %v1573_v14 }
 0x2d3   : > { %v1581_v19 = vpack.c.bf16 %v1572_v17, %v1571_v16 }
 0x2d5   : > { %2835 = vmatprep.mubr.bf16.mxu1 %v1581_v19 }
 0x2d6   : > { %2836 = vmatmul.mubr.bf16.gmra.mrb[28].mxu1 %v1582_v18 }
 0x376   : > { %v2825_v21 = vpop.f32.mrb[16].mxu1 }
 0x377   : > { %v1697_v22 = vadd.f32 %v2825_v21, %v2535_v20  ;;  %v1688_v23 = vpop.f32.mrb[17].mxu1 }
 0x378   : > { %v2826_v24 = vpop.f32.mrb[18].mxu1  ;;  %v1689_v29 = vadd.f32 %v2535_v20, %v1688_v23 }
 0x379   : > { %1757 = vadd.xlane.f32.xlu0 %v1697_v22  ;;  %v1691_v25 = vpop.f32.mrb[19].mxu1  ;;  %v1700_v30 = vadd.f32 %v2826_v24, %v2535_v20 }
 0x37a   : > { %v1692_v27 = vadd.f32 %v2535_v20, %v1691_v25 }
 0x37c   : > { %1755 = vadd.xlane.f32.xlu1 %v1692_v27 }
 0x37d   : > { %1753 = vadd.xlane.f32.xlu0 %v1689_v29 }
 0x381   : > { %1759 = vadd.xlane.f32.xlu0 %v1700_v30 }
 0x387   : > { %v2829_v31 = vpop.f32.mrb[20].mxu1 }
 0x388   : > { %v1713_v32 = vadd.f32 %v2829_v31, %v2535_v20  ;;  %v1704_v33 = vpop.f32.mrb[21].mxu1 }
 0x389   : > { %v2830_v34 = vpop.f32.mrb[22].mxu1  ;;  %v1705_v37 = vadd.f32 %v2535_v20, %v1704_v33 }
 0x38a   : > { %v1716_v35 = vadd.f32 %v2830_v34, %v2535_v20  ;;  %v1707_v36 = vpop.f32.mrb[23].mxu1  ;;  %1765 = vadd.xlane.f32.xlu1 %v1713_v32 }
 0x38b   : > { %v1708_v38 = vadd.f32 %v2535_v20, %v1707_v36 }
 0x38c   : > { %1767 = vadd.xlane.f32.xlu0 %v1716_v35 }
 0x38e   : > { %1761 = vadd.xlane.f32.xlu1 %v1705_v37 }
 0x390   : > { %1763 = vadd.xlane.f32.xlu0 %v1708_v38 }
 0x398   : > { %v2833_v39 = vpop.f32.mrb[24].mxu1 }
 0x399   : > { %v3714_v40 = vadd.f32 %v2833_v39, %v2535_v20  ;;  %v1720_v41 = vpop.f32.mrb[25].mxu1 }
 0x39a   : > { %v2834_v42 = vpop.f32.mrb[26].mxu1  ;;  %v3719_v46 = vadd.f32 %v2535_v20, %v1720_v41 }
 0x39b   : > { %v3716_v43 = vadd.f32 %v2834_v42, %v2535_v20  ;;  %v1723_v44 = vpop.f32.mrb[27].mxu1  ;;  %1773 = vadd.xlane.f32.xlu1 %v3714_v40 }
 0x39c   : > { %v3722_v45 = vadd.f32 %v2535_v20, %v1723_v44 }
 0x39d   : > { %1775 = vadd.xlane.f32.xlu0 %v3716_v43 }
 0x39f   : > { %1769 = vadd.xlane.f32.xlu1 %v3719_v46 }
 0x3a1   : > { %1771 = vadd.xlane.f32.xlu0 %v3722_v45 }
 0x3a9   : > { %v2837_v47 = vpop.f32.mrb[28].mxu1 }
 0x3aa   : > { %v1736_v48 = vpop.f32.mrb[29].mxu1  ;;  %v3731_v53 = vadd.f32 %v2837_v47, %v2535_v20 }
 0x3ab   : > { %v3726_v50 = vadd.f32 %v2535_v20, %v1736_v48  ;;  %v2838_v49 = vpop.f32.mrb[30].mxu1 }
 0x3ac   : > { %v1739_v51 = vpop.f32.mrb[31].mxu1  ;;  %v3734_v54 = vadd.f32 %v2838_v49, %v2535_v20 }
 0x3ad   : > { %v3728_v52 = vadd.f32 %v2535_v20, %v1739_v51  ;;  %1777 = vadd.xlane.f32.xlu1 %v3726_v50 }
 0x3af   : > { %1779 = vadd.xlane.f32.xlu0 %v3728_v52 }
 0x3b1   : > { %1781 = vadd.xlane.f32.xlu1 %v3731_v53 }
 0x3b3   : > { %1783 = vadd.xlane.f32.xlu0 %v3734_v54 }
 0x406   : > { %v1758_v55 = vpop.xlane.xlu0 %1757 }
 0x407   : > { %v1788_v56 = vmul.f32 0.0078125, %v1758_v55 }
 0x409   : > { %v3738_v57 = vsub.f32 %v1697_v22, %v1788_v56  ;;  %v1756_v26 = vpop.xlane.xlu1 %1755 }
 0x40a   : > { %v1754_v58 = vpop.xlane.xlu0 %1753  ;;  %v1787_v63 = vmul.f32 0.0078125, %v1756_v26 }
 0x40b   : > { %v1786_v59 = vmul.f32 0.0078125, %v1754_v58  ;;  %v1820_v60 = vmul.f32 %v3738_v57, %v3738_v57 }
 0x40c   : > { %v3748_v3 = vsub.f32 %v1692_v27, %v1787_v63 }
 0x40d   : > { %v3742_v61 = vsub.f32 %v1689_v29, %v1786_v59  ;;  %1838 = vadd.xlane.f32.xlu1 %v1820_v60 }
 0x40e   : > { %v1760_v62 = vpop.xlane.xlu0 %1759  ;;  %v1819_v5 = vmul.f32 %v3748_v3, %v3748_v3 }
 0x40f   : > { %v1789_v0 = vmul.f32 0.0078125, %v1760_v62  ;;  %v1818_v1 = vmul.f32 %v3742_v61, %v3742_v61 }
 0x411   : > { %v3746_v2 = vsub.f32 %v1700_v30, %v1789_v0  ;;  %1834 = vadd.xlane.f32.xlu1 %v1818_v1 }
 0x413   : > { %v1821_v28 = vmul.f32 %v3746_v2, %v3746_v2 }
 0x415   : > { %1840 = vadd.xlane.f32.xlu0 %v1821_v28 }
 0x417   : > { %v1766_v4 = vpop.xlane.xlu1 %1765 }
 0x418   : > { %v1792_v6 = vmul.f32 0.0078125, %v1766_v4 }
 0x419   : > { %v1768_v8 = vpop.xlane.xlu0 %1767  ;;  %1836 = vadd.xlane.f32.xlu0 %v1819_v5  ;;  %v3816_v5 = vld [vmem:[%s4082_s10] ss:$0 sm:$0xff] }
 0x41a   : > { %v3754_v9 = vsub.f32 %v1713_v32, %v1792_v6  ;;  %v1793_v7 = vmul.f32 0.0078125, %v1768_v8 }
 0x41b   : > { %v1762_v10 = vpop.xlane.xlu1 %1761 }
 0x41c   : > { %v3756_v11 = vsub.f32 %v1716_v35, %v1793_v7  ;;  %v1790_v12 = vmul.f32 0.0078125, %v1762_v10  ;;  %v1824_v13 = vmul.f32 %v3754_v9, %v3754_v9  ;;  %v3822_v7 = vld [vmem:[%s4083_s11] ss:$0 sm:$0xff] }
 0x41d   : > { %v1764_v14 = vpop.xlane.xlu0 %1763 }
 0x41e   : > { %v3760_v15 = vsub.f32 %v1705_v37, %v1790_v12  ;;  %v1791_v16 = vmul.f32 0.0078125, %v1764_v14  ;;  %1846 = vadd.xlane.f32.xlu1 %v1824_v13  ;;  %v1825_v17 = vmul.f32 %v3756_v11, %v3756_v11 }
 0x420   : > { %v3764_v18 = vsub.f32 %v1708_v38, %v1791_v16  ;;  %1848 = vadd.xlane.f32.xlu0 %v1825_v17  ;;  %v1822_v19 = vmul.f32 %v3760_v15, %v3760_v15 }
 0x422   : > { %1842 = vadd.xlane.f32.xlu1 %v1822_v19  ;;  %v1823_v20 = vmul.f32 %v3764_v18, %v3764_v18 }
 0x424   : > { %1844 = vadd.xlane.f32.xlu0 %v1823_v20 }
 0x428   : > { %v1774_v21 = vpop.xlane.xlu1 %1773 }
 0x429   : > { %v1796_v22 = vmul.f32 0.0078125, %v1774_v21 }
 0x42a   : > { %v1776_v23 = vpop.xlane.xlu0 %1775 }
 0x42b   : > { %v3771_v24 = vsub.f32 %v3714_v40, %v1796_v22  ;;  %v1797_v25 = vmul.f32 0.0078125, %v1776_v23  ;;  %v3153_v22 = vld [vmem:[%s3466_s24 + $0x10] sm:$0xff] }
 0x42c   : > { %v1770_v27 = vpop.xlane.xlu1 %1769 }
 0x42d   : > { %v3774_v29 = vsub.f32 %v3716_v43, %v1797_v25  ;;  %v1794_v30 = vmul.f32 0.0078125, %v1770_v27  ;;  %v1828_v31 = vmul.f32 %v3771_v24, %v3771_v24 }
 0x42e   : > { %v1772_v32 = vpop.xlane.xlu0 %1771 }
 0x42f   : > { %v3779_v33 = vsub.f32 %v3719_v46, %v1794_v30  ;;  %v1795_v34 = vmul.f32 0.0078125, %v1772_v32  ;;  %1854 = vadd.xlane.f32.xlu1 %v1828_v31  ;;  %v1829_v35 = vmul.f32 %v3774_v29, %v3774_v29 }
 0x431   : > { %v3784_v36 = vsub.f32 %v3722_v45, %v1795_v34  ;;  %1856 = vadd.xlane.f32.xlu0 %v1829_v35  ;;  %v1826_v37 = vmul.f32 %v3779_v33, %v3779_v33 }
 0x433   : > { %1850 = vadd.xlane.f32.xlu1 %v1826_v37  ;;  %v1827_v38 = vmul.f32 %v3784_v36, %v3784_v36 }
 0x435   : > { %1852 = vadd.xlane.f32.xlu0 %v1827_v38  ;;  %v3154_v38 = vld [vmem:[%s3466_s24] sm:$0xff] }
 0x43a   : > { %v1778_v39 = vpop.xlane.xlu1 %1777 }
 0x43b   : > { %v1798_v40 = vmul.f32 0.0078125, %v1778_v39 }
 0x43c   : > { %v1780_v41 = vpop.xlane.xlu0 %1779 }
 0x43d   : > { %v3794_v42 = vsub.f32 %v3726_v50, %v1798_v40  ;;  %v1799_v43 = vmul.f32 0.0078125, %v1780_v41 }
 0x43e   : > { %v1782_v44 = vpop.xlane.xlu1 %1781 }
 0x43f   : > { %v3797_v46 = vsub.f32 %v3728_v52, %v1799_v43  ;;  %v1800_v45 = vmul.f32 0.0078125, %v1782_v44  ;;  %v1830_v47 = vmul.f32 %v3794_v42, %v3794_v42 }
 0x440   : > { %v1784_v48 = vpop.xlane.xlu0 %1783 }
 0x441   : > { %v3802_v49 = vsub.f32 %v3731_v53, %v1800_v45  ;;  %v1801_v51 = vmul.f32 0.0078125, %v1784_v48  ;;  %1858 = vadd.xlane.f32.xlu1 %v1830_v47  ;;  %v1831_v55 = vmul.f32 %v3797_v46, %v3797_v46 }
 0x443   : > { %v3807_v50 = vsub.f32 %v3734_v54, %v1801_v51  ;;  %1860 = vadd.xlane.f32.xlu0 %v1831_v55  ;;  %v1832_v52 = vmul.f32 %v3802_v49, %v3802_v49 }
 0x445   : > { %1862 = vadd.xlane.f32.xlu1 %v1832_v52  ;;  %v1833_v56 = vmul.f32 %v3807_v50, %v3807_v50 }
 0x447   : > { %1864 = vadd.xlane.f32.xlu0 %v1833_v56 }
 0x49a   : > { %v1839_v58 = vpop.xlane.xlu1 %1838 }
 0x49b   : > { %v1868_v53 = vmul.f32 0.0078125, %v1839_v58 }
 0x49d   : > { %v1884_v59 = vadd.f32 1e-05, %v1868_v53 }
 0x49e   : > { %v1835_v60 = vpop.xlane.xlu1 %1834 }
 0x49f   : > { %3121 = vrsqrt.f32 %v1884_v59  ;;  %v1866_v26 = vmul.f32 0.0078125, %v1835_v60 }
 0x4a1   : > { %v1882_v62 = vadd.f32 1e-05, %v1866_v26 }
 0x4a2   : > { %v1841_v63 = vpop.xlane.xlu0 %1840 }
 0x4a3   : > { %3123 = vrsqrt.f32 %v1882_v62  ;;  %v1869_v54 = vmul.f32 0.0078125, %v1841_v63 }
 0x4a5   : > { %v1885_v0 = vadd.f32 1e-05, %v1869_v54 }
 0x4a6   : > { %v1837_v1 = vpop.xlane.xlu0 %1836 }
 0x4a7   : > { %3125 = vrsqrt.f32 %v1885_v0  ;;  %v1867_v28 = vmul.f32 0.0078125, %v1837_v1 }
 0x4a9   : > { %v3122_v4 = vpop.eup %3121  ;;  %v1883_v6 = vadd.f32 1e-05, %v1867_v28 }
 0x4aa   : > { %v1916_v8 = vmul.f32 %v3122_v4, %v3738_v57 }
 0x4ab   : > { %3127 = vrsqrt.f32 %v1883_v6  ;;  %v1847_v10 = vpop.xlane.xlu1 %1846 }
 0x4ac   : > { %v1938_v12 = vmul.f32 %v3816_v5, %v1916_v8  ;;  %v1872_v13 = vmul.f32 0.0078125, %v1847_v10 }
 0x4ad   : > { %v3124_v14 = vpop.eup %3123  ;;  %v1849_v16 = vpop.xlane.xlu0 %1848 }
 0x4ae   : > { %v1960_v17 = vadd.f32 %v3822_v7, %v1938_v12  ;;  %v1914_v19 = vmul.f32 %v3124_v14, %v3742_v61  ;;  %v1888_v20 = vadd.f32 1e-05, %v1872_v13  ;;  %v1873_v21 = vmul.f32 0.0078125, %v1849_v16  ;;  %v3157_v12 = vld [vmem:[%s3466_s24 + $0x30] sm:$0xff] }
 0x4af   : > { %v1843_v57 = vpop.xlane.xlu1 %1842 }
 0x4b0   : > { %v1976_v23 = vadd.f32 %v3153_v22, %v1960_v17  ;;  %v1936_v25 = vmul.f32 %v3816_v5, %v1914_v19  ;;  %3129 = vrsqrt.f32 %v1888_v20  ;;  %v1889_v27 = vadd.f32 1e-05, %v1873_v21  ;;  %v3158_v21 = vld [vmem:[%s3466_s24 + $0x38] sm:$0xff] }
 0x4b1   : > { %v3126_v30 = vpop.eup %3125  ;;  %v1870_v31 = vmul.f32 0.0078125, %v1843_v57  ;;  %v1845_v32 = vpop.xlane.xlu0 %1844 }
 0x4b2   : > { %1992 = vst [vmem:[%s3830_s30 + $0x10] sm:$0xff] %v1976_v23  ;;  %v1958_v61 = vadd.f32 %v3822_v7, %v1936_v25  ;;  %v1917_v34 = vmul.f32 %v3126_v30, %v3746_v2  ;;  %3131 = vrsqrt.f32 %v1889_v27  ;;  %v1871_v35 = vmul.f32 0.0078125, %v1845_v32  ;;  %v3155_v2 = vld [vmem:[%s3466_s24 + $0x18] sm:$0xff] }
 0x4b3   : > { %v1886_v37 = vadd.f32 1e-05, %v1870_v31  ;;  %v3159_v31 = vld [vmem:[%s3466_s24 + $0x20] sm:$0xff] }
 0x4b4   : > { %v1974_v39 = vadd.f32 %v3154_v38, %v1958_v61  ;;  %v1939_v40 = vmul.f32 %v3816_v5, %v1917_v34  ;;  %v1887_v41 = vadd.f32 1e-05, %v1871_v35  ;;  %v3160_v61 = vld [vmem:[%s3466_s24 + $0x28] sm:$0xff] }
 0x4b5   : > { %v3128_v43 = vpop.eup %3127  ;;  %3133 = vrsqrt.f32 %v1886_v37 }
 0x4b6   : > { %1990 = vst [vmem:[%s3830_s30] sm:$0xff] %v1974_v39  ;;  %v1961_v44 = vadd.f32 %v3822_v7, %v1939_v40  ;;  %v1915_v45 = vmul.f32 %v3128_v43, %v3748_v3  ;;  %3135 = vrsqrt.f32 %v1887_v41  ;;  %v3156_v3 = vld [vmem:[%s3466_s24 + $0x8] sm:$0xff] }
 0x4b8   : > { %v1977_v47 = vadd.f32 %v3155_v2, %v1961_v44  ;;  %v1937_v48 = vmul.f32 %v3816_v5, %v1915_v45 }
 0x4ba   : > { %v3130_v51 = vpop.eup %3129  ;;  %1993 = vst [vmem:[%s3830_s30 + $0x18] sm:$0xff] %v1977_v47  ;;  %v2614_v55 = vpack.c.bf16 %v1977_v47, %v1976_v23  ;;  %v1959_v52 = vadd.f32 %v3822_v7, %v1937_v48 }
 0x4bb   : > { %v1920_v56 = vmul.f32 %v3130_v51, %v3754_v9 }
 0x4bc   : > { %v3132_v58 = vpop.eup %3131  ;;  %2646 = vst [vmem:[%s3846_s22 + $0x8] sm:$0xff] %v2614_v55   ;;  %v1975_v53 = vadd.f32 %v3156_v3, %v1959_v52  ;;  %v1855_v59 = vpop.xlane.xlu1 %1854 }
 0x4bd   : > { %v1942_v60 = vmul.f32 %v3816_v5, %v1920_v56  ;;  %v1921_v26 = vmul.f32 %v3132_v58, %v3756_v11  ;;  %v1876_v62 = vmul.f32 0.0078125, %v1855_v59  ;;  %v3161_v56 = vld [vmem:[%s3466_s24 + $0x50] sm:$0xff] }
 0x4be   : > { %1991 = vst [vmem:[%s3830_s30 + $0x8] sm:$0xff] %v1975_v53  ;;  %v2609_v63 = vpack.c.bf16 %v1975_v53, %v1974_v39  ;;  %v1857_v54 = vpop.xlane.xlu0 %1856 }
 0x4bf   : > { %v3134_v0 = vpop.eup %3133  ;;  %v1964_v9 = vadd.f32 %v3822_v7, %v1942_v60  ;;  %v1943_v1 = vmul.f32 %v3816_v5, %v1921_v26  ;;  %v1892_v28 = vadd.f32 1e-05, %v1876_v62  ;;  %v1877_v4 = vmul.f32 0.0078125, %v1857_v54 }
 0x4c0   : > { %v3136_v6 = vpop.eup %3135  ;;  %2610 = vst [vmem:[%s3846_s22] sm:$0xff] %v2609_v63   ;;  %v1918_v8 = vmul.f32 %v3134_v0, %v3760_v15  ;;  %v1851_v10 = vpop.xlane.xlu1 %1850  ;;  %v3162_v63 = vld [vmem:[%s3466_s24 + $0x58] sm:$0xff] }
 0x4c1   : > { %v1980_v11 = vadd.f32 %v3157_v12, %v1964_v9  ;;  %v1965_v13 = vadd.f32 %v3822_v7, %v1943_v1  ;;  %v1919_v14 = vmul.f32 %v3136_v6, %v3764_v18  ;;  %3137 = vrsqrt.f32 %v1892_v28 }
 0x4c2   : > { %v1940_v16 = vmul.f32 %v3816_v5, %v1918_v8  ;;  %v1893_v17 = vadd.f32 1e-05, %v1877_v4  ;;  %v1874_v19 = vmul.f32 0.0078125, %v1851_v10  ;;  %v1853_v20 = vpop.xlane.xlu0 %1852  ;;  %v3163_v4 = vld [vmem:[%s3466_s24 + $0x40] sm:$0xff]  ;;  %v3164_v10 = vld [vmem:[%s3466_s24 + $0x48] sm:$0xff] }
 0x4c3   : > { %1996 = vst [vmem:[%s3830_s30 + $0x30] sm:$0xff] %v1980_v11  ;;  %v1981_v15 = vadd.f32 %v3158_v21, %v1965_v13  ;;  %v1941_v57 = vmul.f32 %v3816_v5, %v1919_v14  ;;  %v1875_v22 = vmul.f32 0.0078125, %v1853_v20 }
 0x4c4   : > { %v1962_v23 = vadd.f32 %v3822_v7, %v1940_v16  ;;  %3139 = vrsqrt.f32 %v1893_v17  ;;  %v1890_v18 = vadd.f32 1e-05, %v1874_v19 }
 0x4c5   : > { %1997 = vst [vmem:[%s3830_s30 + $0x38] sm:$0xff] %v1981_v15  ;;  %v2624_v25 = vpack.c.bf16 %v1981_v15, %v1980_v11  ;;  %v1963_v27 = vadd.f32 %v3822_v7, %v1941_v57  ;;  %v1891_v30 = vadd.f32 1e-05, %v1875_v22 }
 0x4c6   : > { %v1978_v32 = vadd.f32 %v3159_v31, %v1962_v23  ;;  %3141 = vrsqrt.f32 %v1890_v18  ;;  %v3165_v23 = vld [vmem:[%s3466_s24 + $0x60] sm:$0xff] }
 0x4c7   : > { %2648 = vst [vmem:[%s3846_s22 + $0x18] sm:$0xff] %v2624_v25   ;;  %v1979_v34 = vadd.f32 %v3160_v61, %v1963_v27  ;;  %3143 = vrsqrt.f32 %v1891_v30  ;;  %v3166_v27 = vld [vmem:[%s3466_s24 + $0x68] sm:$0xff] }
 0x4c8   : > { %1994 = vst [vmem:[%s3830_s30 + $0x20] sm:$0xff] %v1978_v32 }
 0x4c9   : > { %1995 = vst [vmem:[%s3830_s30 + $0x28] sm:$0xff] %v1979_v34  ;;  %v2619_v35 = vpack.c.bf16 %v1979_v34, %v1978_v32  ;;  %v3167_v34 = vld [vmem:[%s3466_s24 + $0x70] sm:$0xff] }
 0x4cb   : > { %v3138_v37 = vpop.eup %3137  ;;  %2647 = vst [vmem:[%s3846_s22 + $0x10] sm:$0xff] %v2619_v35  }
 0x4cc   : > { %v1924_v38 = vmul.f32 %v3138_v37, %v3771_v24 }
 0x4ce   : > { %v3140_v39 = vpop.eup %3139  ;;  %v1946_v40 = vmul.f32 %v3816_v5, %v1924_v38  ;;  %v1859_v41 = vpop.xlane.xlu1 %1858 }
 0x4cf   : > { %v1925_v43 = vmul.f32 %v3140_v39, %v3774_v29  ;;  %v1878_v44 = vmul.f32 0.0078125, %v1859_v41 }
 0x4d0   : > { %v3142_v45 = vpop.eup %3141  ;;  %v1968_v2 = vadd.f32 %v3822_v7, %v1946_v40  ;;  %v1861_v47 = vpop.xlane.xlu0 %1860 }
 0x4d1   : > { %v3144_v48 = vpop.eup %3143  ;;  %v1947_v51 = vmul.f32 %v3816_v5, %v1925_v43  ;;  %v1922_v55 = vmul.f32 %v3142_v45, %v3779_v33  ;;  %v1894_v52 = vadd.f32 1e-05, %v1878_v44  ;;  %v1879_v24 = vmul.f32 0.0078125, %v1861_v47 }
 0x4d2   : > { %v1984_v58 = vadd.f32 %v3161_v56, %v1968_v2  ;;  %v1923_v3 = vmul.f32 %v3144_v48, %v3784_v36  ;;  %v1863_v53 = vpop.xlane.xlu1 %1862 }
 0x4d3   : > { %v1969_v29 = vadd.f32 %v3822_v7, %v1947_v51  ;;  %v1944_v59 = vmul.f32 %v3816_v5, %v1922_v55  ;;  %3145 = vrsqrt.f32 %v1894_v52  ;;  %v1895_v60 = vadd.f32 1e-05, %v1879_v24 }
 0x4d4   : > { %2000 = vst [vmem:[%s3830_s30 + $0x50] sm:$0xff] %v1984_v58  ;;  %v1945_v26 = vmul.f32 %v3816_v5, %v1923_v3  ;;  %v1880_v33 = vmul.f32 0.0078125, %v1863_v53  ;;  %v1865_v62 = vpop.xlane.xlu0 %1864 }
 0x4d5   : > { %v1985_v54 = vadd.f32 %v3162_v63, %v1969_v29  ;;  %v1966_v36 = vadd.f32 %v3822_v7, %v1944_v59  ;;  %3147 = vrsqrt.f32 %v1895_v60  ;;  %v1881_v0 = vmul.f32 0.0078125, %v1865_v62 }
 0x4d6   : > { %v1967_v9 = vadd.f32 %v3822_v7, %v1945_v26  ;;  %v1896_v1 = vadd.f32 1e-05, %v1880_v33 }
 0x4d7   : > { %2001 = vst [vmem:[%s3830_s30 + $0x58] sm:$0xff] %v1985_v54  ;;  %v2634_v28 = vpack.c.bf16 %v1985_v54, %v1984_v58  ;;  %v1982_v6 = vadd.f32 %v3163_v4, %v1966_v36  ;;  %v1897_v8 = vadd.f32 1e-05, %v1881_v0 }
 0x4d8   : > { %v1983_v12 = vadd.f32 %v3164_v10, %v1967_v9  ;;  %3149 = vrsqrt.f32 %v1896_v1 }
 0x4d9   : > { %2650 = vst [vmem:[%s3846_s22 + $0x28] sm:$0xff] %v2634_v28   ;;  %1998 = vst [vmem:[%s3830_s30 + $0x40] sm:$0xff] %v1982_v6  ;;  %3151 = vrsqrt.f32 %v1897_v8 }
 0x4da   : > { %1999 = vst [vmem:[%s3830_s30 + $0x48] sm:$0xff] %v1983_v12  ;;  %v2629_v11 = vpack.c.bf16 %v1983_v12, %v1982_v6 }
 0x4dc   : > { %2649 = vst [vmem:[%s3846_s22 + $0x20] sm:$0xff] %v2629_v11  }
 0x4dd   : > { %v3146_v13 = vpop.eup %3145 }
 0x4de   : > { %v1926_v14 = vmul.f32 %v3146_v13, %v3794_v42 }
 0x4df   : > { %v3148_v16 = vpop.eup %3147 }
 0x4e0   : > { %v1948_v17 = vmul.f32 %v3816_v5, %v1926_v14  ;;  %v1927_v19 = vmul.f32 %v3148_v16, %v3797_v46 }
 0x4e2   : > { %v3150_v20 = vpop.eup %3149  ;;  %v1970_v21 = vadd.f32 %v3822_v7, %v1948_v17  ;;  %v1949_v15 = vmul.f32 %v3816_v5, %v1927_v19 }
 0x4e3   : > { %v3152_v57 = vpop.eup %3151  ;;  %v1928_v22 = vmul.f32 %v3150_v20, %v3802_v49 }
 0x4e4   : > { %v1986_v18 = vadd.f32 %v3165_v23, %v1970_v21  ;;  %v1971_v42 = vadd.f32 %v3822_v7, %v1949_v15  ;;  %v1929_v25 = vmul.f32 %v3152_v57, %v3807_v50  ;;  %v3168_v50 = vld [vmem:[%s3466_s24 + $0x78] sm:$0xff] }
 0x4e5   : > { %v1950_v46 = vmul.f32 %v3816_v5, %v1928_v22 }
 0x4e6   : > { %2002 = vst [vmem:[%s3830_s30 + $0x60] sm:$0xff] %v1986_v18  ;;  %v1987_v30 = vadd.f32 %v3166_v27, %v1971_v42  ;;  %v1951_v31 = vmul.f32 %v3816_v5, %v1929_v25 }
 0x4e7   : > { %v1972_v49 = vadd.f32 %v3822_v7, %v1950_v46 }
 0x4e8   : > { %2003 = vst [vmem:[%s3830_s30 + $0x68] sm:$0xff] %v1987_v30  ;;  %v2639_v32 = vpack.c.bf16 %v1987_v30, %v1986_v18  ;;  %v1973_v61 = vadd.f32 %v3822_v7, %v1951_v31  ;;  %2097 = sbr.rel (!%p3410_p5) target bundleno = 1292 (0x50c), region = 72 }
 0x4e9   : > { %v1988_v35 = vadd.f32 %v3167_v34, %v1972_v49 }
 0x4ea   : > { %2651 = vst [vmem:[%s3846_s22 + $0x30] sm:$0xff] %v2639_v32   ;;  %v1989_v37 = vadd.f32 %v3168_v50, %v1973_v61 }
 0x4eb   : > { %2004 = vst [vmem:[%s3830_s30 + $0x70] sm:$0xff] %v1988_v35 }
 0x4ec   : > { %2005 = vst [vmem:[%s3830_s30 + $0x78] sm:$0xff] %v1989_v37  ;;  %v2644_v38 = vpack.c.bf16 %v1989_v37, %v1988_v35 }
 0x4ee   : > { %2652 = vst [vmem:[%s3846_s22 + $0x38] sm:$0xff] %v2644_v38  }
 0x4ef   : > { %s4113_s23 = smov (!%p2100_p11, %s2099_s23), 16 }
 0x4f0   : > { %s3921_s14 = sshll.u32 %s4113_s23, 7 }
 0x4f1   : > { %s2104_s17 = ssub.s32 2048, %s3921_s14 }
 0x4f2   : > { %2105 = vsyncadd %s4089_s21, %s2104_s17  ;;  %p2566_p12 = scmp.ne.s32.totalorder %s3921_s14, 0  ;;  %s2602_s24 = sshll.u32 %s3393_s29, 11 }
 0x4f3   : > { %s3931_s0 = scalar_lea.hbm %s4084_s12, %s2602_s24  ;;  %s2110_s1 = sshll.u32 %s3830_s30, 4  ;;  %s3934_s1 = int_to_ptr.vmem [resolvable:$true] %s2110_s1 }
 0x4f4   : > { %s3169_s23 = scalar_lea.vmem %s3934_s1, %s3921_s14  ;;  %s3299_s17 = smov [#allocation2]  }
 0x4f5   : > { %p3170_p13 = scmp.ne.s32.totalorder %s3934_s1, %s3169_s23  ;;  %s3173_s21 = sshll.u32 %s3299_s17, 4  ;;  %s3174_s21 = int_to_ptr.vmem [resolvable:$false] %s3173_s21 }
 0x4f6   : > { %s3175_s2 = scalar_lea.vmem %s3174_s21, 4096  ;;  %p3176_p2 = scmp.lt.s32.totalorder %s3934_s1, %s3174_s21 }
 0x4f7   : > { %p3171_p0 = pnand %p3170_p13, %p2566_p12  ;;  %p3177_p3 = scmp.lt.s32.totalorder %s3175_s2, %s3169_s23 }
 0x4f9   : > { %p3172_p1 = pneg %p3171_p0  ;;  %p3178_p4 = por %p3177_p3, %p3176_p2 }
 0x4fb   : > { %p3179_p7 = pnand %p3178_p4, %p3172_p1 }
 0x4fd   : > { %3182 = shalt.err (!%p3179_p7)
}
 0x4fe   : > { %s3183_s30 = scalar_lea.hbm %s3931_s0, %s3921_s14  ;;  %s3187_s27 = scalar_lea.hbm %s4084_s12, 2560 }
 0x4ff   : > { %p3184_p8 = scmp.ne.s32.totalorder %s3931_s0, %s3183_s30  ;;  %p3188_p11 = scmp.lt.u32.totalorder %s3931_s0, %s4084_s12 }
 0x500   : > { %p3189_p13 = scmp.lt.u32.totalorder %s3187_s27, %s3183_s30  ;;  %p3191_p1 = scmp.lt.u32.totalorder %s3183_s30, %s3931_s0 }
 0x501   : > { %p3185_p9 = pnand %p3184_p8, %p2566_p12 }
 0x502   : > { %p3190_p0 = por %p3189_p13, %p3188_p11 }
 0x503   : > { %p3186_p10 = pneg %p3185_p9 }
 0x504   : > { %p3192_p2 = por %p3191_p1, %p3190_p0 }
 0x506   : > { %p3193_p3 = pnand %p3192_p2, %p3186_p10 }
 0x508   : > { %3196 = shalt.err (!%p3193_p3)
}
 0x509   : > { %s3300_s23 = smov 128   ;;  %s3301_s17 = smov 8  }
 0x50a   : > { %s4103_s24 = scalar_lea.sflag [#allocation3], %s3789_s16 }
 0x50b   : > { %2116 = dma.vmem_to_hbm [thread:$0]  (%p2566_p12), %s3934_s1, %s3921_s14, %s3931_s0, %s4103_s24, %s3300_s23, %s3300_s23, %s3301_s17  }
 0x50c PF: > { %2119 = sbr.rel (!%p3410_p5) target bundleno = 1358 (0x54e), region = 76  ;;  %s2121_s30 = ssub.s32 (%p3410_p5), 20, %s3421_s20 }
 0x50d   : > { %s2603_s15 = sshll.u32 (%p3410_p5), %s3393_s29, 6  ;;  %p2122_p4 = scmp.lt.s32.totalorder (%p3410_p5), %s2121_s30, 16 }
 0x50e   : > { %s3969_s2 = scalar_lea.vmem (%p3410_p5), %s4085_s13, %s2603_s15  }
 0x513   : > { %s4115_s30 = smov (!%p2122_p4, %s2121_s30), 16 }
 0x514   : > { %s2571_s3 = sshll.u32 %s4115_s30, 6 }
 0x515   : > { %p2574_p7 = scmp.eq.s32.totalorder %s2571_s3, 0 }
 0x516   : > { %s3975_s0 = sshrl.u32 (!%p2574_p7), %s4115_s30, 4 }
 0x517   : > { %2130 = sbr.rel (%p2574_p7) target bundleno = 1358 (0x54e), region = 80  ;;  %p2575_p5 = scmp.le.s32.totalorder (!%p2574_p7), %s3975_s0, 0 }
 0x51e   : > { %2378 = sbr.rel (%p2575_p5) target bundleno = 1337 (0x539), region = 171  ;;  %s4104_s1 = smov (!%p2575_p5), %s3969_s2 }
 0x51f   : > { %s4105_s29 = smov (!%p2575_p5), %s3846_s22  ;;  %s3984_s18 = smov (!%p2575_p5), 0  }
 0x520   : > { %s3986_s20 = smov (!%p2575_p5), 0  }
 0x525 LB: >> { %v2146_v5 = vld [vmem:[%s3271_s29] sm:$0xf]  ;;  %v2148_v7 = vld [vmem:[%s3271_s29 + $0x4] sm:$0xf]  ;;  %v2150_v39 = vld [vmem:[%s3271_s29 + $0x8] sm:$0xf]  ;;  %s3279_s20 = sphi %s3986_s20, %s2140_s20   ;;  %s3275_s18 = sphi %s3984_s18, %s4106_s18   ;;  %s3271_s29 = sphi %s4105_s29, %s2183_s29   ;;  %s3267_s1 = sphi %s4104_s1, %s2184_s1  }
 0x526   : >> { %2147 = vst [vmem:[%s3267_s1] sm:$0xf] %v2146_v5  ;;  %2149 = vst [vmem:[%s3267_s1 + $0x4] sm:$0xf] %v2148_v7  ;;  %v2152_v40 = vld [vmem:[%s3271_s29 + $0xc] sm:$0xf]  ;;  %s2178_s3 = sadd.s32 1, %s3275_s18 }
 0x527   : >> { %2151 = vst [vmem:[%s3267_s1 + $0x8] sm:$0xf] %v2150_v39  ;;  %v2154_v41 = vld [vmem:[%s3271_s29 + $0x10] sm:$0xf]  ;;  %v2156_v43 = vld [vmem:[%s3271_s29 + $0x14] sm:$0xf]  ;;  %p2179_p12 = scmp.ge.s32.totalorder %s2178_s3, %s3975_s0 }
 0x528   : >> { %2153 = vst [vmem:[%s3267_s1 + $0xc] sm:$0xf] %v2152_v40  ;;  %2155 = vst [vmem:[%s3267_s1 + $0x10] sm:$0xf] %v2154_v41  ;;  %v2158_v44 = vld [vmem:[%s3271_s29 + $0x18] sm:$0xf] }
 0x529   : >> { %2157 = vst [vmem:[%s3267_s1 + $0x14] sm:$0xf] %v2156_v43  ;;  %v2160_v45 = vld [vmem:[%s3271_s29 + $0x1c] sm:$0xf]  ;;  %v2162_v2 = vld [vmem:[%s3271_s29 + $0x20] sm:$0xf] }
 0x52a   : >> { %2159 = vst [vmem:[%s3267_s1 + $0x18] sm:$0xf] %v2158_v44  ;;  %2161 = vst [vmem:[%s3267_s1 + $0x1c] sm:$0xf] %v2160_v45  ;;  %v2164_v47 = vld [vmem:[%s3271_s29 + $0x24] sm:$0xf] }
 0x52b   : >> { %2163 = vst [vmem:[%s3267_s1 + $0x20] sm:$0xf] %v2162_v2  ;;  %v2166_v48 = vld [vmem:[%s3271_s29 + $0x28] sm:$0xf]  ;;  %v2168_v51 = vld [vmem:[%s3271_s29 + $0x2c] sm:$0xf] }
 0x52c   : >> { %2165 = vst [vmem:[%s3267_s1 + $0x24] sm:$0xf] %v2164_v47  ;;  %2167 = vst [vmem:[%s3267_s1 + $0x28] sm:$0xf] %v2166_v48  ;;  %v2170_v55 = vld [vmem:[%s3271_s29 + $0x30] sm:$0xf] }
 0x52d   : >> { %2169 = vst [vmem:[%s3267_s1 + $0x2c] sm:$0xf] %v2168_v51  ;;  %v2172_v52 = vld [vmem:[%s3271_s29 + $0x34] sm:$0xf]  ;;  %v2174_v24 = vld [vmem:[%s3271_s29 + $0x38] sm:$0xf] }
 0x52e   : >> { %2171 = vst [vmem:[%s3267_s1 + $0x30] sm:$0xf] %v2170_v55  ;;  %2173 = vst [vmem:[%s3267_s1 + $0x34] sm:$0xf] %v2172_v52  ;;  %v2176_v56 = vld [vmem:[%s3271_s29 + $0x3c] sm:$0xf] }
 0x52f   : >> { %2175 = vst [vmem:[%s3267_s1 + $0x38] sm:$0xf] %v2174_v24  ;;  %2177 = vst [vmem:[%s3267_s1 + $0x3c] sm:$0xf] %v2176_v56  ;;  %s4117_s3 = smov (%p2179_p12, %s2178_s3), 0  ;;  %s2140_s20 = sadd.s32 1, %s3279_s20  }
 0x530   : >> { %s2576_s16 = sshll.u32 %s4117_s3, 6  ;;  %p2139_p8 = scmp.ge.s32.totalorder %s2140_s20, %s3975_s0 }
 0x531   : >> { %s2183_s29 = scalar_lea.vmem %s3846_s22, %s2576_s16 [#allocation4]   ;;  %s2184_s1 = scalar_lea.vmem %s3969_s2, %s2576_s16  }
 0x532   : >> { %s4106_s18 = smov %s4117_s3  ;;  %2142 = sbr.rel (!%p2139_p8) target bundleno = 1317 (0x525), region = 177 }
 0x539 PF: > { %s4047_s14 = sand.u32 15, %s4115_s30   ;;  %s2604_s23 = sshll.u32 %s3975_s0, 6 }
 0x53a   : > { %s2189_s17 = scalar_lea.vmem %s3846_s22, %s2604_s23 [#allocation4]   ;;  %s2191_s24 = scalar_lea.vmem %s3969_s2, %s2604_s23  }
 0x53b   : > { %p2581_p9 = scmp.le.s32.totalorder %s4047_s14, 0 }
 0x53c   : > { %s3281_s15 = smov (!%p2581_p9), %s2191_s24   ;;  %s3285_s27 = smov (!%p2581_p9), %s2189_s17  }
 0x53d   : > { %2392 = sbr.rel (%p2581_p9) target bundleno = 1358 (0x54e), region = 182  ;;  %s3289_s21 = smov (!%p2581_p9), 0  }
 0x53e   : > { %s3293_s3 = smov (!%p2581_p9), 0  }
 0x544 LB: >> { %v2201_v58 = vld [vmem:[%s3287_s27] sm:$0xf]  ;;  %s2203_s30 = sadd.s32 1, %s3291_s21  ;;  %s2195_s3 = sadd.s32 1, %s3295_s3   ;;  %s3295_s3 = sphi %s3293_s3, %s2195_s3   ;;  %s3291_s21 = sphi %s3289_s21, %s3290_s21   ;;  %s3287_s27 = sphi %s3285_s27, %s2208_s27   ;;  %s3283_s15 = sphi %s3281_s15, %s2209_s15  }
 0x545   : >> { %2202 = vst [vmem:[%s3283_s15] sm:$0xf] %v2201_v58  ;;  %p2204_p10 = scmp.ge.s32.totalorder %s2203_s30, %s4047_s14  ;;  %p2194_p11 = scmp.ge.s32.totalorder %s2195_s3, %s4047_s14 }
 0x547   : >> { %s4119_s30 = smov (%p2204_p10, %s2203_s30), 0  ;;  %2197 = sbr.rel (!%p2194_p11) target bundleno = 1348 (0x544), region = 188 }
 0x548   : >> { %s2582_s22 = sshll.u32 %s4119_s30, 2  ;;  %s3290_s21 = smov %s4119_s30  }
 0x549   : >> { %s2208_s27 = scalar_lea.vmem %s2189_s17, %s2582_s22 [#allocation4]   ;;  %s2209_s15 = scalar_lea.vmem %s2191_s24, %s2582_s22  }
 0x54e PF: > { %p2860_p13 = scmp.ge.s32.totalorder %s3263_s28, 2  ;;  %s2296_s2 = sand.u32 1, %s3251_s25  }
 0x54f   : > { %s2297_s0 = scalar_lea.sflag [#allocation3], %s2296_s2 }
 0x550   : > { %p2857_p0 = pnand %p2860_p13, %p3414_p6 }
 0x552   : > { %3246 = dma.done.wait (!%p2857_p0), %s2297_s0, 2048  }
 0x553   : > { %3248 = vsyncadd (!%p2857_p0), %s2297_s0, 4294965248  ;;  %s4107_s28 = sld [smem:[#allocation7_spill]]  ;;  %s4108_s1 = sld [smem:[#allocation6_spill]] }
 0x554   : > { %s4109_s27 = sld [smem:[#allocation8_spill]]  ;;  %s4110_s25 = smov %s3255_s26 }
 0x559   : > { %p24_p1 = scmp.ge.s32.totalorder %s4107_s28, 4   ;;  %s4111_s26 = smov %s4108_s1 }
 0x55b   :  { %26 = sbr.rel (!%p24_p1) target bundleno = 8 (0x8), region = 199 }
 0x562   :  { %2309 = vsyncpa [#allocation3], 1 }
 0x563   :  { %2311 = vsyncpa [#allocation3 + $0x1], 1 }

</bundles_post_ra>
